<compile_context>
chip_gen: v7x
topology: tpu7x:2x2x1
jax: 0.10.0
libtpu: 0.0.40
codegen_flags: <defaults>
</compile_context>

<pallas_src>
import functools

import jax
import jax.numpy as jnp
from jax.experimental import pallas as pl
from jax.experimental.pallas import tpu as pltpu

BN_EPS = 1e-5

# Consolidated-parameter-vector layout: [gamma0..gamma4 | beta0..beta4 | pred_bias]
_BN_WIDTHS = (1024, 512, 512, 512, 512)
_G_OFFS = []
_off = 0
for _w in _BN_WIDTHS:
    _G_OFFS.append(_off)
    _off += _w
_B_OFFS = []
for _w in _BN_WIDTHS:
    _B_OFFS.append(_off)
    _off += _w
_BP_OFF = _off  # == 6144 (multiple of 128, lane-aligned)


def _lin_bn_glu(x_bf16, w_ref, gamma, beta):
    """bf16 Linear (f32 accum) -> BatchNorm1d (batch stats, folded) -> GLU(dim=1)."""
    y = jnp.dot(x_bf16, w_ref[...], preferred_element_type=jnp.float32)
    # One-pass batch statistics (biased variance, torch training-mode BN).
    mean = jnp.mean(y, axis=0, keepdims=True)
    mean_sq = jnp.mean(y * y, axis=0, keepdims=True)
    var = jnp.maximum(mean_sq - mean * mean, 0.0)   # guard against cancellation
    # Fold BN into a single scale + shift.
    s = gamma * jax.lax.rsqrt(var + BN_EPS)
    t = beta - mean * s
    y = y * s + t
    h = y.shape[1] // 2
    return y[:, :h] * jax.nn.sigmoid(y[:, h:])


def ceblock_kernel(x_ref, w0, w1, w2, w3, w4, wp, pvec_ref, o_ref):
    x = x_ref[...].astype(jnp.bfloat16)              # cast inside the kernel
    weights = (w0, w1, w2, w3, w4)
    for i in range(5):
        wdt = _BN_WIDTHS[i]
        gamma = pvec_ref[:, _G_OFFS[i]:_G_OFFS[i] + wdt]   # static, 128-aligned slices
        beta = pvec_ref[:, _B_OFFS[i]:_B_OFFS[i] + wdt]
        x = _lin_bn_glu(x, weights[i], gamma, beta).astype(jnp.bfloat16)
    # Prediction head: 256 -> num_coeff (bias kept; no BN after it).
    bp = pvec_ref[:, _BP_OFF:]
    o_ref[...] = (jnp.dot(x, wp[...], preferred_element_type=jnp.float32)
                  + bp).astype(o_ref.dtype)


def make_params(key, num_coeff):
    """Deterministic synthetic parameters matching ceblock.__init__ shapes (f32)."""
    dims = [(1024, 1024), (512, 512), (256, 512), (256, 512), (256, 512)]
    params = []
    for i, (fin, fout) in enumerate(dims):
        kw, kb, kg, kbeta = jax.random.split(jax.random.fold_in(key, i), 4)
        w = jax.random.normal(kw, (fin, fout), jnp.float32) * 0.02   # already (in, out)
        b = jax.random.normal(kb, (1, fout), jnp.float32) * 0.02
        gamma = 1.0 + 0.1 * jax.random.normal(kg, (1, fout), jnp.float32)
        beta = 0.1 * jax.random.normal(kbeta, (1, fout), jnp.float32)
        params += [w, b, gamma, beta]
    kw, kb = jax.random.split(jax.random.fold_in(key, 99), 2)
    wp = jax.random.normal(kw, (256, num_coeff), jnp.float32) * 0.02
    bp = jax.random.normal(kb, (1, num_coeff), jnp.float32) * 0.02
    params += [wp, bp]
    return params


def prepare_params(params):
    """One-time (outside jit) prep: bf16 weights, drop dead BN-layer biases,
    concatenate all tiny per-channel params into one f32 vector."""
    ws, gammas, betas = [], [], []
    for i in range(5):
        w, _b, gamma, beta = params[4 * i:4 * i + 4]   # bias cancelled by BN mean-sub
        ws.append(w.astype(jnp.bfloat16))
        gammas.append(gamma)
        betas.append(beta)
    wp, bp = params[-2:]
    pvec = jnp.concatenate(gammas + betas + [bp], axis=1).astype(jnp.float32)
    return ws + [wp.astype(jnp.bfloat16), pvec]


@functools.partial(jax.jit, static_argnames=("group_size",))
def ceblock_forward(x, prepped_params, group_size=None):
    """Run ceblock.  x: (N, 1024) f32.  Rows are split into G = N // group_size
    independent batches; BatchNorm statistics are computed per group.  The
    default group_size=None means one group == the whole batch (original
    module semantics)."""
    N, F = x.shape
    assert F == 1024
    if group_size is None:
        group_size = N
    assert N % group_size == 0
    assert group_size % 8 == 0, "group rows must be sublane-aligned"
    B = group_size
    G = N // B
    w0, w1, w2, w3, w4, wp, pvec = prepped_params
    num_coeff = wp.shape[1]

    const = lambda g: (0, 0)   # weight / param blocks: fetched once, VMEM-resident
    in_specs = (
        [pl.BlockSpec((B, F), lambda g: (g, 0))]
        + [pl.BlockSpec(w.shape, const) for w in (w0, w1, w2, w3, w4, wp)]
        + [pl.BlockSpec(pvec.shape, const)]
    )
    return pl.pallas_call(
        ceblock_kernel,
        out_shape=jax.ShapeDtypeStruct((N, num_coeff), jnp.float32),
        grid_spec=pltpu.PrefetchScalarGridSpec(
            num_scalar_prefetch=0,
            grid=(G,),
            in_specs=in_specs,
            out_specs=pl.BlockSpec((B, num_coeff), lambda g: (g, 0)),
        ),
        compiler_params=pltpu.CompilerParams(
            dimension_semantics=("parallel",),      # shards groups across v7x's 2 TCs
            vmem_limit_bytes=16 * 1024 * 1024,
        ),
    )(x, *prepped_params)


def ceblock_reference_f32(x, params):
    """Pure-f32 reference with torch training-mode BN semantics (includes biases)."""
    p = list(params)
    h = x.astype(jnp.float32)
    for i in range(5):
        w, b, g, beta = p[4 * i:4 * i + 4]
        y = h @ w + b
        mean = jnp.mean(y, axis=0, keepdims=True)
        var = jnp.mean((y - mean) ** 2, axis=0, keepdims=True)
        y = (y - mean) * jax.lax.rsqrt(var + BN_EPS) * g + beta
        half = y.shape[1] // 2
        h = y[:, :half] * jax.nn.sigmoid(y[:, half:])
    wp, bp = p[-2:]
    return h @ wp + bp


def ceblock_reference_bf16(x, params):
    """Reference mirroring the kernel's numerics (bf16 matmuls, f32 accum/BN)."""
    p = list(params)
    h = x.astype(jnp.bfloat16)
    for i in range(5):
        w, b, g, beta = p[4 * i:4 * i + 4]
        y = jnp.dot(h, w.astype(jnp.bfloat16), preferred_element_type=jnp.float32) + b
        mean = jnp.mean(y, axis=0, keepdims=True)
        var = jnp.mean((y - mean) ** 2, axis=0, keepdims=True)
        y = (y - mean) * jax.lax.rsqrt(var + BN_EPS) * g + beta
        half = y.shape[1] // 2
        h = (y[:, :half] * jax.nn.sigmoid(y[:, half:])).astype(jnp.bfloat16)
    wp, bp = p[-2:]
    return jnp.dot(h, wp.astype(jnp.bfloat16), preferred_element_type=jnp.float32) + bp


if __name__ == "__main__":
    num_coeff = 128
    key = jax.random.PRNGKey(0)
    kx1, kx2, kp = jax.random.split(key, 3)
    params = make_params(kp, num_coeff)
    prepped = prepare_params(params)   # bf16 cast + dead-bias strip + param concat

    # --- Case 1: single batch (G = 1) -> exact original-module semantics -----
    B1 = 8
    x1 = jax.random.normal(kx1, (B1, 1024), jnp.float32)
    out1 = jax.block_until_ready(ceblock_forward(x1, prepped))
    assert out1.shape == (B1, num_coeff)

    ref1_bf16 = ceblock_reference_bf16(x1, params)
    assert jnp.allclose(out1, ref1_bf16, atol=2e-3, rtol=2e-3), \
        float(jnp.max(jnp.abs(out1 - ref1_bf16)))
    ref1_f32 = ceblock_reference_f32(x1, params)
    assert jnp.allclose(out1, ref1_f32, atol=3e-2, rtol=3e-2), \
        float(jnp.max(jnp.abs(out1 - ref1_f32)))

    # --- Case 2: G = 2 independent batches of 16 rows (weight DMA amortized,
    #             group axis sharded across TensorCores on v7x) --------------
    G, B2 = 2, 16
    x2 = jax.random.normal(kx2, (G * B2, 1024), jnp.float32)
    out2 = jax.block_until_ready(ceblock_forward(x2, prepped, group_size=B2))
    assert out2.shape == (G * B2, num_coeff)
    for g in range(G):
        xs = x2[g * B2:(g + 1) * B2]
        ref_g = ceblock_reference_bf16(xs, params)
        assert jnp.allclose(out2[g * B2:(g + 1) * B2], ref_g, atol=2e-3, rtol=2e-3), \
            (g, float(jnp.max(jnp.abs(out2[g * B2:(g + 1) * B2] - ref_g))))

    print("KERNEL_OK")
</pallas_src>

<mosaic_0001>
module attributes {stable_mosaic.version = 11 : i64} {
  func.func @ceblock_kernel(%arg0: i32, %arg1: memref<8x1024xf32, #tpu.memory_space<vmem>>, %arg2: memref<1024x1024xbf16, #tpu.memory_space<vmem>>, %arg3: memref<512x512xbf16, #tpu.memory_space<vmem>>, %arg4: memref<256x512xbf16, #tpu.memory_space<vmem>>, %arg5: memref<256x512xbf16, #tpu.memory_space<vmem>>, %arg6: memref<256x512xbf16, #tpu.memory_space<vmem>>, %arg7: memref<256x128xbf16, #tpu.memory_space<vmem>>, %arg8: memref<1x6272xf32, #tpu.memory_space<vmem>>, %arg9: memref<8x128xf32, #tpu.memory_space<vmem>>) attributes {dimension_semantics = [#tpu.dimension_semantics<parallel>], iteration_bounds = array<i64: 1>, scalar_prefetch = 0 : i64, scratch_operands = 0 : i64, tpu.core_type = #tpu.core_type<tc>, window_params = [{transform_indices = @transform_0, window_bounds = array<i64: 8, 1024>}, {pipeline_mode = #tpu.pipeline_mode<synchronous>, transform_indices = @transform_1, window_bounds = array<i64: 1024, 1024>}, {pipeline_mode = #tpu.pipeline_mode<synchronous>, transform_indices = @transform_2, window_bounds = array<i64: 512, 512>}, {pipeline_mode = #tpu.pipeline_mode<synchronous>, transform_indices = @transform_3, window_bounds = array<i64: 256, 512>}, {pipeline_mode = #tpu.pipeline_mode<synchronous>, transform_indices = @transform_4, window_bounds = array<i64: 256, 512>}, {pipeline_mode = #tpu.pipeline_mode<synchronous>, transform_indices = @transform_5, window_bounds = array<i64: 256, 512>}, {pipeline_mode = #tpu.pipeline_mode<synchronous>, transform_indices = @transform_6, window_bounds = array<i64: 256, 128>}, {pipeline_mode = #tpu.pipeline_mode<synchronous>, transform_indices = @transform_7, window_bounds = array<i64: 1, 6272>}, {transform_indices = @transform_8, window_bounds = array<i64: 8, 128>}]} {
    %c0 = arith.constant 0 : index
    %c0_0 = arith.constant 0 : index
    %0 = vector.load %arg1[%c0, %c0_0] : memref<8x1024xf32, #tpu.memory_space<vmem>>, vector<8x1024xf32>
    %1 = arith.truncf %0 : vector<8x1024xf32> to vector<8x1024xbf16>
    %c0_1 = arith.constant 0 : index
    %c0_2 = arith.constant 0 : index
    %2 = vector.load %arg8[%c0_1, %c0_2] : memref<1x6272xf32, #tpu.memory_space<vmem>>, vector<1x1024xf32>
    %c0_3 = arith.constant 0 : index
    %c3072 = arith.constant 3072 : index
    %3 = vector.load %arg8[%c0_3, %c3072] : memref<1x6272xf32, #tpu.memory_space<vmem>>, vector<1x1024xf32>
    %c0_4 = arith.constant 0 : index
    %c0_5 = arith.constant 0 : index
    %4 = vector.load %arg2[%c0_4, %c0_5] : memref<1024x1024xbf16, #tpu.memory_space<vmem>>, vector<1024x1024xbf16>
    %cst = arith.constant dense<0.000000e+00> : vector<8x1024xf32>
    %5 = tpu.matmul %1, %4, %cst {dimension_numbers = #tpu.dot_dimension_numbers<[1], [0], [0], [1], [0, 0, 1, 1], [], []>} : vector<8x1024xbf16>, vector<1024x1024xbf16>, vector<8x1024xf32> -> vector<8x1024xf32>
    %cst_6 = arith.constant dense<0.000000e+00> : vector<1024xf32>
    %6 = vector.multi_reduction <add>, %5, %cst_6 [0] : vector<8x1024xf32> to vector<1024xf32>
    %7 = vector.shape_cast %6 : vector<1024xf32> to vector<1x1024xf32>
    %cst_7 = arith.constant 8.000000e+00 : f32
    %8 = vector.broadcast %cst_7 : f32 to vector<1x1024xf32>
    %9 = arith.divf %7, %8 : vector<1x1024xf32>
    %10 = arith.mulf %5, %5 : vector<8x1024xf32>
    %cst_8 = arith.constant dense<0.000000e+00> : vector<1024xf32>
    %11 = vector.multi_reduction <add>, %10, %cst_8 [0] : vector<8x1024xf32> to vector<1024xf32>
    %12 = vector.shape_cast %11 : vector<1024xf32> to vector<1x1024xf32>
    %cst_9 = arith.constant 8.000000e+00 : f32
    %13 = vector.broadcast %cst_9 : f32 to vector<1x1024xf32>
    %14 = arith.divf %12, %13 : vector<1x1024xf32>
    %15 = arith.mulf %9, %9 : vector<1x1024xf32>
    %16 = arith.subf %14, %15 : vector<1x1024xf32>
    %cst_10 = arith.constant 0.000000e+00 : f32
    %17 = vector.broadcast %cst_10 : f32 to vector<1x1024xf32>
    %18 = arith.maximumf %16, %17 : vector<1x1024xf32>
    %cst_11 = arith.constant 9.99999974E-6 : f32
    %19 = vector.broadcast %cst_11 : f32 to vector<1x1024xf32>
    %20 = arith.addf %18, %19 : vector<1x1024xf32>
    %21 = math.rsqrt %20 : vector<1x1024xf32>
    %22 = arith.mulf %2, %21 : vector<1x1024xf32>
    %23 = arith.mulf %9, %22 : vector<1x1024xf32>
    %24 = arith.subf %3, %23 : vector<1x1024xf32>
    %25 = vector.broadcast %22 : vector<1x1024xf32> to vector<8x1024xf32>
    %26 = arith.mulf %5, %25 : vector<8x1024xf32>
    %27 = vector.broadcast %24 : vector<1x1024xf32> to vector<8x1024xf32>
    %28 = arith.addf %26, %27 : vector<8x1024xf32>
    %29 = vector.extract_strided_slice %28 {offsets = [0, 0], sizes = [8, 512], strides = [1, 1]} : vector<8x1024xf32> to vector<8x512xf32>
    %30 = vector.extract_strided_slice %28 {offsets = [0, 512], sizes = [8, 512], strides = [1, 1]} : vector<8x1024xf32> to vector<8x512xf32>
    %31 = arith.negf %30 : vector<8x512xf32>
    %32 = math.exp %31 : vector<8x512xf32>
    %cst_12 = arith.constant 1.000000e+00 : f32
    %33 = vector.broadcast %cst_12 : f32 to vector<8x512xf32>
    %34 = arith.addf %33, %32 : vector<8x512xf32>
    %35 = arith.divf %33, %34 : vector<8x512xf32>
    %36 = arith.mulf %29, %35 : vector<8x512xf32>
    %37 = arith.truncf %36 : vector<8x512xf32> to vector<8x512xbf16>
    %c0_13 = arith.constant 0 : index
    %c1024 = arith.constant 1024 : index
    %38 = vector.load %arg8[%c0_13, %c1024] : memref<1x6272xf32, #tpu.memory_space<vmem>>, vector<1x512xf32>
    %c0_14 = arith.constant 0 : index
    %c4096 = arith.constant 4096 : index
    %39 = vector.load %arg8[%c0_14, %c4096] : memref<1x6272xf32, #tpu.memory_space<vmem>>, vector<1x512xf32>
    %c0_15 = arith.constant 0 : index
    %c0_16 = arith.constant 0 : index
    %40 = vector.load %arg3[%c0_15, %c0_16] : memref<512x512xbf16, #tpu.memory_space<vmem>>, vector<512x512xbf16>
    %cst_17 = arith.constant dense<0.000000e+00> : vector<8x512xf32>
    %41 = tpu.matmul %37, %40, %cst_17 {dimension_numbers = #tpu.dot_dimension_numbers<[1], [0], [0], [1], [0, 0, 1, 1], [], []>} : vector<8x512xbf16>, vector<512x512xbf16>, vector<8x512xf32> -> vector<8x512xf32>
    %cst_18 = arith.constant dense<0.000000e+00> : vector<512xf32>
    %42 = vector.multi_reduction <add>, %41, %cst_18 [0] : vector<8x512xf32> to vector<512xf32>
    %43 = vector.shape_cast %42 : vector<512xf32> to vector<1x512xf32>
    %cst_19 = arith.constant 8.000000e+00 : f32
    %44 = vector.broadcast %cst_19 : f32 to vector<1x512xf32>
    %45 = arith.divf %43, %44 : vector<1x512xf32>
    %46 = arith.mulf %41, %41 : vector<8x512xf32>
    %cst_20 = arith.constant dense<0.000000e+00> : vector<512xf32>
    %47 = vector.multi_reduction <add>, %46, %cst_20 [0] : vector<8x512xf32> to vector<512xf32>
    %48 = vector.shape_cast %47 : vector<512xf32> to vector<1x512xf32>
    %cst_21 = arith.constant 8.000000e+00 : f32
    %49 = vector.broadcast %cst_21 : f32 to vector<1x512xf32>
    %50 = arith.divf %48, %49 : vector<1x512xf32>
    %51 = arith.mulf %45, %45 : vector<1x512xf32>
    %52 = arith.subf %50, %51 : vector<1x512xf32>
    %cst_22 = arith.constant 0.000000e+00 : f32
    %53 = vector.broadcast %cst_22 : f32 to vector<1x512xf32>
    %54 = arith.maximumf %52, %53 : vector<1x512xf32>
    %cst_23 = arith.constant 9.99999974E-6 : f32
    %55 = vector.broadcast %cst_23 : f32 to vector<1x512xf32>
    %56 = arith.addf %54, %55 : vector<1x512xf32>
    %57 = math.rsqrt %56 : vector<1x512xf32>
    %58 = arith.mulf %38, %57 : vector<1x512xf32>
    %59 = arith.mulf %45, %58 : vector<1x512xf32>
    %60 = arith.subf %39, %59 : vector<1x512xf32>
    %61 = vector.broadcast %58 : vector<1x512xf32> to vector<8x512xf32>
    %62 = arith.mulf %41, %61 : vector<8x512xf32>
    %63 = vector.broadcast %60 : vector<1x512xf32> to vector<8x512xf32>
    %64 = arith.addf %62, %63 : vector<8x512xf32>
    %65 = vector.extract_strided_slice %64 {offsets = [0, 0], sizes = [8, 256], strides = [1, 1]} : vector<8x512xf32> to vector<8x256xf32>
    %66 = vector.extract_strided_slice %64 {offsets = [0, 256], sizes = [8, 256], strides = [1, 1]} : vector<8x512xf32> to vector<8x256xf32>
    %67 = arith.negf %66 : vector<8x256xf32>
    %68 = math.exp %67 : vector<8x256xf32>
    %cst_24 = arith.constant 1.000000e+00 : f32
    %69 = vector.broadcast %cst_24 : f32 to vector<8x256xf32>
    %70 = arith.addf %69, %68 : vector<8x256xf32>
    %71 = arith.divf %69, %70 : vector<8x256xf32>
    %72 = arith.mulf %65, %71 : vector<8x256xf32>
    %73 = arith.truncf %72 : vector<8x256xf32> to vector<8x256xbf16>
    %c0_25 = arith.constant 0 : index
    %c1536 = arith.constant 1536 : index
    %74 = vector.load %arg8[%c0_25, %c1536] : memref<1x6272xf32, #tpu.memory_space<vmem>>, vector<1x512xf32>
    %c0_26 = arith.constant 0 : index
    %c4608 = arith.constant 4608 : index
    %75 = vector.load %arg8[%c0_26, %c4608] : memref<1x6272xf32, #tpu.memory_space<vmem>>, vector<1x512xf32>
    %c0_27 = arith.constant 0 : index
    %c0_28 = arith.constant 0 : index
    %76 = vector.load %arg4[%c0_27, %c0_28] : memref<256x512xbf16, #tpu.memory_space<vmem>>, vector<256x512xbf16>
    %cst_29 = arith.constant dense<0.000000e+00> : vector<8x512xf32>
    %77 = tpu.matmul %73, %76, %cst_29 {dimension_numbers = #tpu.dot_dimension_numbers<[1], [0], [0], [1], [0, 0, 1, 1], [], []>} : vector<8x256xbf16>, vector<256x512xbf16>, vector<8x512xf32> -> vector<8x512xf32>
    %cst_30 = arith.constant dense<0.000000e+00> : vector<512xf32>
    %78 = vector.multi_reduction <add>, %77, %cst_30 [0] : vector<8x512xf32> to vector<512xf32>
    %79 = vector.shape_cast %78 : vector<512xf32> to vector<1x512xf32>
    %cst_31 = arith.constant 8.000000e+00 : f32
    %80 = vector.broadcast %cst_31 : f32 to vector<1x512xf32>
    %81 = arith.divf %79, %80 : vector<1x512xf32>
    %82 = arith.mulf %77, %77 : vector<8x512xf32>
    %cst_32 = arith.constant dense<0.000000e+00> : vector<512xf32>
    %83 = vector.multi_reduction <add>, %82, %cst_32 [0] : vector<8x512xf32> to vector<512xf32>
    %84 = vector.shape_cast %83 : vector<512xf32> to vector<1x512xf32>
    %cst_33 = arith.constant 8.000000e+00 : f32
    %85 = vector.broadcast %cst_33 : f32 to vector<1x512xf32>
    %86 = arith.divf %84, %85 : vector<1x512xf32>
    %87 = arith.mulf %81, %81 : vector<1x512xf32>
    %88 = arith.subf %86, %87 : vector<1x512xf32>
    %cst_34 = arith.constant 0.000000e+00 : f32
    %89 = vector.broadcast %cst_34 : f32 to vector<1x512xf32>
    %90 = arith.maximumf %88, %89 : vector<1x512xf32>
    %cst_35 = arith.constant 9.99999974E-6 : f32
    %91 = vector.broadcast %cst_35 : f32 to vector<1x512xf32>
    %92 = arith.addf %90, %91 : vector<1x512xf32>
    %93 = math.rsqrt %92 : vector<1x512xf32>
    %94 = arith.mulf %74, %93 : vector<1x512xf32>
    %95 = arith.mulf %81, %94 : vector<1x512xf32>
    %96 = arith.subf %75, %95 : vector<1x512xf32>
    %97 = vector.broadcast %94 : vector<1x512xf32> to vector<8x512xf32>
    %98 = arith.mulf %77, %97 : vector<8x512xf32>
    %99 = vector.broadcast %96 : vector<1x512xf32> to vector<8x512xf32>
    %100 = arith.addf %98, %99 : vector<8x512xf32>
    %101 = vector.extract_strided_slice %100 {offsets = [0, 0], sizes = [8, 256], strides = [1, 1]} : vector<8x512xf32> to vector<8x256xf32>
    %102 = vector.extract_strided_slice %100 {offsets = [0, 256], sizes = [8, 256], strides = [1, 1]} : vector<8x512xf32> to vector<8x256xf32>
    %103 = arith.negf %102 : vector<8x256xf32>
    %104 = math.exp %103 : vector<8x256xf32>
    %cst_36 = arith.constant 1.000000e+00 : f32
    %105 = vector.broadcast %cst_36 : f32 to vector<8x256xf32>
    %106 = arith.addf %105, %104 : vector<8x256xf32>
    %107 = arith.divf %105, %106 : vector<8x256xf32>
    %108 = arith.mulf %101, %107 : vector<8x256xf32>
    %109 = arith.truncf %108 : vector<8x256xf32> to vector<8x256xbf16>
    %c0_37 = arith.constant 0 : index
    %c2048 = arith.constant 2048 : index
    %110 = vector.load %arg8[%c0_37, %c2048] : memref<1x6272xf32, #tpu.memory_space<vmem>>, vector<1x512xf32>
    %c0_38 = arith.constant 0 : index
    %c5120 = arith.constant 5120 : index
    %111 = vector.load %arg8[%c0_38, %c5120] : memref<1x6272xf32, #tpu.memory_space<vmem>>, vector<1x512xf32>
    %c0_39 = arith.constant 0 : index
    %c0_40 = arith.constant 0 : index
    %112 = vector.load %arg5[%c0_39, %c0_40] : memref<256x512xbf16, #tpu.memory_space<vmem>>, vector<256x512xbf16>
    %cst_41 = arith.constant dense<0.000000e+00> : vector<8x512xf32>
    %113 = tpu.matmul %109, %112, %cst_41 {dimension_numbers = #tpu.dot_dimension_numbers<[1], [0], [0], [1], [0, 0, 1, 1], [], []>} : vector<8x256xbf16>, vector<256x512xbf16>, vector<8x512xf32> -> vector<8x512xf32>
    %cst_42 = arith.constant dense<0.000000e+00> : vector<512xf32>
    %114 = vector.multi_reduction <add>, %113, %cst_42 [0] : vector<8x512xf32> to vector<512xf32>
    %115 = vector.shape_cast %114 : vector<512xf32> to vector<1x512xf32>
    %cst_43 = arith.constant 8.000000e+00 : f32
    %116 = vector.broadcast %cst_43 : f32 to vector<1x512xf32>
    %117 = arith.divf %115, %116 : vector<1x512xf32>
    %118 = arith.mulf %113, %113 : vector<8x512xf32>
    %cst_44 = arith.constant dense<0.000000e+00> : vector<512xf32>
    %119 = vector.multi_reduction <add>, %118, %cst_44 [0] : vector<8x512xf32> to vector<512xf32>
    %120 = vector.shape_cast %119 : vector<512xf32> to vector<1x512xf32>
    %cst_45 = arith.constant 8.000000e+00 : f32
    %121 = vector.broadcast %cst_45 : f32 to vector<1x512xf32>
    %122 = arith.divf %120, %121 : vector<1x512xf32>
    %123 = arith.mulf %117, %117 : vector<1x512xf32>
    %124 = arith.subf %122, %123 : vector<1x512xf32>
    %cst_46 = arith.constant 0.000000e+00 : f32
    %125 = vector.broadcast %cst_46 : f32 to vector<1x512xf32>
    %126 = arith.maximumf %124, %125 : vector<1x512xf32>
    %cst_47 = arith.constant 9.99999974E-6 : f32
    %127 = vector.broadcast %cst_47 : f32 to vector<1x512xf32>
    %128 = arith.addf %126, %127 : vector<1x512xf32>
    %129 = math.rsqrt %128 : vector<1x512xf32>
    %130 = arith.mulf %110, %129 : vector<1x512xf32>
    %131 = arith.mulf %117, %130 : vector<1x512xf32>
    %132 = arith.subf %111, %131 : vector<1x512xf32>
    %133 = vector.broadcast %130 : vector<1x512xf32> to vector<8x512xf32>
    %134 = arith.mulf %113, %133 : vector<8x512xf32>
    %135 = vector.broadcast %132 : vector<1x512xf32> to vector<8x512xf32>
    %136 = arith.addf %134, %135 : vector<8x512xf32>
    %137 = vector.extract_strided_slice %136 {offsets = [0, 0], sizes = [8, 256], strides = [1, 1]} : vector<8x512xf32> to vector<8x256xf32>
    %138 = vector.extract_strided_slice %136 {offsets = [0, 256], sizes = [8, 256], strides = [1, 1]} : vector<8x512xf32> to vector<8x256xf32>
    %139 = arith.negf %138 : vector<8x256xf32>
    %140 = math.exp %139 : vector<8x256xf32>
    %cst_48 = arith.constant 1.000000e+00 : f32
    %141 = vector.broadcast %cst_48 : f32 to vector<8x256xf32>
    %142 = arith.addf %141, %140 : vector<8x256xf32>
    %143 = arith.divf %141, %142 : vector<8x256xf32>
    %144 = arith.mulf %137, %143 : vector<8x256xf32>
    %145 = arith.truncf %144 : vector<8x256xf32> to vector<8x256xbf16>
    %c0_49 = arith.constant 0 : index
    %c2560 = arith.constant 2560 : index
    %146 = vector.load %arg8[%c0_49, %c2560] : memref<1x6272xf32, #tpu.memory_space<vmem>>, vector<1x512xf32>
    %c0_50 = arith.constant 0 : index
    %c5632 = arith.constant 5632 : index
    %147 = vector.load %arg8[%c0_50, %c5632] : memref<1x6272xf32, #tpu.memory_space<vmem>>, vector<1x512xf32>
    %c0_51 = arith.constant 0 : index
    %c0_52 = arith.constant 0 : index
    %148 = vector.load %arg6[%c0_51, %c0_52] : memref<256x512xbf16, #tpu.memory_space<vmem>>, vector<256x512xbf16>
    %cst_53 = arith.constant dense<0.000000e+00> : vector<8x512xf32>
    %149 = tpu.matmul %145, %148, %cst_53 {dimension_numbers = #tpu.dot_dimension_numbers<[1], [0], [0], [1], [0, 0, 1, 1], [], []>} : vector<8x256xbf16>, vector<256x512xbf16>, vector<8x512xf32> -> vector<8x512xf32>
    %cst_54 = arith.constant dense<0.000000e+00> : vector<512xf32>
    %150 = vector.multi_reduction <add>, %149, %cst_54 [0] : vector<8x512xf32> to vector<512xf32>
    %151 = vector.shape_cast %150 : vector<512xf32> to vector<1x512xf32>
    %cst_55 = arith.constant 8.000000e+00 : f32
    %152 = vector.broadcast %cst_55 : f32 to vector<1x512xf32>
    %153 = arith.divf %151, %152 : vector<1x512xf32>
    %154 = arith.mulf %149, %149 : vector<8x512xf32>
    %cst_56 = arith.constant dense<0.000000e+00> : vector<512xf32>
    %155 = vector.multi_reduction <add>, %154, %cst_56 [0] : vector<8x512xf32> to vector<512xf32>
    %156 = vector.shape_cast %155 : vector<512xf32> to vector<1x512xf32>
    %cst_57 = arith.constant 8.000000e+00 : f32
    %157 = vector.broadcast %cst_57 : f32 to vector<1x512xf32>
    %158 = arith.divf %156, %157 : vector<1x512xf32>
    %159 = arith.mulf %153, %153 : vector<1x512xf32>
    %160 = arith.subf %158, %159 : vector<1x512xf32>
    %cst_58 = arith.constant 0.000000e+00 : f32
    %161 = vector.broadcast %cst_58 : f32 to vector<1x512xf32>
    %162 = arith.maximumf %160, %161 : vector<1x512xf32>
    %cst_59 = arith.constant 9.99999974E-6 : f32
    %163 = vector.broadcast %cst_59 : f32 to vector<1x512xf32>
    %164 = arith.addf %162, %163 : vector<1x512xf32>
    %165 = math.rsqrt %164 : vector<1x512xf32>
    %166 = arith.mulf %146, %165 : vector<1x512xf32>
    %167 = arith.mulf %153, %166 : vector<1x512xf32>
    %168 = arith.subf %147, %167 : vector<1x512xf32>
    %169 = vector.broadcast %166 : vector<1x512xf32> to vector<8x512xf32>
    %170 = arith.mulf %149, %169 : vector<8x512xf32>
    %171 = vector.broadcast %168 : vector<1x512xf32> to vector<8x512xf32>
    %172 = arith.addf %170, %171 : vector<8x512xf32>
    %173 = vector.extract_strided_slice %172 {offsets = [0, 0], sizes = [8, 256], strides = [1, 1]} : vector<8x512xf32> to vector<8x256xf32>
    %174 = vector.extract_strided_slice %172 {offsets = [0, 256], sizes = [8, 256], strides = [1, 1]} : vector<8x512xf32> to vector<8x256xf32>
    %175 = arith.negf %174 : vector<8x256xf32>
    %176 = math.exp %175 : vector<8x256xf32>
    %cst_60 = arith.constant 1.000000e+00 : f32
    %177 = vector.broadcast %cst_60 : f32 to vector<8x256xf32>
    %178 = arith.addf %177, %176 : vector<8x256xf32>
    %179 = arith.divf %177, %178 : vector<8x256xf32>
    %180 = arith.mulf %173, %179 : vector<8x256xf32>
    %181 = arith.truncf %180 : vector<8x256xf32> to vector<8x256xbf16>
    %c0_61 = arith.constant 0 : index
    %c6144 = arith.constant 6144 : index
    %182 = vector.load %arg8[%c0_61, %c6144] : memref<1x6272xf32, #tpu.memory_space<vmem>>, vector<1x128xf32>
    %c0_62 = arith.constant 0 : index
    %c0_63 = arith.constant 0 : index
    %183 = vector.load %arg7[%c0_62, %c0_63] : memref<256x128xbf16, #tpu.memory_space<vmem>>, vector<256x128xbf16>
    %cst_64 = arith.constant dense<0.000000e+00> : vector<8x128xf32>
    %184 = tpu.matmul %181, %183, %cst_64 {dimension_numbers = #tpu.dot_dimension_numbers<[1], [0], [0], [1], [0, 0, 1, 1], [], []>} : vector<8x256xbf16>, vector<256x128xbf16>, vector<8x128xf32> -> vector<8x128xf32>
    %185 = vector.broadcast %182 : vector<1x128xf32> to vector<8x128xf32>
    %186 = arith.addf %184, %185 : vector<8x128xf32>
    %c0_65 = arith.constant 0 : index
    %c0_66 = arith.constant 0 : index
    %187 = vector.load %arg9[%c0_65, %c0_66] : memref<8x128xf32, #tpu.memory_space<vmem>>, vector<8x128xf32>
    tpu.vector_store %arg9[%c0_65, %c0_66], %186 {strides = array<i32>} : memref<8x128xf32, #tpu.memory_space<vmem>>, vector<8x128xf32>,
    return
  }
  func.func @transform_0(%arg0: i32) -> (i32, i32) {
    %c0_i32 = arith.constant 0 : i32
    %c0_i32_0 = arith.constant 0 : i32
    return %arg0, %c0_i32 : i32, i32
  }
  func.func @transform_1(%arg0: i32) -> (i32, i32) {
    %c0_i32 = arith.constant 0 : i32
    %c0_i32_0 = arith.constant 0 : i32
    %c0_i32_1 = arith.constant 0 : i32
    return %c0_i32, %c0_i32_0 : i32, i32
  }
  func.func @transform_2(%arg0: i32) -> (i32, i32) {
    %c0_i32 = arith.constant 0 : i32
    %c0_i32_0 = arith.constant 0 : i32
    %c0_i32_1 = arith.constant 0 : i32
    return %c0_i32, %c0_i32_0 : i32, i32
  }
  func.func @transform_3(%arg0: i32) -> (i32, i32) {
    %c0_i32 = arith.constant 0 : i32
    %c0_i32_0 = arith.constant 0 : i32
    %c0_i32_1 = arith.constant 0 : i32
    return %c0_i32, %c0_i32_0 : i32, i32
  }
  func.func @transform_4(%arg0: i32) -> (i32, i32) {
    %c0_i32 = arith.constant 0 : i32
    %c0_i32_0 = arith.constant 0 : i32
    %c0_i32_1 = arith.constant 0 : i32
    return %c0_i32, %c0_i32_0 : i32, i32
  }
  func.func @transform_5(%arg0: i32) -> (i32, i32) {
    %c0_i32 = arith.constant 0 : i32
    %c0_i32_0 = arith.constant 0 : i32
    %c0_i32_1 = arith.constant 0 : i32
    return %c0_i32, %c0_i32_0 : i32, i32
  }
  func.func @transform_6(%arg0: i32) -> (i32, i32) {
    %c0_i32 = arith.constant 0 : i32
    %c0_i32_0 = arith.constant 0 : i32
    %c0_i32_1 = arith.constant 0 : i32
    return %c0_i32, %c0_i32_0 : i32, i32
  }
  func.func @transform_7(%arg0: i32) -> (i32, i32) {
    %c0_i32 = arith.constant 0 : i32
    %c0_i32_0 = arith.constant 0 : i32
    %c0_i32_1 = arith.constant 0 : i32
    return %c0_i32, %c0_i32_0 : i32, i32
  }
  func.func @transform_8(%arg0: i32) -> (i32, i32) {
    %c0_i32 = arith.constant 0 : i32
    %c0_i32_0 = arith.constant 0 : i32
    return %arg0, %c0_i32 : i32, i32
  }
}

</mosaic_0001>

<bundles_post_ra>
// kernel: ceblock_forward.1
= control target key start
LH: loop header
LB: loop body
LE: loop exit
PB: predicated region body
PF: predicated region fallthrough
CT: control target
= control target key end

     0   :  { %13 = vsyncpa [#allocation3], 0  ;;  %s10109_s0 = inlined_call_operand.hbm [shape: f32[8,1024], index: 0, kind: input, shape index: {}]   ;;  %s10110_s1 = inlined_call_operand.hbm [shape: bf16[1024,1024], index: 1, kind: input, shape index: {}]   ;;  %s10111_s2 = inlined_call_operand.hbm [shape: bf16[512,512], index: 2, kind: input, shape index: {}]   ;;  %s10112_s3 = inlined_call_operand.hbm [shape: bf16[256,512], index: 3, kind: input, shape index: {}]   ;;  %s10113_s4 = inlined_call_operand.hbm [shape: bf16[256,512], index: 4, kind: input, shape index: {}]   ;;  %s10114_s5 = inlined_call_operand.hbm [shape: bf16[256,512], index: 5, kind: input, shape index: {}]   ;;  %s10115_s6 = inlined_call_operand.hbm [shape: bf16[256,128], index: 6, kind: input, shape index: {}]   ;;  %s10116_s7 = inlined_call_operand.hbm [shape: f32[1,6272], index: 7, kind: input, shape index: {}]   ;;  %s10117_s8 = inlined_call_operand.hbm [shape: f32[8,128], index: 8, kind: output, shape index: {}]  }
   0x1   :  { %14 = vsyncpa [#allocation6], 0 }
   0x2   :  { %15 = vsyncpa [#allocation9], 0 }
   0x3   :  { %16 = vsyncpa [#allocation12], 0 }
   0x4   :  { %17 = vsyncpa [#allocation15], 0 }
   0x5   :  { %18 = vsyncpa [#allocation4], 0  ;;  %s9429_s27 = smov [#allocation5]   ;;  %s9219_s9 = scalar_lea.hbm %s10110_s1, 65536 }
   0x6   :  { %s34_s28 = sshll.u32 %s9429_s27, 4  ;;  %p9220_p0 = scmp.ne.s32.totalorder %s10110_s1, %s9219_s9  ;;  %s35_s28 = int_to_ptr.vmem [resolvable:$true] %s34_s28 }
   0x7   :  { %p9223_p1 = scmp.lt.u32.totalorder %s9219_s9, %s10110_s1 }
   0x9   :  { %p9225_p2 = pnand %p9223_p1, %p9220_p0 }
   0xb   :  { %9228 = shalt.err (!%p9225_p2)
}
   0xc   :  { %s9229_s14 = scalar_lea.vmem %s35_s28, 65536  ;;  %p9234_p4 = scmp.lt.s32.totalorder %s35_s28, %s35_s28 }
   0xd   :  { %p9230_p3 = scmp.ne.s32.totalorder %s35_s28, %s9229_s14  ;;  %p9235_p5 = scmp.lt.s32.totalorder %s9229_s14, %s9229_s14 }
   0xf   :  { %p9236_p6 = por %p9235_p5, %p9234_p4 }
  0x11   :  { %p9237_p7 = pnand %p9236_p6, %p9230_p3 }
  0x13   :  { %9240 = shalt.err (!%p9237_p7)
}
  0x14   :  { %s9430_s15 = smov 512   ;;  %s9431_s16 = smov 32  }
  0x15   :  { %40 = dma.hbm_to_vmem [thread:$0]  %s10110_s1, 65536, %s35_s28, [#allocation6], %s9430_s15, %s9430_s15, %s9431_s16  }
  0x16   :  { %s9432_s19 = smov [#allocation8]   ;;  %s9433_s21 = smov [#allocation11]  }
  0x17   :  { %s58_s20 = sshll.u32 %s9432_s19, 4  ;;  %s82_s22 = sshll.u32 %s9433_s21, 4  ;;  %s59_s20 = int_to_ptr.vmem [resolvable:$true] %s58_s20  ;;  %s83_s22 = int_to_ptr.vmem [resolvable:$true] %s82_s22 }
  0x18   :  { %s9241_s25 = scalar_lea.hbm %s10112_s3, 8192 }
  0x19   :  { %p9242_p8 = scmp.ne.s32.totalorder %s10112_s3, %s9241_s25  ;;  %p9245_p9 = scmp.lt.u32.totalorder %s9241_s25, %s10112_s3 }
  0x1b   :  { %p9247_p10 = pnand %p9245_p9, %p9242_p8 }
  0x1d   :  { %9250 = shalt.err (!%p9247_p10)
}
  0x1e   :  { %s9251_s1 = scalar_lea.vmem %s59_s20, 8192  ;;  %p9256_p12 = scmp.lt.s32.totalorder %s59_s20, %s59_s20 }
  0x1f   :  { %p9252_p11 = scmp.ne.s32.totalorder %s59_s20, %s9251_s1  ;;  %p9257_p13 = scmp.lt.s32.totalorder %s9251_s1, %s9251_s1 }
  0x21   :  { %p9258_p0 = por %p9257_p13, %p9256_p12 }
  0x23   :  { %p9259_p1 = pnand %p9258_p0, %p9252_p11 }
  0x25   :  { %9262 = shalt.err (!%p9259_p1)
}
  0x26   :  { %s9434_s28 = smov 256   ;;  %s9435_s9 = smov 16  }
  0x27   :  { %64 = dma.hbm_to_vmem [thread:$0]  %s10112_s3, 8192, %s59_s20, [#allocation9], %s9434_s28, %s9434_s28, %s9435_s9  }
  0x28   :  { %s9263_s14 = scalar_lea.hbm %s10114_s5, 8192 }
  0x29   :  { %p9264_p2 = scmp.ne.s32.totalorder %s10114_s5, %s9263_s14  ;;  %p9267_p3 = scmp.lt.u32.totalorder %s9263_s14, %s10114_s5 }
  0x2b   :  { %p9269_p4 = pnand %p9267_p3, %p9264_p2 }
  0x2d   :  { %9272 = shalt.err (!%p9269_p4)
}
  0x2e   :  { %s9273_s19 = scalar_lea.vmem %s83_s22, 8192  ;;  %p9278_p6 = scmp.lt.s32.totalorder %s83_s22, %s83_s22 }
  0x2f   :  { %p9274_p5 = scmp.ne.s32.totalorder %s83_s22, %s9273_s19  ;;  %p9279_p7 = scmp.lt.s32.totalorder %s9273_s19, %s9273_s19 }
  0x31   :  { %p9280_p8 = por %p9279_p7, %p9278_p6 }
  0x33   :  { %p9281_p9 = pnand %p9280_p8, %p9274_p5 }
  0x35   :  { %9284 = shalt.err (!%p9281_p9)
}
  0x36   :  { %88 = dma.hbm_to_vmem [thread:$0]  %s10114_s5, 8192, %s83_s22, [#allocation12], %s9434_s28, %s9434_s28, %s9435_s9  }
  0x37   :  { %s9436_s21 = smov [#allocation2]   ;;  %s9437_s24 = smov [#allocation7]  }
  0x38   :  { %s25_s23 = sshll.u32 %s9436_s21, 4  ;;  %s46_s25 = sshll.u32 %s9437_s24, 4  ;;  %s26_s23 = int_to_ptr.vmem [resolvable:$true] %s25_s23  ;;  %s47_s25 = int_to_ptr.vmem [resolvable:$true] %s46_s25 }
  0x39   :  { %s9285_s29 = scalar_lea.hbm %s10109_s0, 1024 }
  0x3a   :  { %p9286_p10 = scmp.ne.s32.totalorder %s10109_s0, %s9285_s29  ;;  %p9289_p11 = scmp.lt.u32.totalorder %s9285_s29, %s10109_s0 }
  0x3c   :  { %p9291_p12 = pnand %p9289_p11, %p9286_p10 }
  0x3e   :  { %9294 = shalt.err (!%p9291_p12)
}
  0x3f   :  { %s9295_s5 = scalar_lea.vmem %s26_s23, 1024  ;;  %p9300_p0 = scmp.lt.s32.totalorder %s26_s23, %s26_s23 }
  0x40   :  { %p9296_p13 = scmp.ne.s32.totalorder %s26_s23, %s9295_s5  ;;  %p9301_p1 = scmp.lt.s32.totalorder %s9295_s5, %s9295_s5 }
  0x42   :  { %p9302_p2 = por %p9301_p1, %p9300_p0 }
  0x44   :  { %p9303_p3 = pnand %p9302_p2, %p9296_p13 }
  0x46   :  { %9306 = shalt.err (!%p9303_p3)
}
  0x47   :  { %28 = dma.hbm_to_vmem [thread:$0]  %s10109_s0, 1024, %s26_s23, [#allocation3]  }
  0x48   :  { %s9307_s15 = scalar_lea.hbm %s10111_s2, 16384 }
  0x49   :  { %p9308_p4 = scmp.ne.s32.totalorder %s10111_s2, %s9307_s15  ;;  %p9311_p5 = scmp.lt.u32.totalorder %s9307_s15, %s10111_s2 }
  0x4b   :  { %p9313_p6 = pnand %p9311_p5, %p9308_p4 }
  0x4d   :  { %9316 = shalt.err (!%p9313_p6)
}
  0x4e   :  { %s9317_s3 = scalar_lea.vmem %s47_s25, 16384  ;;  %p9322_p8 = scmp.lt.s32.totalorder %s47_s25, %s47_s25 }
  0x4f   :  { %p9318_p7 = scmp.ne.s32.totalorder %s47_s25, %s9317_s3  ;;  %p9323_p9 = scmp.lt.s32.totalorder %s9317_s3, %s9317_s3 }
  0x51   :  { %p9324_p10 = por %p9323_p9, %p9322_p8 }
  0x53   :  { %p9325_p11 = pnand %p9324_p10, %p9318_p7 }
  0x55   :  { %9328 = shalt.err (!%p9325_p11)
}
  0x56   :  { %52 = dma.hbm_to_vmem [thread:$0]  %s10111_s2, 16384, %s47_s25, [#allocation6], %s9434_s28, %s9434_s28, %s9435_s9  }
  0x57   :  { %s9438_s21 = smov [#allocation10]   ;;  %s9439_s24 = smov [#allocation13]  }
  0x58   :  { %s70_s23 = sshll.u32 %s9438_s21, 4  ;;  %s94_s26 = sshll.u32 %s9439_s24, 4  ;;  %s71_s23 = int_to_ptr.vmem [resolvable:$true] %s70_s23  ;;  %s95_s26 = int_to_ptr.vmem [resolvable:$true] %s94_s26 }
  0x59   :  { %s9329_s30 = scalar_lea.hbm %s10113_s4, 8192 }
  0x5a   :  { %p9330_p12 = scmp.ne.s32.totalorder %s10113_s4, %s9329_s30  ;;  %p9333_p13 = scmp.lt.u32.totalorder %s9329_s30, %s10113_s4 }
  0x5c   :  { %p9335_p0 = pnand %p9333_p13, %p9330_p12 }
  0x5e   :  { %9338 = shalt.err (!%p9335_p0)
}
  0x5f   :  { %s9339_s2 = scalar_lea.vmem %s71_s23, 8192  ;;  %p9344_p2 = scmp.lt.s32.totalorder %s71_s23, %s71_s23 }
  0x60   :  { %p9340_p1 = scmp.ne.s32.totalorder %s71_s23, %s9339_s2  ;;  %p9345_p3 = scmp.lt.s32.totalorder %s9339_s2, %s9339_s2 }
  0x62   :  { %p9346_p4 = por %p9345_p3, %p9344_p2 }
  0x64   :  { %p9347_p5 = pnand %p9346_p4, %p9340_p1 }
  0x66   :  { %9350 = shalt.err (!%p9347_p5)
}
  0x67   :  { %76 = dma.hbm_to_vmem [thread:$0]  %s10113_s4, 8192, %s71_s23, [#allocation9], %s9434_s28, %s9434_s28, %s9435_s9  }
  0x68   :  { %s9351_s14 = scalar_lea.hbm %s10115_s6, 2048 }
  0x69   :  { %p9352_p6 = scmp.ne.s32.totalorder %s10115_s6, %s9351_s14  ;;  %p9355_p7 = scmp.lt.u32.totalorder %s9351_s14, %s10115_s6 }
  0x6b   :  { %p9357_p8 = pnand %p9355_p7, %p9352_p6 }
  0x6d   :  { %9360 = shalt.err (!%p9357_p8)
}
  0x6e   :  { %s9361_s19 = scalar_lea.vmem %s95_s26, 2048  ;;  %p9366_p10 = scmp.lt.s32.totalorder %s95_s26, %s95_s26 }
  0x6f   :  { %p9362_p9 = scmp.ne.s32.totalorder %s95_s26, %s9361_s19  ;;  %p9367_p11 = scmp.lt.s32.totalorder %s9361_s19, %s9361_s19 }
  0x71   :  { %p9368_p12 = por %p9367_p11, %p9366_p10 }
  0x73   :  { %p9369_p13 = pnand %p9368_p12, %p9362_p9 }
  0x75   :  { %9372 = shalt.err (!%p9369_p13)
}
  0x76   :  { %s9440_s4 = smov 64   ;;  %s9441_s28 = smov 4  }
  0x77   :  { %100 = dma.hbm_to_vmem [thread:$0]  %s10115_s6, 2048, %s95_s26, [#allocation12], %s9440_s4, %s9440_s4, %s9441_s28  }
  0x78   :  { %s9442_s0 = smov [#allocation14]   ;;  %s9373_s24 = scalar_lea.hbm %s10116_s7, 784 }
  0x79   :  { %s107_s20 = sshll.u32 %s9442_s0, 4  ;;  %p9374_p0 = scmp.ne.s32.totalorder %s10116_s7, %s9373_s24  ;;  %s108_s20 = int_to_ptr.vmem [resolvable:$true] %s107_s20 }
  0x7a   :  { %p9377_p1 = scmp.lt.u32.totalorder %s9373_s24, %s10116_s7 }
  0x7c   :  { %p9379_p2 = pnand %p9377_p1, %p9374_p0 }
  0x7e   :  { %9382 = shalt.err (!%p9379_p2)
}
  0x7f   :  { %s9383_s10 = scalar_lea.vmem %s108_s20, 784  ;;  %s9387_s6 = scalar_lea.vmem %s108_s20, 800 }
  0x80   :  { %p9384_p3 = scmp.ne.s32.totalorder %s108_s20, %s9383_s10  ;;  %p9388_p4 = scmp.lt.s32.totalorder %s108_s20, %s108_s20 }
  0x81   :  { %p9389_p5 = scmp.lt.s32.totalorder %s9387_s6, %s9383_s10 }
  0x83   :  { %p9390_p6 = por %p9389_p5, %p9388_p4 }
  0x85   :  { %p9391_p7 = pnand %p9390_p6, %p9384_p3 }
  0x87   :  { %9394 = shalt.err (!%p9391_p7)
}
  0x88   :  { %110 = dma.hbm_to_vmem [thread:$0]  %s10116_s7, 784, %s108_s20, [#allocation15]  }
  0x89   :  { %9417 = dma.done.wait [#allocation3], 1024  }
  0x8a   :  { %9418 = vsyncadd [#allocation3], 4294966272 }
  0x8b   :  { %9419 = dma.done.wait [#allocation6], 81920  }
  0x8c   :  { %9420 = vsyncadd [#allocation6], 4294885376 }
  0x8d   :  { %9421 = dma.done.wait [#allocation9], 16384  }
  0x8e   :  { %9422 = vsyncadd [#allocation9], 4294950912 }
  0x8f   :  { %9423 = dma.done.wait [#allocation12], 10240  }
  0x90   :  { %9424 = vsyncadd [#allocation12], 4294957056 }
  0x91   :  { %9425 = dma.done.wait [#allocation15], 784  }
  0x92   :  { %9426 = vsyncadd [#allocation15], 4294966512  ;;  %v154_v0 = vld [vmem:[#allocation5] sm:$0xff]  ;;  %v155_v2 = vld [vmem:[#allocation5 + $0x8] sm:$0xff]  ;;  %s9444_s7 = smov [#allocation16]  }
  0x93   :  { %v158_v1 = vld [vmem:[#allocation5 + $0x20] sm:$0xff]  ;;  %v159_v4 = vld [vmem:[#allocation5 + $0x28] sm:$0xff]  ;;  %s7659_s5 = sshll.u32 %s9444_s7, 4  ;;  %s7660_s5 = int_to_ptr.vmem [resolvable:$true] %s7659_s5 }
  0x94   :  { %v7673_v3 = vcombine.high %v154_v0, %v158_v1  ;;  %v7672_v5 = vcombine.low %v154_v0, %v158_v1  ;;  %v162_v6 = vld [vmem:[#allocation5 + $0x40] sm:$0xff]  ;;  %v7675_v8 = vcombine.high %v155_v2, %v159_v4  ;;  %v7674_v9 = vcombine.low %v155_v2, %v159_v4  ;;  %v163_v11 = vld [vmem:[#allocation5 + $0x48] sm:$0xff]  ;;  %s9395_s2 = scalar_lea.vmem %s7660_s5, 128  ;;  %p9400_p9 = scmp.lt.s32.totalorder %s7660_s5, %s7660_s5 }
  0x95   :  { %v166_v7 = vld [vmem:[#allocation5 + $0x60] sm:$0xff]  ;;  %v167_v12 = vld [vmem:[#allocation5 + $0x68] sm:$0xff]  ;;  %p9396_p8 = scmp.ne.s32.totalorder %s7660_s5, %s9395_s2  ;;  %p9401_p10 = scmp.lt.s32.totalorder %s9395_s2, %s9395_s2 }
  0x96   :  { %v7681_v10 = vcombine.high %v162_v6, %v166_v7  ;;  %v170_v13 = vld [vmem:[#allocation5 + $0x80] sm:$0xff]  ;;  %3226 = vmatprep.subr.bf16.mxu0 %v7673_v3  ;;  %v7683_v14 = vcombine.high %v163_v11, %v167_v12  ;;  %v171_v16 = vld [vmem:[#allocation5 + $0x88] sm:$0xff]  ;;  %3390 = vmatprep.subr.bf16.mxu1 %v7675_v8  ;;  %v7680_v18 = vcombine.low %v162_v6, %v166_v7 }
  0x97   :  { %v174_v15 = vld [vmem:[#allocation5 + $0xa0] sm:$0xff]  ;;  %v175_v17 = vld [vmem:[#allocation5 + $0xa8] sm:$0xff]  ;;  %3227 = vmatpush1.bf16.msra.mxu0 %v7672_v5  ;;  %3391 = vmatpush1.bf16.msra.mxu1 %v7674_v9  ;;  %v7682_v19 = vcombine.low %v163_v11, %v167_v12  ;;  %p9402_p11 = por %p9401_p10, %p9400_p9 }
  0x98   :  { %3228 = vmatprep.subr.bf16.mxu0 %v7681_v10  ;;  %v7689_v20 = vcombine.high %v170_v13, %v174_v15  ;;  %3392 = vmatprep.subr.bf16.mxu1 %v7683_v14  ;;  %v7691_v21 = vcombine.high %v171_v16, %v175_v17  ;;  %v178_v22 = vld [vmem:[#allocation5 + $0xc0] sm:$0xff]  ;;  %v179_v24 = vld [vmem:[#allocation5 + $0xc8] sm:$0xff]  ;;  %v7688_v26 = vcombine.low %v170_v13, %v174_v15 }
  0x99   :  { %v182_v23 = vld [vmem:[#allocation5 + $0xe0] sm:$0xff]  ;;  %v183_v25 = vld [vmem:[#allocation5 + $0xe8] sm:$0xff]  ;;  %v7690_v27 = vcombine.low %v171_v16, %v175_v17  ;;  %p9403_p12 = pnand %p9402_p11, %p9396_p8 }
  0x9a   :  { %v7697_v28 = vcombine.high %v178_v22, %v182_v23  ;;  %v7699_v29 = vcombine.high %v179_v24, %v183_v25  ;;  %v186_v30 = vld [vmem:[#allocation5 + $0x100] sm:$0xff]  ;;  %v187_v32 = vld [vmem:[#allocation5 + $0x108] sm:$0xff]  ;;  %v7696_v34 = vcombine.low %v178_v22, %v182_v23  ;;  %v7698_v35 = vcombine.low %v179_v24, %v183_v25 }
  0x9b   :  { %3229 = vmatpush1.bf16.msra.mxu0 %v7680_v18  ;;  %3393 = vmatpush1.bf16.msra.mxu1 %v7682_v19  ;;  %v190_v31 = vld [vmem:[#allocation5 + $0x120] sm:$0xff]  ;;  %v191_v33 = vld [vmem:[#allocation5 + $0x128] sm:$0xff] }
  0x9c   :  { %3230 = vmatprep.subr.bf16.mxu0 %v7689_v20  ;;  %3394 = vmatprep.subr.bf16.mxu1 %v7691_v21  ;;  %v7705_v36 = vcombine.high %v186_v30, %v190_v31  ;;  %v7707_v37 = vcombine.high %v187_v32, %v191_v33  ;;  %v194_v38 = vld [vmem:[#allocation5 + $0x140] sm:$0xff]  ;;  %v195_v40 = vld [vmem:[#allocation5 + $0x148] sm:$0xff]  ;;  %v7704_v42 = vcombine.low %v186_v30, %v190_v31 }
  0x9d   :  { %v198_v39 = vld [vmem:[#allocation5 + $0x160] sm:$0xff]  ;;  %v199_v41 = vld [vmem:[#allocation5 + $0x168] sm:$0xff]  ;;  %v7706_v43 = vcombine.low %v187_v32, %v191_v33 }
  0x9e   :  { %v7713_v44 = vcombine.high %v194_v38, %v198_v39  ;;  %v7715_v45 = vcombine.high %v195_v40, %v199_v41  ;;  %v202_v46 = vld [vmem:[#allocation5 + $0x180] sm:$0xff]  ;;  %v203_v48 = vld [vmem:[#allocation5 + $0x188] sm:$0xff]  ;;  %v7712_v50 = vcombine.low %v194_v38, %v198_v39  ;;  %v7714_v51 = vcombine.low %v195_v40, %v199_v41 }
  0x9f   :  { %3231 = vmatpush1.bf16.msra.mxu0 %v7688_v26  ;;  %3395 = vmatpush1.bf16.msra.mxu1 %v7690_v27  ;;  %v206_v47 = vld [vmem:[#allocation5 + $0x1a0] sm:$0xff]  ;;  %v207_v49 = vld [vmem:[#allocation5 + $0x1a8] sm:$0xff] }
  0xa0   :  { %3232 = vmatprep.subr.bf16.mxu0 %v7697_v28  ;;  %3396 = vmatprep.subr.bf16.mxu1 %v7699_v29  ;;  %v7721_v52 = vcombine.high %v202_v46, %v206_v47  ;;  %v137_v53 = vld [vmem:[#allocation2 + $0x8] sm:$0xff]  ;;  %v7723_v54 = vcombine.high %v203_v48, %v207_v49  ;;  %v210_v55 = vld [vmem:[#allocation5 + $0x1c0] sm:$0xff]  ;;  %v7720_v60 = vcombine.low %v202_v46, %v206_v47 }
  0xa1   :  { %v214_v56 = vld [vmem:[#allocation5 + $0x1e0] sm:$0xff]  ;;  %v9598_v57 = vpack.c.bf16 %v137_v53, %v137_v53  ;;  %v211_v58 = vld [vmem:[#allocation5 + $0x1c8] sm:$0xff]  ;;  %v7722_v61 = vcombine.low %v203_v48, %v207_v49 }
  0xa2   :  { %v215_v59 = vld [vmem:[#allocation5 + $0x1e8] sm:$0xff]  ;;  %v7729_v62 = vcombine.high %v210_v55, %v214_v56  ;;  %v218_v0 = vld [vmem:[#allocation5 + $0x200] sm:$0xff]  ;;  %v7728_v4 = vcombine.low %v210_v55, %v214_v56 }
  0xa3   :  { %3233 = vmatpush1.bf16.msra.mxu0 %v7696_v34  ;;  %3397 = vmatpush1.bf16.msra.mxu1 %v7698_v35  ;;  %v7731_v63 = vcombine.high %v211_v58, %v215_v59  ;;  %v222_v1 = vld [vmem:[#allocation5 + $0x220] sm:$0xff]  ;;  %v219_v2 = vld [vmem:[#allocation5 + $0x208] sm:$0xff]  ;;  %v7730_v5 = vcombine.low %v211_v58, %v215_v59 }
  0xa4   :  { %3234 = vmatprep.subr.bf16.mxu0 %v7705_v36  ;;  %3398 = vmatprep.subr.bf16.mxu1 %v7707_v37  ;;  %v223_v3 = vld [vmem:[#allocation5 + $0x228] sm:$0xff]  ;;  %v7737_v6 = vcombine.high %v218_v0, %v222_v1  ;;  %v226_v8 = vld [vmem:[#allocation5 + $0x240] sm:$0xff]  ;;  %v7736_v12 = vcombine.low %v218_v0, %v222_v1 }
  0xa5   :  { %3258 = vmatprep.mubr.bf16.mxu0 %v9598_v57  ;;  %3422 = vmatprep.mubr.bf16.mxu1 %v9598_v57  ;;  %v7739_v7 = vcombine.high %v219_v2, %v223_v3  ;;  %v230_v9 = vld [vmem:[#allocation5 + $0x260] sm:$0xff]  ;;  %v227_v10 = vld [vmem:[#allocation5 + $0x248] sm:$0xff]  ;;  %v7738_v13 = vcombine.low %v219_v2, %v223_v3 }
  0xa6   :  { %v231_v11 = vld [vmem:[#allocation5 + $0x268] sm:$0xff]  ;;  %v7745_v14 = vcombine.high %v226_v8, %v230_v9  ;;  %v234_v16 = vld [vmem:[#allocation5 + $0x280] sm:$0xff]  ;;  %v7744_v20 = vcombine.low %v226_v8, %v230_v9 }
  0xa7   :  { %3235 = vmatpush1.bf16.msra.mxu0 %v7704_v42  ;;  %3399 = vmatpush1.bf16.msra.mxu1 %v7706_v43  ;;  %v7747_v15 = vcombine.high %v227_v10, %v231_v11  ;;  %v238_v17 = vld [vmem:[#allocation5 + $0x2a0] sm:$0xff]  ;;  %v235_v18 = vld [vmem:[#allocation5 + $0x288] sm:$0xff]  ;;  %v7746_v21 = vcombine.low %v227_v10, %v231_v11 }
  0xa8   :  { %3236 = vmatprep.subr.bf16.mxu0 %v7713_v44  ;;  %3400 = vmatprep.subr.bf16.mxu1 %v7715_v45  ;;  %v239_v19 = vld [vmem:[#allocation5 + $0x2a8] sm:$0xff]  ;;  %v7753_v22 = vcombine.high %v234_v16, %v238_v17  ;;  %v242_v24 = vld [vmem:[#allocation5 + $0x2c0] sm:$0xff]  ;;  %v7752_v28 = vcombine.low %v234_v16, %v238_v17 }
  0xa9   :  { %v7755_v23 = vcombine.high %v235_v18, %v239_v19  ;;  %v246_v25 = vld [vmem:[#allocation5 + $0x2e0] sm:$0xff]  ;;  %v243_v26 = vld [vmem:[#allocation5 + $0x2c8] sm:$0xff]  ;;  %v7754_v29 = vcombine.low %v235_v18, %v239_v19 }
  0xaa   :  { %v247_v27 = vld [vmem:[#allocation5 + $0x2e8] sm:$0xff]  ;;  %v7761_v30 = vcombine.high %v242_v24, %v246_v25  ;;  %v250_v32 = vld [vmem:[#allocation5 + $0x300] sm:$0xff]  ;;  %v7760_v36 = vcombine.low %v242_v24, %v246_v25 }
  0xab   :  { %3237 = vmatpush1.bf16.msra.mxu0 %v7712_v50  ;;  %3401 = vmatpush1.bf16.msra.mxu1 %v7714_v51  ;;  %v7763_v31 = vcombine.high %v243_v26, %v247_v27  ;;  %v254_v33 = vld [vmem:[#allocation5 + $0x320] sm:$0xff]  ;;  %v251_v34 = vld [vmem:[#allocation5 + $0x308] sm:$0xff]  ;;  %v7762_v37 = vcombine.low %v243_v26, %v247_v27 }
  0xac   :  { %3238 = vmatprep.subr.bf16.mxu0 %v7721_v52  ;;  %3402 = vmatprep.subr.bf16.mxu1 %v7723_v54  ;;  %v255_v35 = vld [vmem:[#allocation5 + $0x328] sm:$0xff]  ;;  %v7769_v38 = vcombine.high %v250_v32, %v254_v33  ;;  %v258_v40 = vld [vmem:[#allocation5 + $0x340] sm:$0xff]  ;;  %v7768_v44 = vcombine.low %v250_v32, %v254_v33 }
  0xad   :  { %v7771_v39 = vcombine.high %v251_v34, %v255_v35  ;;  %v262_v41 = vld [vmem:[#allocation5 + $0x360] sm:$0xff]  ;;  %v259_v42 = vld [vmem:[#allocation5 + $0x348] sm:$0xff]  ;;  %v7770_v45 = vcombine.low %v251_v34, %v255_v35 }
  0xae   :  { %v263_v43 = vld [vmem:[#allocation5 + $0x368] sm:$0xff]  ;;  %v7777_v46 = vcombine.high %v258_v40, %v262_v41  ;;  %v266_v48 = vld [vmem:[#allocation5 + $0x380] sm:$0xff]  ;;  %v7776_v52 = vcombine.low %v258_v40, %v262_v41 }
  0xaf   :  { %3239 = vmatpush1.bf16.msra.mxu0 %v7720_v60  ;;  %3403 = vmatpush1.bf16.msra.mxu1 %v7722_v61  ;;  %v7779_v47 = vcombine.high %v259_v42, %v263_v43  ;;  %v270_v49 = vld [vmem:[#allocation5 + $0x3a0] sm:$0xff]  ;;  %v267_v50 = vld [vmem:[#allocation5 + $0x388] sm:$0xff]  ;;  %v7778_v53 = vcombine.low %v259_v42, %v263_v43 }
  0xb0   :  { %3240 = vmatprep.subr.bf16.mxu0 %v7729_v62  ;;  %3404 = vmatprep.subr.bf16.mxu1 %v7731_v63  ;;  %v271_v51 = vld [vmem:[#allocation5 + $0x3a8] sm:$0xff]  ;;  %v7785_v54 = vcombine.high %v266_v48, %v270_v49  ;;  %v274_v56 = vld [vmem:[#allocation5 + $0x3c0] sm:$0xff]  ;;  %v7784_v61 = vcombine.low %v266_v48, %v270_v49 }
  0xb1   :  { %v7787_v55 = vcombine.high %v267_v50, %v271_v51  ;;  %v278_v58 = vld [vmem:[#allocation5 + $0x3e0] sm:$0xff]  ;;  %v275_v59 = vld [vmem:[#allocation5 + $0x3c8] sm:$0xff]  ;;  %v7786_v62 = vcombine.low %v267_v50, %v271_v51 }
  0xb2   :  { %v279_v60 = vld [vmem:[#allocation5 + $0x3e8] sm:$0xff]  ;;  %v7793_v63 = vcombine.high %v274_v56, %v278_v58  ;;  %v282_v1 = vld [vmem:[#allocation5 + $0x400] sm:$0xff] }
  0xb3   :  { %3241 = vmatpush1.bf16.msra.mxu0 %v7728_v4  ;;  %3405 = vmatpush1.bf16.msra.mxu1 %v7730_v5  ;;  %v7795_v0 = vcombine.high %v275_v59, %v279_v60  ;;  %v286_v2 = vld [vmem:[#allocation5 + $0x420] sm:$0xff]  ;;  %v283_v3 = vld [vmem:[#allocation5 + $0x408] sm:$0xff]  ;;  %v7792_v5 = vcombine.low %v274_v56, %v278_v58 }
  0xb4   :  { %3242 = vmatprep.subr.bf16.mxu0 %v7737_v6  ;;  %3406 = vmatprep.subr.bf16.mxu1 %v7739_v7  ;;  %v287_v4 = vld [vmem:[#allocation5 + $0x428] sm:$0xff]  ;;  %v136_v6 = vld [vmem:[#allocation2] sm:$0xff]  ;;  %v7794_v7 = vcombine.low %v275_v59, %v279_v60  ;;  %v7801_v8 = vcombine.high %v282_v1, %v286_v2  ;;  %v7800_v16 = vcombine.low %v282_v1, %v286_v2 }
  0xb5   :  { %v7803_v9 = vcombine.high %v283_v3, %v287_v4  ;;  %v290_v10 = vld [vmem:[#allocation5 + $0x440] sm:$0xff]  ;;  %v7802_v17 = vcombine.low %v283_v3, %v287_v4  ;;  %v303_v24 = vld [vmem:[#allocation5 + $0x4a8] sm:$0xff] }
  0xb6   :  { %v294_v11 = vld [vmem:[#allocation5 + $0x460] sm:$0xff]  ;;  %v311_v32 = vld [vmem:[#allocation5 + $0x4e8] sm:$0xff] }
  0xb7   :  { %3243 = vmatpush1.bf16.msra.mxu0 %v7736_v12  ;;  %3407 = vmatpush1.bf16.msra.mxu1 %v7738_v13  ;;  %v9602_v12 = vpack.c.bf16 %v136_v6, %v136_v6  ;;  %v291_v13 = vld [vmem:[#allocation5 + $0x448] sm:$0xff]  ;;  %v7809_v18 = vcombine.high %v290_v10, %v294_v11  ;;  %v7808_v25 = vcombine.low %v290_v10, %v294_v11  ;;  %v350_v6 = vld [vmem:[#allocation5 + $0x620] sm:$0xff] }
  0xb8   :  { %3244 = vmatprep.subr.bf16.mxu0 %v7745_v14  ;;  %3408 = vmatprep.subr.bf16.mxu1 %v7747_v15  ;;  %v295_v14 = vld [vmem:[#allocation5 + $0x468] sm:$0xff]  ;;  %v139_v15 = vld [vmem:[#allocation2 + $0x18] sm:$0xff] }
  0xb9   :  { %v7811_v19 = vcombine.high %v291_v13, %v295_v14  ;;  %v7810_v26 = vcombine.low %v291_v13, %v295_v14  ;;  %v319_v40 = vld [vmem:[#allocation5 + $0x528] sm:$0xff]  ;;  %v354_v14 = vld [vmem:[#allocation5 + $0x640] sm:$0xff] }
  0xba   :  { %v327_v48 = vld [vmem:[#allocation5 + $0x568] sm:$0xff] }
  0xbb   :  { %3245 = vmatpush1.bf16.msra.mxu0 %v7744_v20  ;;  %3409 = vmatpush1.bf16.msra.mxu1 %v7746_v21  ;;  %v298_v20 = vld [vmem:[#allocation5 + $0x480] sm:$0xff]  ;;  %v335_v56 = vld [vmem:[#allocation5 + $0x5a8] sm:$0xff] }
  0xbc   :  { %3246 = vmatprep.subr.bf16.mxu0 %v7753_v22  ;;  %3410 = vmatprep.subr.bf16.mxu1 %v7755_v23  ;;  %v302_v21 = vld [vmem:[#allocation5 + $0x4a0] sm:$0xff]  ;;  %v299_v22 = vld [vmem:[#allocation5 + $0x488] sm:$0xff]  ;;  %v9604_v23 = vpack.c.bf16 %v139_v15, %v139_v15 }
  0xbd   :  { %v7817_v27 = vcombine.high %v298_v20, %v302_v21  ;;  %v7816_v33 = vcombine.low %v298_v20, %v302_v21  ;;  %v7818_v34 = vcombine.low %v299_v22, %v303_v24  ;;  %v343_v1 = vld [vmem:[#allocation5 + $0x5e8] sm:$0xff]  ;;  %v358_v15 = vld [vmem:[#allocation5 + $0x660] sm:$0xff] }
  0xbe   :  { %v7873_v21 = vcombine.high %v354_v14, %v358_v15 }
  0xbf   :  { %3247 = vmatpush1.bf16.msra.mxu0 %v7752_v28  ;;  %3411 = vmatpush1.bf16.msra.mxu1 %v7754_v29  ;;  %v306_v28 = vld [vmem:[#allocation5 + $0x4c0] sm:$0xff] }
  0xc0   :  { %3248 = vmatprep.subr.bf16.mxu0 %v7761_v30  ;;  %3412 = vmatprep.subr.bf16.mxu1 %v7763_v31  ;;  %v310_v29 = vld [vmem:[#allocation5 + $0x4e0] sm:$0xff]  ;;  %v307_v30 = vld [vmem:[#allocation5 + $0x4c8] sm:$0xff]  ;;  %v7819_v31 = vcombine.high %v299_v22, %v303_v24 }
  0xc1   :  { %v7825_v35 = vcombine.high %v306_v28, %v310_v29  ;;  %v7824_v41 = vcombine.low %v306_v28, %v310_v29  ;;  %v7826_v42 = vcombine.low %v307_v30, %v311_v32  ;;  %v362_v22 = vld [vmem:[#allocation5 + $0x680] sm:$0xff]  ;;  %v7872_v28 = vcombine.low %v354_v14, %v358_v15  ;;  %v138_v14 = vld [vmem:[#allocation2 + $0x10] sm:$0xff] }
  0xc2   :  { %v366_v24 = vld [vmem:[#allocation5 + $0x6a0] sm:$0xff] }
  0xc3   :  { %3249 = vmatpush1.bf16.msra.mxu0 %v7760_v36  ;;  %3413 = vmatpush1.bf16.msra.mxu1 %v7762_v37  ;;  %v314_v36 = vld [vmem:[#allocation5 + $0x500] sm:$0xff] }
  0xc4   :  { %3250 = vmatprep.subr.bf16.mxu0 %v7769_v38  ;;  %3414 = vmatprep.subr.bf16.mxu1 %v7771_v39  ;;  %v318_v37 = vld [vmem:[#allocation5 + $0x520] sm:$0xff]  ;;  %v315_v38 = vld [vmem:[#allocation5 + $0x508] sm:$0xff]  ;;  %v7827_v39 = vcombine.high %v307_v30, %v311_v32  ;;  %v7881_v30 = vcombine.high %v362_v22, %v366_v24 }
  0xc5   :  { %v7833_v43 = vcombine.high %v314_v36, %v318_v37  ;;  %v7832_v49 = vcombine.low %v314_v36, %v318_v37  ;;  %v7834_v50 = vcombine.low %v315_v38, %v319_v40  ;;  %v374_v32 = vld [vmem:[#allocation5 + $0x6e0] sm:$0xff]  ;;  %v7880_v36 = vcombine.low %v362_v22, %v366_v24  ;;  %v141_v24 = vld [vmem:[#allocation2 + $0x28] sm:$0xff] }
  0xc7   :  { %3251 = vmatpush1.bf16.msra.mxu0 %v7768_v44  ;;  %3415 = vmatpush1.bf16.msra.mxu1 %v7770_v45  ;;  %v322_v44 = vld [vmem:[#allocation5 + $0x540] sm:$0xff] }
  0xc8   :  { %3252 = vmatprep.subr.bf16.mxu0 %v7777_v46  ;;  %3416 = vmatprep.subr.bf16.mxu1 %v7779_v47  ;;  %v326_v45 = vld [vmem:[#allocation5 + $0x560] sm:$0xff]  ;;  %v323_v46 = vld [vmem:[#allocation5 + $0x548] sm:$0xff]  ;;  %v7835_v47 = vcombine.high %v315_v38, %v319_v40 }
  0xc9   :  { %v7841_v51 = vcombine.high %v322_v44, %v326_v45  ;;  %v7840_v58 = vcombine.low %v322_v44, %v326_v45  ;;  %v7842_v59 = vcombine.low %v323_v46, %v327_v48  ;;  %v382_v40 = vld [vmem:[#allocation5 + $0x720] sm:$0xff] }
  0xcb   :  { %3253 = vmatpush1.bf16.msra.mxu0 %v7776_v52  ;;  %3417 = vmatpush1.bf16.msra.mxu1 %v7778_v53  ;;  %v330_v52 = vld [vmem:[#allocation5 + $0x580] sm:$0xff] }
  0xcc   :  { %3254 = vmatprep.subr.bf16.mxu0 %v7785_v54  ;;  %3418 = vmatprep.subr.bf16.mxu1 %v7787_v55  ;;  %v334_v53 = vld [vmem:[#allocation5 + $0x5a0] sm:$0xff]  ;;  %v331_v54 = vld [vmem:[#allocation5 + $0x588] sm:$0xff]  ;;  %v7843_v55 = vcombine.high %v323_v46, %v327_v48 }
  0xcd   :  { %v7849_v60 = vcombine.high %v330_v52, %v334_v53  ;;  %v7848_v2 = vcombine.low %v330_v52, %v334_v53  ;;  %v7850_v3 = vcombine.low %v331_v54, %v335_v56  ;;  %v390_v48 = vld [vmem:[#allocation5 + $0x760] sm:$0xff] }
  0xcf   :  { %3255 = vmatpush1.bf16.msra.mxu0 %v7784_v61  ;;  %3419 = vmatpush1.bf16.msra.mxu1 %v7786_v62  ;;  %v338_v61 = vld [vmem:[#allocation5 + $0x5c0] sm:$0xff] }
  0xd0   :  { %3256 = vmatprep.subr.bf16.mxu0 %v7793_v63  ;;  %3420 = vmatprep.subr.bf16.mxu1 %v7795_v0  ;;  %v342_v62 = vld [vmem:[#allocation5 + $0x5e0] sm:$0xff]  ;;  %v339_v63 = vld [vmem:[#allocation5 + $0x5c8] sm:$0xff]  ;;  %v7851_v0 = vcombine.high %v331_v54, %v335_v56 }
  0xd1   :  { %v7857_v4 = vcombine.high %v338_v61, %v342_v62  ;;  %v7856_v10 = vcombine.low %v338_v61, %v342_v62  ;;  %v7858_v11 = vcombine.low %v339_v63, %v343_v1  ;;  %v398_v56 = vld [vmem:[#allocation5 + $0x7a0] sm:$0xff] }
  0xd3   :  { %3257 = vmatpush1.bf16.msra.mxu0 %v7792_v5  ;;  %3421 = vmatpush1.bf16.msra.mxu1 %v7794_v7  ;;  %v346_v5 = vld [vmem:[#allocation5 + $0x600] sm:$0xff]  ;;  %v347_v7 = vld [vmem:[#allocation5 + $0x608] sm:$0xff] }
  0xd4   :  { %3267 = vmatprep.subr.bf16.mxu0 %v7801_v8  ;;  %3431 = vmatprep.subr.bf16.mxu1 %v7803_v9  ;;  %v7859_v8 = vcombine.high %v339_v63, %v343_v1  ;;  %v351_v9 = vld [vmem:[#allocation5 + $0x628] sm:$0xff]  ;;  %v7865_v13 = vcombine.high %v346_v5, %v350_v6  ;;  %v406_v1 = vld [vmem:[#allocation5 + $0x7e0] sm:$0xff] }
  0xd5   :  { %v7866_v20 = vcombine.low %v347_v7, %v351_v9 }
  0xd6   :  { %3259 = vmatmul.mubr.bf16.vlgmr.msra.gmra.mrb[0].mxu0 %v9602_v12  ;;  %3423 = vmatmul.mubr.bf16.vlgmr.msra.gmra.mrb[0].mxu1 %v9602_v12 }
  0xd7   :  { %3268 = vmatpush1.bf16.msra.mxu0 %v7800_v16  ;;  %3432 = vmatpush1.bf16.msra.mxu1 %v7802_v17  ;;  %v355_v16 = vld [vmem:[#allocation5 + $0x648] sm:$0xff]  ;;  %v7867_v17 = vcombine.high %v347_v7, %v351_v9  ;;  %v414_v9 = vld [vmem:[#allocation5 + $0x820] sm:$0xff] }
  0xd8   :  { %3269 = vmatprep.subr.bf16.mxu0 %v7809_v18  ;;  %3433 = vmatprep.subr.bf16.mxu1 %v7811_v19  ;;  %v359_v18 = vld [vmem:[#allocation5 + $0x668] sm:$0xff]  ;;  %v7864_v19 = vcombine.low %v346_v5, %v350_v6  ;;  %v410_v6 = vld [vmem:[#allocation5 + $0x800] sm:$0xff] }
  0xd9   :  { %3299 = vmatprep.mubr.bf16.mxu0 %v9604_v23  ;;  %3463 = vmatprep.mubr.bf16.mxu1 %v9604_v23  ;;  %v7874_v29 = vcombine.low %v355_v16, %v359_v18 }
  0xdb   :  { %3270 = vmatpush1.bf16.msra.mxu0 %v7808_v25  ;;  %3434 = vmatpush1.bf16.msra.mxu1 %v7810_v26  ;;  %v363_v25 = vld [vmem:[#allocation5 + $0x688] sm:$0xff]  ;;  %v7875_v26 = vcombine.high %v355_v16, %v359_v18  ;;  %v418_v16 = vld [vmem:[#allocation5 + $0x840] sm:$0xff]  ;;  %v7929_v18 = vcombine.high %v410_v6, %v414_v9 }
  0xdc   :  { %3271 = vmatprep.subr.bf16.mxu0 %v7817_v27  ;;  %3435 = vmatprep.subr.bf16.mxu1 %v7819_v31  ;;  %v367_v27 = vld [vmem:[#allocation5 + $0x6a8] sm:$0xff]  ;;  %v370_v31 = vld [vmem:[#allocation5 + $0x6c0] sm:$0xff] }
  0xdd   :  { %v7882_v37 = vcombine.low %v363_v25, %v367_v27  ;;  %v7889_v38 = vcombine.high %v370_v31, %v374_v32  ;;  %v7888_v44 = vcombine.low %v370_v31, %v374_v32  ;;  %v427_v32 = vld [vmem:[#allocation5 + $0x888] sm:$0xff] }
  0xdf   :  { %3272 = vmatpush1.bf16.msra.mxu0 %v7816_v33  ;;  %3436 = vmatpush1.bf16.msra.mxu1 %v7818_v34  ;;  %v371_v33 = vld [vmem:[#allocation5 + $0x6c8] sm:$0xff]  ;;  %v7883_v34 = vcombine.high %v363_v25, %v367_v27  ;;  %v9610_v25 = vpack.c.bf16 %v138_v14, %v138_v14 }
  0xe0   :  { %3273 = vmatprep.subr.bf16.mxu0 %v7825_v35  ;;  %3437 = vmatprep.subr.bf16.mxu1 %v7827_v39  ;;  %v375_v35 = vld [vmem:[#allocation5 + $0x6e8] sm:$0xff]  ;;  %v378_v39 = vld [vmem:[#allocation5 + $0x700] sm:$0xff] }
  0xe1   :  { %v7890_v45 = vcombine.low %v371_v33, %v375_v35  ;;  %v7897_v46 = vcombine.high %v378_v39, %v382_v40  ;;  %v7896_v52 = vcombine.low %v378_v39, %v382_v40  ;;  %v438_v39 = vld [vmem:[#allocation5 + $0x8e0] sm:$0xff]  ;;  %v435_v40 = vld [vmem:[#allocation5 + $0x8c8] sm:$0xff] }
  0xe3   :  { %3274 = vmatpush1.bf16.msra.mxu0 %v7824_v41  ;;  %3438 = vmatpush1.bf16.msra.mxu1 %v7826_v42  ;;  %v379_v41 = vld [vmem:[#allocation5 + $0x708] sm:$0xff]  ;;  %v7891_v42 = vcombine.high %v371_v33, %v375_v35 }
  0xe4   :  { %3275 = vmatprep.subr.bf16.mxu0 %v7833_v43  ;;  %3439 = vmatprep.subr.bf16.mxu1 %v7835_v47  ;;  %v383_v43 = vld [vmem:[#allocation5 + $0x728] sm:$0xff]  ;;  %v386_v47 = vld [vmem:[#allocation5 + $0x740] sm:$0xff] }
  0xe5   :  { %v7898_v53 = vcombine.low %v379_v41, %v383_v43  ;;  %v7905_v54 = vcombine.high %v386_v47, %v390_v48  ;;  %v7904_v61 = vcombine.low %v386_v47, %v390_v48  ;;  %v431_v33 = vld [vmem:[#allocation5 + $0x8a8] sm:$0xff]  ;;  %v446_v47 = vld [vmem:[#allocation5 + $0x920] sm:$0xff] }
  0xe6   :  { %v443_v48 = vld [vmem:[#allocation5 + $0x908] sm:$0xff] }
  0xe7   :  { %3276 = vmatpush1.bf16.msra.mxu0 %v7832_v49  ;;  %3440 = vmatpush1.bf16.msra.mxu1 %v7834_v50  ;;  %v387_v49 = vld [vmem:[#allocation5 + $0x748] sm:$0xff]  ;;  %v7899_v50 = vcombine.high %v379_v41, %v383_v43  ;;  %v7947_v41 = vcombine.high %v427_v32, %v431_v33 }
  0xe8   :  { %3277 = vmatprep.subr.bf16.mxu0 %v7841_v51  ;;  %3441 = vmatprep.subr.bf16.mxu1 %v7843_v55  ;;  %v391_v51 = vld [vmem:[#allocation5 + $0x768] sm:$0xff]  ;;  %v394_v55 = vld [vmem:[#allocation5 + $0x780] sm:$0xff] }
  0xe9   :  { %v7906_v62 = vcombine.low %v387_v49, %v391_v51  ;;  %v7913_v63 = vcombine.high %v394_v55, %v398_v56  ;;  %v7912_v5 = vcombine.low %v394_v55, %v398_v56  ;;  %v454_v55 = vld [vmem:[#allocation5 + $0x960] sm:$0xff]  ;;  %v451_v56 = vld [vmem:[#allocation5 + $0x948] sm:$0xff] }
  0xeb   :  { %3278 = vmatpush1.bf16.msra.mxu0 %v7840_v58  ;;  %3442 = vmatpush1.bf16.msra.mxu1 %v7842_v59  ;;  %v395_v58 = vld [vmem:[#allocation5 + $0x788] sm:$0xff]  ;;  %v7907_v59 = vcombine.high %v387_v49, %v391_v51 }
  0xec   :  { %3279 = vmatprep.subr.bf16.mxu0 %v7849_v60  ;;  %3443 = vmatprep.subr.bf16.mxu1 %v7851_v0  ;;  %v399_v60 = vld [vmem:[#allocation5 + $0x7a8] sm:$0xff]  ;;  %v402_v0 = vld [vmem:[#allocation5 + $0x7c0] sm:$0xff] }
  0xed   :  { %v7914_v7 = vcombine.low %v395_v58, %v399_v60  ;;  %v7920_v15 = vcombine.low %v402_v0, %v406_v1 }
  0xef   :  { %3280 = vmatpush1.bf16.msra.mxu0 %v7848_v2  ;;  %3444 = vmatpush1.bf16.msra.mxu1 %v7850_v3  ;;  %v403_v2 = vld [vmem:[#allocation5 + $0x7c8] sm:$0xff]  ;;  %v7915_v3 = vcombine.high %v395_v58, %v399_v60 }
  0xf0   :  { %3281 = vmatprep.subr.bf16.mxu0 %v7857_v4  ;;  %3445 = vmatprep.subr.bf16.mxu1 %v7859_v8  ;;  %v407_v4 = vld [vmem:[#allocation5 + $0x7e8] sm:$0xff]  ;;  %v7921_v8 = vcombine.high %v402_v0, %v406_v1  ;;  %v462_v0 = vld [vmem:[#allocation5 + $0x9a0] sm:$0xff] }
  0xf1   :  { %v459_v1 = vld [vmem:[#allocation5 + $0x988] sm:$0xff] }
  0xf3   :  { %3282 = vmatpush1.bf16.msra.mxu0 %v7856_v10  ;;  %3446 = vmatpush1.bf16.msra.mxu1 %v7858_v11  ;;  %v411_v10 = vld [vmem:[#allocation5 + $0x808] sm:$0xff] }
  0xf4   :  { %3283 = vmatprep.subr.bf16.mxu0 %v7865_v13  ;;  %3447 = vmatprep.subr.bf16.mxu1 %v7867_v17  ;;  %v415_v11 = vld [vmem:[#allocation5 + $0x828] sm:$0xff]  ;;  %v7923_v13 = vcombine.high %v403_v2, %v407_v4  ;;  %v7922_v17 = vcombine.low %v403_v2, %v407_v4 }
  0xf5   :  { %v7931_v22 = vcombine.high %v411_v10, %v415_v11  ;;  %v7930_v27 = vcombine.low %v411_v10, %v415_v11  ;;  %v471_v11 = vld [vmem:[#allocation5 + $0x9e8] sm:$0xff] }
  0xf7   :  { %3284 = vmatpush1.bf16.msra.mxu0 %v7864_v19  ;;  %3448 = vmatpush1.bf16.msra.mxu1 %v7866_v20  ;;  %v422_v19 = vld [vmem:[#allocation5 + $0x860] sm:$0xff]  ;;  %v419_v20 = vld [vmem:[#allocation5 + $0x848] sm:$0xff] }
  0xf8   :  { %3285 = vmatprep.subr.bf16.mxu0 %v7873_v21  ;;  %3449 = vmatprep.subr.bf16.mxu1 %v7875_v26  ;;  %v423_v21 = vld [vmem:[#allocation5 + $0x868] sm:$0xff]  ;;  %v7928_v26 = vcombine.low %v410_v6, %v414_v9  ;;  %v7936_v35 = vcombine.low %v418_v16, %v422_v19 }
  0xf9   :  { %v7939_v31 = vcombine.high %v419_v20, %v423_v21  ;;  %v467_v9 = vld [vmem:[#allocation5 + $0x9c8] sm:$0xff] }
  0xfb   :  { %3286 = vmatpush1.bf16.msra.mxu0 %v7872_v28  ;;  %3450 = vmatpush1.bf16.msra.mxu1 %v7874_v29  ;;  %v7937_v28 = vcombine.high %v418_v16, %v422_v19  ;;  %v426_v29 = vld [vmem:[#allocation5 + $0x880] sm:$0xff]  ;;  %v7987_v19 = vcombine.high %v467_v9, %v471_v11 }
  0xfc   :  { %3287 = vmatprep.subr.bf16.mxu0 %v7881_v30  ;;  %3451 = vmatprep.subr.bf16.mxu1 %v7883_v34  ;;  %v430_v30 = vld [vmem:[#allocation5 + $0x8a0] sm:$0xff]  ;;  %v9612_v34 = vpack.c.bf16 %v141_v24, %v141_v24 }
  0xfd   :  { %v7944_v43 = vcombine.low %v426_v29, %v430_v30  ;;  %v474_v16 = vld [vmem:[#allocation5 + $0xa00] sm:$0xff] }
  0xff   :  { %3288 = vmatpush1.bf16.msra.mxu0 %v7880_v36  ;;  %3452 = vmatpush1.bf16.msra.mxu1 %v7882_v37  ;;  %v7938_v36 = vcombine.low %v419_v20, %v423_v21  ;;  %v7945_v37 = vcombine.high %v426_v29, %v430_v30  ;;  %v479_v20 = vld [vmem:[#allocation5 + $0xa28] sm:$0xff] }
 0x100   :  { %3289 = vmatprep.subr.bf16.mxu0 %v7889_v38  ;;  %3453 = vmatprep.subr.bf16.mxu1 %v7891_v42  ;;  %v434_v38 = vld [vmem:[#allocation5 + $0x8c0] sm:$0xff]  ;;  %v439_v42 = vld [vmem:[#allocation5 + $0x8e8] sm:$0xff] }
 0x101   :  { %v7955_v49 = vcombine.high %v435_v40, %v439_v42  ;;  %v7952_v51 = vcombine.low %v434_v38, %v438_v39  ;;  %v487_v30 = vld [vmem:[#allocation5 + $0xa68] sm:$0xff] }
 0x103   :  { %3290 = vmatpush1.bf16.msra.mxu0 %v7888_v44  ;;  %3454 = vmatpush1.bf16.msra.mxu1 %v7890_v45  ;;  %v7946_v44 = vcombine.low %v427_v32, %v431_v33  ;;  %v7953_v45 = vcombine.high %v434_v38, %v438_v39  ;;  %v495_v39 = vld [vmem:[#allocation5 + $0xaa8] sm:$0xff] }
 0x104   :  { %3291 = vmatprep.subr.bf16.mxu0 %v7897_v46  ;;  %3455 = vmatprep.subr.bf16.mxu1 %v7899_v50  ;;  %v442_v46 = vld [vmem:[#allocation5 + $0x900] sm:$0xff]  ;;  %v447_v50 = vld [vmem:[#allocation5 + $0x928] sm:$0xff] }
 0x105   :  { %v7963_v58 = vcombine.high %v443_v48, %v447_v50  ;;  %v7960_v60 = vcombine.low %v442_v46, %v446_v47 }
 0x107   :  { %3292 = vmatpush1.bf16.msra.mxu0 %v7896_v52  ;;  %3456 = vmatpush1.bf16.msra.mxu1 %v7898_v53  ;;  %v7954_v52 = vcombine.low %v435_v40, %v439_v42  ;;  %v7961_v53 = vcombine.high %v442_v46, %v446_v47  ;;  %v503_v47 = vld [vmem:[#allocation5 + $0xae8] sm:$0xff] }
 0x108   :  { %3293 = vmatprep.subr.bf16.mxu0 %v7905_v54  ;;  %3457 = vmatprep.subr.bf16.mxu1 %v7907_v59  ;;  %v450_v54 = vld [vmem:[#allocation5 + $0x940] sm:$0xff]  ;;  %v455_v59 = vld [vmem:[#allocation5 + $0x968] sm:$0xff] }
 0x109   :  { %v7971_v2 = vcombine.high %v451_v56, %v455_v59  ;;  %v7968_v4 = vcombine.low %v450_v54, %v454_v55 }
 0x10b   :  { %3294 = vmatpush1.bf16.msra.mxu0 %v7904_v61  ;;  %3458 = vmatpush1.bf16.msra.mxu1 %v7906_v62  ;;  %v7962_v61 = vcombine.low %v443_v48, %v447_v50  ;;  %v7969_v62 = vcombine.high %v450_v54, %v454_v55  ;;  %v511_v55 = vld [vmem:[#allocation5 + $0xb28] sm:$0xff] }
 0x10c   :  { %3295 = vmatprep.subr.bf16.mxu0 %v7913_v63  ;;  %3459 = vmatprep.subr.bf16.mxu1 %v7915_v3  ;;  %v458_v63 = vld [vmem:[#allocation5 + $0x980] sm:$0xff]  ;;  %v463_v3 = vld [vmem:[#allocation5 + $0x9a8] sm:$0xff] }
 0x10d   :  { %v7977_v6 = vcombine.high %v458_v63, %v462_v0  ;;  %v7979_v10 = vcombine.high %v459_v1, %v463_v3  ;;  %v7978_v14 = vcombine.low %v459_v1, %v463_v3 }
 0x10f   :  { %3296 = vmatpush1.bf16.msra.mxu0 %v7912_v5  ;;  %3460 = vmatpush1.bf16.msra.mxu1 %v7914_v7  ;;  %v7970_v5 = vcombine.low %v451_v56, %v455_v59  ;;  %v466_v7 = vld [vmem:[#allocation5 + $0x9c0] sm:$0xff] }
 0x110   :  { %3297 = vmatprep.subr.bf16.mxu0 %v7921_v8  ;;  %3461 = vmatprep.subr.bf16.mxu1 %v7923_v13  ;;  %v470_v8 = vld [vmem:[#allocation5 + $0x9e0] sm:$0xff]  ;;  %v7976_v13 = vcombine.low %v458_v63, %v462_v0  ;;  %v519_v0 = vld [vmem:[#allocation5 + $0xb68] sm:$0xff] }
 0x111   :  { %v7984_v21 = vcombine.low %v466_v7, %v470_v8 }
 0x113   :  { %3298 = vmatpush1.bf16.msra.mxu0 %v7920_v15  ;;  %3462 = vmatpush1.bf16.msra.mxu1 %v7922_v17  ;;  %v7985_v15 = vcombine.high %v466_v7, %v470_v8  ;;  %v478_v17 = vld [vmem:[#allocation5 + $0xa20] sm:$0xff]  ;;  %v527_v8 = vld [vmem:[#allocation5 + $0xba8] sm:$0xff] }
 0x114   :  { %3308 = vmatprep.subr.bf16.mxu0 %v7929_v18  ;;  %3472 = vmatprep.subr.bf16.mxu1 %v7931_v22  ;;  %v475_v18 = vld [vmem:[#allocation5 + $0xa08] sm:$0xff]  ;;  %v7986_v22 = vcombine.low %v467_v9, %v471_v11  ;;  %v7993_v24 = vcombine.high %v474_v16, %v478_v17 }
 0x115   :  { %v7995_v29 = vcombine.high %v475_v18, %v479_v20  ;;  %v7994_v32 = vcombine.low %v475_v18, %v479_v20 }
 0x116   :  { %3300 = vmatmul.mubr.bf16.vlgmr.msra.gmra.mrb[0].mxu0 %v9610_v25  ;;  %3464 = vmatmul.mubr.bf16.vlgmr.msra.gmra.mrb[0].mxu1 %v9610_v25 }
 0x117   :  { %3309 = vmatpush1.bf16.msra.mxu0 %v7928_v26  ;;  %3473 = vmatpush1.bf16.msra.mxu1 %v7930_v27  ;;  %v482_v26 = vld [vmem:[#allocation5 + $0xa40] sm:$0xff] }
 0x118   :  { %3310 = vmatprep.subr.bf16.mxu0 %v7937_v28  ;;  %3474 = vmatprep.subr.bf16.mxu1 %v7939_v31  ;;  %v486_v27 = vld [vmem:[#allocation5 + $0xa60] sm:$0xff]  ;;  %v483_v28 = vld [vmem:[#allocation5 + $0xa48] sm:$0xff]  ;;  %v7992_v31 = vcombine.low %v474_v16, %v478_v17 }
 0x119   :  { %3340 = vmatprep.mubr.bf16.mxu0 %v9612_v34  ;;  %3504 = vmatprep.mubr.bf16.mxu1 %v9612_v34  ;;  %v8001_v33 = vcombine.high %v482_v26, %v486_v27  ;;  %v8003_v38 = vcombine.high %v483_v28, %v487_v30  ;;  %v8000_v40 = vcombine.low %v482_v26, %v486_v27  ;;  %v535_v17 = vld [vmem:[#allocation5 + $0xbe8] sm:$0xff] }
 0x11a   :  { %v543_v26 = vld [vmem:[#allocation5 + $0xc28] sm:$0xff] }
 0x11b   :  { %3311 = vmatpush1.bf16.msra.mxu0 %v7936_v35  ;;  %3475 = vmatpush1.bf16.msra.mxu1 %v7938_v36  ;;  %v490_v35 = vld [vmem:[#allocation5 + $0xa80] sm:$0xff] }
 0x11c   :  { %3312 = vmatprep.subr.bf16.mxu0 %v7945_v37  ;;  %3476 = vmatprep.subr.bf16.mxu1 %v7947_v41  ;;  %v494_v36 = vld [vmem:[#allocation5 + $0xaa0] sm:$0xff]  ;;  %v491_v37 = vld [vmem:[#allocation5 + $0xa88] sm:$0xff]  ;;  %v8002_v41 = vcombine.low %v483_v28, %v487_v30 }
 0x11d   :  { %v8009_v42 = vcombine.high %v490_v35, %v494_v36  ;;  %v8011_v46 = vcombine.high %v491_v37, %v495_v39  ;;  %v8008_v48 = vcombine.low %v490_v35, %v494_v36  ;;  %v140_v28 = vld [vmem:[#allocation2 + $0x20] sm:$0xff]  ;;  %v547_v35 = vld [vmem:[#allocation5 + $0xc48] sm:$0xff] }
 0x11e   :  { %v546_v30 = vld [vmem:[#allocation5 + $0xc40] sm:$0xff]  ;;  %v551_v36 = vld [vmem:[#allocation5 + $0xc68] sm:$0xff] }
 0x11f   :  { %3313 = vmatpush1.bf16.msra.mxu0 %v7944_v43  ;;  %3477 = vmatpush1.bf16.msra.mxu1 %v7946_v44  ;;  %v498_v43 = vld [vmem:[#allocation5 + $0xac0] sm:$0xff] }
 0x120   :  { %3314 = vmatprep.subr.bf16.mxu0 %v7953_v45  ;;  %3478 = vmatprep.subr.bf16.mxu1 %v7955_v49  ;;  %v502_v44 = vld [vmem:[#allocation5 + $0xae0] sm:$0xff]  ;;  %v499_v45 = vld [vmem:[#allocation5 + $0xac8] sm:$0xff]  ;;  %v8010_v49 = vcombine.low %v491_v37, %v495_v39  ;;  %v9618_v39 = vpack.c.bf16 %v140_v28, %v140_v28 }
 0x121   :  { %v8017_v50 = vcombine.high %v498_v43, %v502_v44  ;;  %v8019_v54 = vcombine.high %v499_v45, %v503_v47  ;;  %v8016_v56 = vcombine.low %v498_v43, %v502_v44  ;;  %v554_v43 = vld [vmem:[#allocation5 + $0xc80] sm:$0xff]  ;;  %v599_v28 = vld [vmem:[#allocation5 + $0xde8] sm:$0xff] }
 0x122   :  { %v558_v44 = vld [vmem:[#allocation5 + $0xca0] sm:$0xff] }
 0x123   :  { %3315 = vmatpush1.bf16.msra.mxu0 %v7952_v51  ;;  %3479 = vmatpush1.bf16.msra.mxu1 %v7954_v52  ;;  %v506_v51 = vld [vmem:[#allocation5 + $0xb00] sm:$0xff] }
 0x124   :  { %3316 = vmatprep.subr.bf16.mxu0 %v7961_v53  ;;  %3480 = vmatprep.subr.bf16.mxu1 %v7963_v58  ;;  %v510_v52 = vld [vmem:[#allocation5 + $0xb20] sm:$0xff]  ;;  %v507_v53 = vld [vmem:[#allocation5 + $0xb08] sm:$0xff]  ;;  %v8018_v58 = vcombine.low %v499_v45, %v503_v47 }
 0x125   :  { %v8025_v59 = vcombine.high %v506_v51, %v510_v52  ;;  %v8027_v63 = vcombine.high %v507_v53, %v511_v55  ;;  %v8024_v1 = vcombine.low %v506_v51, %v510_v52  ;;  %v555_v45 = vld [vmem:[#allocation5 + $0xc88] sm:$0xff]  ;;  %v8073_v51 = vcombine.high %v554_v43, %v558_v44  ;;  %v562_v52 = vld [vmem:[#allocation5 + $0xcc0] sm:$0xff] }
 0x126   :  { %v559_v47 = vld [vmem:[#allocation5 + $0xca8] sm:$0xff] }
 0x127   :  { %3317 = vmatpush1.bf16.msra.mxu0 %v7960_v60  ;;  %3481 = vmatpush1.bf16.msra.mxu1 %v7962_v61  ;;  %v514_v60 = vld [vmem:[#allocation5 + $0xb40] sm:$0xff] }
 0x128   :  { %3318 = vmatprep.subr.bf16.mxu0 %v7969_v62  ;;  %3482 = vmatprep.subr.bf16.mxu1 %v7971_v2  ;;  %v518_v61 = vld [vmem:[#allocation5 + $0xb60] sm:$0xff]  ;;  %v515_v62 = vld [vmem:[#allocation5 + $0xb48] sm:$0xff]  ;;  %v8026_v2 = vcombine.low %v507_v53, %v511_v55  ;;  %v8075_v55 = vcombine.high %v555_v45, %v559_v47 }
 0x129   :  { %v8033_v3 = vcombine.high %v514_v60, %v518_v61  ;;  %v8035_v7 = vcombine.high %v515_v62, %v519_v0  ;;  %v8032_v9 = vcombine.low %v514_v60, %v518_v61  ;;  %v566_v53 = vld [vmem:[#allocation5 + $0xce0] sm:$0xff] }
 0x12a   :  { %v8081_v60 = vcombine.high %v562_v52, %v566_v53  ;;  %v570_v61 = vld [vmem:[#allocation5 + $0xd00] sm:$0xff] }
 0x12b   :  { %3319 = vmatpush1.bf16.msra.mxu0 %v7968_v4  ;;  %3483 = vmatpush1.bf16.msra.mxu1 %v7970_v5  ;;  %v522_v4 = vld [vmem:[#allocation5 + $0xb80] sm:$0xff] }
 0x12c   :  { %3320 = vmatprep.subr.bf16.mxu0 %v7977_v6  ;;  %3484 = vmatprep.subr.bf16.mxu1 %v7979_v10  ;;  %v526_v5 = vld [vmem:[#allocation5 + $0xba0] sm:$0xff]  ;;  %v523_v6 = vld [vmem:[#allocation5 + $0xb88] sm:$0xff]  ;;  %v8034_v10 = vcombine.low %v515_v62, %v519_v0 }
 0x12d   :  { %v8041_v11 = vcombine.high %v522_v4, %v526_v5  ;;  %v8043_v16 = vcombine.high %v523_v6, %v527_v8  ;;  %v8040_v18 = vcombine.low %v522_v4, %v526_v5  ;;  %v8042_v20 = vcombine.low %v523_v6, %v527_v8  ;;  %v574_v62 = vld [vmem:[#allocation5 + $0xd20] sm:$0xff] }
 0x12e   :  { %v8089_v4 = vcombine.high %v570_v61, %v574_v62  ;;  %v578_v5 = vld [vmem:[#allocation5 + $0xd40] sm:$0xff] }
 0x12f   :  { %3321 = vmatpush1.bf16.msra.mxu0 %v7976_v13  ;;  %3485 = vmatpush1.bf16.msra.mxu1 %v7978_v14  ;;  %v530_v13 = vld [vmem:[#allocation5 + $0xbc0] sm:$0xff] }
 0x130   :  { %3322 = vmatprep.subr.bf16.mxu0 %v7985_v15  ;;  %3486 = vmatprep.subr.bf16.mxu1 %v7987_v19  ;;  %v534_v14 = vld [vmem:[#allocation5 + $0xbe0] sm:$0xff]  ;;  %v531_v15 = vld [vmem:[#allocation5 + $0xbc8] sm:$0xff] }
 0x131   :  { %v538_v19 = vld [vmem:[#allocation5 + $0xc00] sm:$0xff]  ;;  %v8051_v27 = vcombine.high %v531_v15, %v535_v17 }
 0x132   :  { %v582_v6 = vld [vmem:[#allocation5 + $0xd60] sm:$0xff] }
 0x133   :  { %3323 = vmatpush1.bf16.msra.mxu0 %v7984_v21  ;;  %3487 = vmatpush1.bf16.msra.mxu1 %v7986_v22  ;;  %v8049_v21 = vcombine.high %v530_v13, %v534_v14  ;;  %v542_v22 = vld [vmem:[#allocation5 + $0xc20] sm:$0xff] }
 0x134   :  { %3324 = vmatprep.subr.bf16.mxu0 %v7993_v24  ;;  %3488 = vmatprep.subr.bf16.mxu1 %v7995_v29  ;;  %v539_v24 = vld [vmem:[#allocation5 + $0xc08] sm:$0xff]  ;;  %v8048_v29 = vcombine.low %v530_v13, %v534_v14  ;;  %v8097_v13 = vcombine.high %v578_v5, %v582_v6  ;;  %v586_v14 = vld [vmem:[#allocation5 + $0xd80] sm:$0xff] }
 0x135   :  { %v8059_v37 = vcombine.high %v539_v24, %v543_v26 }
 0x137   :  { %3325 = vmatpush1.bf16.msra.mxu0 %v7992_v31  ;;  %3489 = vmatpush1.bf16.msra.mxu1 %v7994_v32  ;;  %v8050_v31 = vcombine.low %v531_v15, %v535_v17  ;;  %v8057_v32 = vcombine.high %v538_v19, %v542_v22  ;;  %v590_v15 = vld [vmem:[#allocation5 + $0xda0] sm:$0xff] }
 0x138   :  { %3326 = vmatprep.subr.bf16.mxu0 %v8001_v33  ;;  %3490 = vmatprep.subr.bf16.mxu1 %v8003_v38  ;;  %v550_v33 = vld [vmem:[#allocation5 + $0xc60] sm:$0xff]  ;;  %v143_v38 = vld [vmem:[#allocation2 + $0x38] sm:$0xff] }
 0x13b   :  { %3327 = vmatpush1.bf16.msra.mxu0 %v8000_v40  ;;  %3491 = vmatpush1.bf16.msra.mxu1 %v8002_v41  ;;  %v8056_v40 = vcombine.low %v538_v19, %v542_v22  ;;  %v8058_v41 = vcombine.low %v539_v24, %v543_v26  ;;  %v8096_v19 = vcombine.low %v578_v5, %v582_v6  ;;  %v594_v22 = vld [vmem:[#allocation5 + $0xdc0] sm:$0xff]  ;;  %v595_v26 = vld [vmem:[#allocation5 + $0xdc8] sm:$0xff] }
 0x13c   :  { %3328 = vmatprep.subr.bf16.mxu0 %v8009_v42  ;;  %3492 = vmatprep.subr.bf16.mxu1 %v8011_v46  ;;  %v8065_v42 = vcombine.high %v546_v30, %v550_v33  ;;  %v8067_v46 = vcombine.high %v547_v35, %v551_v36  ;;  %v598_v24 = vld [vmem:[#allocation5 + $0xde0] sm:$0xff]  ;;  %v635_v6 = vld [vmem:[#allocation5 + $0xf08] sm:$0xff] }
 0x13d   :  { %v638_v5 = vld [vmem:[#allocation5 + $0xf20] sm:$0xff] }
 0x13f   :  { %3329 = vmatpush1.bf16.msra.mxu0 %v8008_v48  ;;  %3493 = vmatpush1.bf16.msra.mxu1 %v8010_v49  ;;  %v9620_v48 = vpack.c.bf16 %v143_v38, %v143_v38  ;;  %v8064_v49 = vcombine.low %v546_v30, %v550_v33  ;;  %v606_v33 = vld [vmem:[#allocation5 + $0xe20] sm:$0xff]  ;;  %v8112_v38 = vcombine.low %v594_v22, %v598_v24 }
 0x140   :  { %3330 = vmatprep.subr.bf16.mxu0 %v8017_v50  ;;  %3494 = vmatprep.subr.bf16.mxu1 %v8019_v54  ;;  %v8066_v50 = vcombine.low %v547_v35, %v551_v36  ;;  %v563_v54 = vld [vmem:[#allocation5 + $0xcc8] sm:$0xff]  ;;  %v8115_v36 = vcombine.high %v595_v26, %v599_v28 }
 0x141   :  { %v603_v35 = vld [vmem:[#allocation5 + $0xe08] sm:$0xff] }
 0x143   :  { %3331 = vmatpush1.bf16.msra.mxu0 %v8016_v56  ;;  %3495 = vmatpush1.bf16.msra.mxu1 %v8018_v58  ;;  %v567_v56 = vld [vmem:[#allocation5 + $0xce8] sm:$0xff]  ;;  %v8072_v58 = vcombine.low %v554_v43, %v558_v44  ;;  %v614_v43 = vld [vmem:[#allocation5 + $0xe60] sm:$0xff] }
 0x144   :  { %3332 = vmatprep.subr.bf16.mxu0 %v8025_v59  ;;  %3496 = vmatprep.subr.bf16.mxu1 %v8027_v63  ;;  %v8074_v59 = vcombine.low %v555_v45, %v559_v47  ;;  %v571_v63 = vld [vmem:[#allocation5 + $0xd08] sm:$0xff]  ;;  %v8083_v0 = vcombine.high %v563_v54, %v567_v56 }
 0x145   :  { %v611_v44 = vld [vmem:[#allocation5 + $0xe48] sm:$0xff] }
 0x147   :  { %3333 = vmatpush1.bf16.msra.mxu0 %v8024_v1  ;;  %3497 = vmatpush1.bf16.msra.mxu1 %v8026_v2  ;;  %v575_v1 = vld [vmem:[#allocation5 + $0xd28] sm:$0xff]  ;;  %v8080_v2 = vcombine.low %v562_v52, %v566_v53  ;;  %v622_v52 = vld [vmem:[#allocation5 + $0xea0] sm:$0xff] }
 0x148   :  { %3334 = vmatprep.subr.bf16.mxu0 %v8033_v3  ;;  %3498 = vmatprep.subr.bf16.mxu1 %v8035_v7  ;;  %v8082_v3 = vcombine.low %v563_v54, %v567_v56  ;;  %v579_v7 = vld [vmem:[#allocation5 + $0xd48] sm:$0xff]  ;;  %v8091_v8 = vcombine.high %v571_v63, %v575_v1 }
 0x149   :  { %v619_v53 = vld [vmem:[#allocation5 + $0xe88] sm:$0xff] }
 0x14b   :  { %3335 = vmatpush1.bf16.msra.mxu0 %v8032_v9  ;;  %3499 = vmatpush1.bf16.msra.mxu1 %v8034_v10  ;;  %v583_v9 = vld [vmem:[#allocation5 + $0xd68] sm:$0xff]  ;;  %v8088_v10 = vcombine.low %v570_v61, %v574_v62  ;;  %v630_v61 = vld [vmem:[#allocation5 + $0xee0] sm:$0xff] }
 0x14c   :  { %3336 = vmatprep.subr.bf16.mxu0 %v8041_v11  ;;  %3500 = vmatprep.subr.bf16.mxu1 %v8043_v16  ;;  %v8090_v11 = vcombine.low %v571_v63, %v575_v1  ;;  %v587_v16 = vld [vmem:[#allocation5 + $0xd88] sm:$0xff]  ;;  %v8099_v17 = vcombine.high %v579_v7, %v583_v9 }
 0x14d   :  { %v627_v62 = vld [vmem:[#allocation5 + $0xec8] sm:$0xff] }
 0x14f   :  { %3337 = vmatpush1.bf16.msra.mxu0 %v8040_v18  ;;  %3501 = vmatpush1.bf16.msra.mxu1 %v8042_v20  ;;  %v591_v18 = vld [vmem:[#allocation5 + $0xda8] sm:$0xff]  ;;  %v8098_v20 = vcombine.low %v579_v7, %v583_v9 }
 0x150   :  { %3338 = vmatprep.subr.bf16.mxu0 %v8049_v21  ;;  %3502 = vmatprep.subr.bf16.mxu1 %v8051_v27  ;;  %v8105_v21 = vcombine.high %v586_v14, %v590_v15  ;;  %v8107_v27 = vcombine.high %v587_v16, %v591_v18  ;;  %v8106_v30 = vcombine.low %v587_v16, %v591_v18 }
 0x153   :  { %3339 = vmatpush1.bf16.msra.mxu0 %v8048_v29  ;;  %3503 = vmatpush1.bf16.msra.mxu1 %v8050_v31  ;;  %v8104_v29 = vcombine.low %v586_v14, %v590_v15  ;;  %v8113_v31 = vcombine.high %v594_v22, %v598_v24  ;;  %v646_v14 = vld [vmem:[#allocation5 + $0xf60] sm:$0xff]  ;;  %v643_v15 = vld [vmem:[#allocation5 + $0xf48] sm:$0xff] }
 0x154   :  { %3349 = vmatprep.subr.bf16.mxu0 %v8057_v32  ;;  %3513 = vmatprep.subr.bf16.mxu1 %v8059_v37  ;;  %v602_v32 = vld [vmem:[#allocation5 + $0xe00] sm:$0xff]  ;;  %v607_v37 = vld [vmem:[#allocation5 + $0xe28] sm:$0xff] }
 0x155   :  { %v8123_v45 = vcombine.high %v603_v35, %v607_v37  ;;  %v8120_v47 = vcombine.low %v602_v32, %v606_v33  ;;  %v654_v22 = vld [vmem:[#allocation5 + $0xfa0] sm:$0xff]  ;;  %v651_v24 = vld [vmem:[#allocation5 + $0xf88] sm:$0xff] }
 0x156   :  { %3341 = vmatmul.mubr.bf16.vlgmr.msra.gmra.mrb[0].mxu0 %v9618_v39  ;;  %3505 = vmatmul.mubr.bf16.vlgmr.msra.gmra.mrb[0].mxu1 %v9618_v39 }
 0x157   :  { %3350 = vmatpush1.bf16.msra.mxu0 %v8056_v40  ;;  %3514 = vmatpush1.bf16.msra.mxu1 %v8058_v41  ;;  %v8114_v40 = vcombine.low %v595_v26, %v599_v28  ;;  %v8121_v41 = vcombine.high %v602_v32, %v606_v33  ;;  %v658_v32 = vld [vmem:[#allocation5 + $0xfc0] sm:$0xff] }
 0x158   :  { %3351 = vmatprep.subr.bf16.mxu0 %v8065_v42  ;;  %3515 = vmatprep.subr.bf16.mxu1 %v8067_v46  ;;  %v610_v42 = vld [vmem:[#allocation5 + $0xe40] sm:$0xff]  ;;  %v615_v46 = vld [vmem:[#allocation5 + $0xe68] sm:$0xff] }
 0x159   :  { %3381 = vmatprep.mubr.bf16.mxu0 %v9620_v48  ;;  %3545 = vmatprep.mubr.bf16.mxu1 %v9620_v48  ;;  %v8131_v54 = vcombine.high %v611_v44, %v615_v46  ;;  %v8128_v56 = vcombine.low %v610_v42, %v614_v43  ;;  %v662_v33 = vld [vmem:[#allocation5 + $0xfe0] sm:$0xff] }
 0x15b   :  { %3352 = vmatpush1.bf16.msra.mxu0 %v8064_v49  ;;  %3516 = vmatpush1.bf16.msra.mxu1 %v8066_v50  ;;  %v8122_v49 = vcombine.low %v603_v35, %v607_v37  ;;  %v8129_v50 = vcombine.high %v610_v42, %v614_v43  ;;  %v659_v35 = vld [vmem:[#allocation5 + $0xfc8] sm:$0xff]  ;;  %v156_v42 = vld [vmem:[#allocation5 + $0x10] sm:$0xff] }
 0x15c   :  { %3353 = vmatprep.subr.bf16.mxu0 %v8073_v51  ;;  %3517 = vmatprep.subr.bf16.mxu1 %v8075_v55  ;;  %v618_v51 = vld [vmem:[#allocation5 + $0xe80] sm:$0xff]  ;;  %v623_v55 = vld [vmem:[#allocation5 + $0xea8] sm:$0xff]  ;;  %v160_v43 = vld [vmem:[#allocation5 + $0x30] sm:$0xff] }
 0x15d   :  { %v8139_v63 = vcombine.high %v619_v53, %v623_v55  ;;  %v8136_v1 = vcombine.low %v618_v51, %v622_v52 }
 0x15f   :  { %3354 = vmatpush1.bf16.msra.mxu0 %v8072_v58  ;;  %3518 = vmatpush1.bf16.msra.mxu1 %v8074_v59  ;;  %v8130_v58 = vcombine.low %v611_v44, %v615_v46  ;;  %v8137_v59 = vcombine.high %v618_v51, %v622_v52  ;;  %v157_v44 = vld [vmem:[#allocation5 + $0x18] sm:$0xff]  ;;  %v8176_v46 = vcombine.low %v658_v32, %v662_v33  ;;  %v164_v52 = vld [vmem:[#allocation5 + $0x50] sm:$0xff] }
 0x160   :  { %3355 = vmatprep.subr.bf16.mxu0 %v8081_v60  ;;  %3519 = vmatprep.subr.bf16.mxu1 %v8083_v0  ;;  %v626_v60 = vld [vmem:[#allocation5 + $0xec0] sm:$0xff]  ;;  %v631_v0 = vld [vmem:[#allocation5 + $0xee8] sm:$0xff] }
 0x161   :  { %v8147_v7 = vcombine.high %v627_v62, %v631_v0  ;;  %v8144_v9 = vcombine.low %v626_v60, %v630_v61 }
 0x163   :  { %3356 = vmatpush1.bf16.msra.mxu0 %v8080_v2  ;;  %3520 = vmatpush1.bf16.msra.mxu1 %v8082_v3  ;;  %v8138_v2 = vcombine.low %v619_v53, %v623_v55  ;;  %v8145_v3 = vcombine.high %v626_v60, %v630_v61  ;;  %v168_v53 = vld [vmem:[#allocation5 + $0x70] sm:$0xff]  ;;  %v165_v55 = vld [vmem:[#allocation5 + $0x58] sm:$0xff] }
 0x164   :  { %3357 = vmatprep.subr.bf16.mxu0 %v8089_v4  ;;  %3521 = vmatprep.subr.bf16.mxu1 %v8091_v8  ;;  %v634_v4 = vld [vmem:[#allocation5 + $0xf00] sm:$0xff]  ;;  %v639_v8 = vld [vmem:[#allocation5 + $0xf28] sm:$0xff]  ;;  %v7685_v60 = vcombine.high %v164_v52, %v168_v53 }
 0x165   :  { %v8155_v16 = vcombine.high %v635_v6, %v639_v8  ;;  %v8152_v18 = vcombine.low %v634_v4, %v638_v5 }
 0x167   :  { %3358 = vmatpush1.bf16.msra.mxu0 %v8088_v10  ;;  %3522 = vmatpush1.bf16.msra.mxu1 %v8090_v11  ;;  %v8146_v10 = vcombine.low %v627_v62, %v631_v0  ;;  %v8153_v11 = vcombine.high %v634_v4, %v638_v5  ;;  %v172_v62 = vld [vmem:[#allocation5 + $0x90] sm:$0xff]  ;;  %v173_v0 = vld [vmem:[#allocation5 + $0x98] sm:$0xff] }
 0x168   :  { %3359 = vmatprep.subr.bf16.mxu0 %v8097_v13  ;;  %3523 = vmatprep.subr.bf16.mxu1 %v8099_v17  ;;  %v642_v13 = vld [vmem:[#allocation5 + $0xf40] sm:$0xff]  ;;  %v647_v17 = vld [vmem:[#allocation5 + $0xf68] sm:$0xff] }
 0x169   :  { %v8163_v26 = vcombine.high %v643_v15, %v647_v17  ;;  %v8160_v28 = vcombine.low %v642_v13, %v646_v14 }
 0x16b   :  { %3360 = vmatpush1.bf16.msra.mxu0 %v8096_v19  ;;  %3524 = vmatpush1.bf16.msra.mxu1 %v8098_v20  ;;  %v8154_v19 = vcombine.low %v635_v6, %v639_v8  ;;  %v8161_v20 = vcombine.high %v642_v13, %v646_v14  ;;  %v180_v6 = vld [vmem:[#allocation5 + $0xd0] sm:$0xff]  ;;  %v181_v8 = vld [vmem:[#allocation5 + $0xd8] sm:$0xff] }
 0x16c   :  { %3361 = vmatprep.subr.bf16.mxu0 %v8105_v21  ;;  %3525 = vmatprep.subr.bf16.mxu1 %v8107_v27  ;;  %v650_v21 = vld [vmem:[#allocation5 + $0xf80] sm:$0xff]  ;;  %v655_v27 = vld [vmem:[#allocation5 + $0xfa8] sm:$0xff] }
 0x16d   :  { %v8168_v37 = vcombine.low %v650_v21, %v654_v22 }
 0x16f   :  { %3362 = vmatpush1.bf16.msra.mxu0 %v8104_v29  ;;  %3526 = vmatpush1.bf16.msra.mxu1 %v8106_v30  ;;  %v8162_v29 = vcombine.low %v643_v15, %v647_v17  ;;  %v8169_v30 = vcombine.high %v650_v21, %v654_v22  ;;  %v188_v15 = vld [vmem:[#allocation5 + $0x110] sm:$0xff]  ;;  %v189_v17 = vld [vmem:[#allocation5 + $0x118] sm:$0xff] }
 0x170   :  { %3363 = vmatprep.subr.bf16.mxu0 %v8113_v31  ;;  %3527 = vmatprep.subr.bf16.mxu1 %v8115_v36  ;;  %v8171_v31 = vcombine.high %v651_v24, %v655_v27  ;;  %v663_v36 = vld [vmem:[#allocation5 + $0xfe8] sm:$0xff]  ;;  %v196_v22 = vld [vmem:[#allocation5 + $0x150] sm:$0xff] }
 0x173   :  { %3364 = vmatpush1.bf16.msra.mxu0 %v8112_v38  ;;  %3528 = vmatpush1.bf16.msra.mxu1 %v8114_v40  ;;  %v8170_v38 = vcombine.low %v651_v24, %v655_v27  ;;  %v8177_v40 = vcombine.high %v658_v32, %v662_v33  ;;  %v200_v24 = vld [vmem:[#allocation5 + $0x170] sm:$0xff]  ;;  %v201_v27 = vld [vmem:[#allocation5 + $0x178] sm:$0xff] }
 0x174   :  { %3365 = vmatprep.subr.bf16.mxu0 %v8121_v41  ;;  %3529 = vmatprep.subr.bf16.mxu1 %v8123_v45  ;;  %v8179_v41 = vcombine.high %v659_v35, %v663_v36  ;;  %v161_v45 = vld [vmem:[#allocation5 + $0x38] sm:$0xff]  ;;  %v204_v32 = vld [vmem:[#allocation5 + $0x190] sm:$0xff] }
 0x175   :  { %v7679_v51 = vcombine.high %v157_v44, %v161_v45  ;;  %v208_v33 = vld [vmem:[#allocation5 + $0x1b0] sm:$0xff] }
 0x177   :  { %3366 = vmatpush1.bf16.msra.mxu0 %v8120_v47  ;;  %3530 = vmatpush1.bf16.msra.mxu1 %v8122_v49  ;;  %v142_v47 = vld [vmem:[#allocation2 + $0x30] sm:$0xff]  ;;  %v8178_v49 = vcombine.low %v659_v35, %v663_v36  ;;  %v205_v35 = vld [vmem:[#allocation5 + $0x198] sm:$0xff] }
 0x178   :  { %3367 = vmatprep.subr.bf16.mxu0 %v8129_v50  ;;  %3531 = vmatprep.subr.bf16.mxu1 %v8131_v54  ;;  %v7677_v50 = vcombine.high %v156_v42, %v160_v43  ;;  %v9626_v54 = vpack.c.bf16 %v142_v47, %v142_v47  ;;  %v209_v36 = vld [vmem:[#allocation5 + $0x1b8] sm:$0xff] }
 0x179   :  { %v7726_v47 = vcombine.low %v205_v35, %v209_v36 }
 0x17b   :  { %3368 = vmatpush1.bf16.msra.mxu0 %v8128_v56  ;;  %3532 = vmatpush1.bf16.msra.mxu1 %v8130_v58  ;;  %v169_v56 = vld [vmem:[#allocation5 + $0x78] sm:$0xff]  ;;  %v7676_v58 = vcombine.low %v156_v42, %v160_v43  ;;  %v212_v42 = vld [vmem:[#allocation5 + $0x1d0] sm:$0xff] }
 0x17c   :  { %3369 = vmatprep.subr.bf16.mxu0 %v8137_v59  ;;  %3533 = vmatprep.subr.bf16.mxu1 %v8139_v63  ;;  %v7678_v59 = vcombine.low %v157_v44, %v161_v45  ;;  %v7687_v61 = vcombine.high %v165_v55, %v169_v56  ;;  %v176_v63 = vld [vmem:[#allocation5 + $0xb0] sm:$0xff]  ;;  %v213_v44 = vld [vmem:[#allocation5 + $0x1d8] sm:$0xff] }
 0x17d   :  { %v7693_v4 = vcombine.high %v172_v62, %v176_v63  ;;  %v216_v43 = vld [vmem:[#allocation5 + $0x1f0] sm:$0xff]  ;;  %v217_v45 = vld [vmem:[#allocation5 + $0x1f8] sm:$0xff] }
 0x17f   :  { %3370 = vmatpush1.bf16.msra.mxu0 %v8136_v1  ;;  %3534 = vmatpush1.bf16.msra.mxu1 %v8138_v2  ;;  %v177_v1 = vld [vmem:[#allocation5 + $0xb8] sm:$0xff]  ;;  %v7684_v2 = vcombine.low %v164_v52, %v168_v53  ;;  %v224_v52 = vld [vmem:[#allocation5 + $0x230] sm:$0xff] }
 0x180   :  { %3371 = vmatprep.subr.bf16.mxu0 %v8145_v3  ;;  %3535 = vmatprep.subr.bf16.mxu1 %v8147_v7  ;;  %v7686_v3 = vcombine.low %v165_v55, %v169_v56  ;;  %v7695_v5 = vcombine.high %v173_v0, %v177_v1  ;;  %v184_v7 = vld [vmem:[#allocation5 + $0xf0] sm:$0xff]  ;;  %v221_v53 = vld [vmem:[#allocation5 + $0x218] sm:$0xff]  ;;  %v7732_v56 = vcombine.low %v212_v42, %v216_v43 }
 0x181   :  { %v7701_v13 = vcombine.high %v180_v6, %v184_v7  ;;  %v225_v55 = vld [vmem:[#allocation5 + $0x238] sm:$0xff] }
 0x183   :  { %3372 = vmatpush1.bf16.msra.mxu0 %v8144_v9  ;;  %3536 = vmatpush1.bf16.msra.mxu1 %v8146_v10  ;;  %v185_v9 = vld [vmem:[#allocation5 + $0xf8] sm:$0xff]  ;;  %v7692_v10 = vcombine.low %v172_v62, %v176_v63  ;;  %v232_v62 = vld [vmem:[#allocation5 + $0x270] sm:$0xff] }
 0x184   :  { %3373 = vmatprep.subr.bf16.mxu0 %v8153_v11  ;;  %3537 = vmatprep.subr.bf16.mxu1 %v8155_v16  ;;  %v7694_v11 = vcombine.low %v173_v0, %v177_v1  ;;  %v7703_v14 = vcombine.high %v181_v8, %v185_v9  ;;  %v192_v16 = vld [vmem:[#allocation5 + $0x130] sm:$0xff]  ;;  %v229_v63 = vld [vmem:[#allocation5 + $0x258] sm:$0xff] }
 0x185   :  { %v7709_v21 = vcombine.high %v188_v15, %v192_v16  ;;  %v233_v0 = vld [vmem:[#allocation5 + $0x278] sm:$0xff] }
 0x187   :  { %3374 = vmatpush1.bf16.msra.mxu0 %v8152_v18  ;;  %3538 = vmatpush1.bf16.msra.mxu1 %v8154_v19  ;;  %v193_v18 = vld [vmem:[#allocation5 + $0x138] sm:$0xff]  ;;  %v7700_v19 = vcombine.low %v180_v6, %v184_v7  ;;  %v240_v6 = vld [vmem:[#allocation5 + $0x2b0] sm:$0xff] }
 0x188   :  { %3375 = vmatprep.subr.bf16.mxu0 %v8161_v20  ;;  %3539 = vmatprep.subr.bf16.mxu1 %v8163_v26  ;;  %v7702_v20 = vcombine.low %v181_v8, %v185_v9  ;;  %v197_v26 = vld [vmem:[#allocation5 + $0x158] sm:$0xff] }
 0x189   :  { %v237_v7 = vld [vmem:[#allocation5 + $0x298] sm:$0xff] }
 0x18a   :  { %v241_v8 = vld [vmem:[#allocation5 + $0x2b8] sm:$0xff] }
 0x18b   :  { %3376 = vmatpush1.bf16.msra.mxu0 %v8160_v28  ;;  %3540 = vmatpush1.bf16.msra.mxu1 %v8162_v29  ;;  %v7708_v28 = vcombine.low %v188_v15, %v192_v16  ;;  %v7710_v29 = vcombine.low %v189_v17, %v193_v18  ;;  %v248_v15 = vld [vmem:[#allocation5 + $0x2f0] sm:$0xff]  ;;  %v245_v16 = vld [vmem:[#allocation5 + $0x2d8] sm:$0xff] }
 0x18c   :  { %3377 = vmatprep.subr.bf16.mxu0 %v8169_v30  ;;  %3541 = vmatprep.subr.bf16.mxu1 %v8171_v31  ;;  %v7717_v30 = vcombine.high %v196_v22, %v200_v24  ;;  %v7719_v31 = vcombine.high %v197_v26, %v201_v27 }
 0x18f   :  { %3378 = vmatpush1.bf16.msra.mxu0 %v8168_v37  ;;  %3542 = vmatpush1.bf16.msra.mxu1 %v8170_v38  ;;  %v7716_v37 = vcombine.low %v196_v22, %v200_v24  ;;  %v7718_v38 = vcombine.low %v197_v26, %v201_v27  ;;  %v256_v22 = vld [vmem:[#allocation5 + $0x330] sm:$0xff]  ;;  %v253_v24 = vld [vmem:[#allocation5 + $0x318] sm:$0xff] }
 0x190   :  { %3379 = vmatprep.subr.bf16.mxu0 %v8177_v40  ;;  %3543 = vmatprep.subr.bf16.mxu1 %v8179_v41  ;;  %v7725_v40 = vcombine.high %v204_v32, %v208_v33  ;;  %v7727_v41 = vcombine.high %v205_v35, %v209_v36  ;;  %v257_v26 = vld [vmem:[#allocation5 + $0x338] sm:$0xff] }
 0x191   :  { %v265_v35 = vld [vmem:[#allocation5 + $0x378] sm:$0xff] }
 0x193   :  { %3380 = vmatpush1.bf16.msra.mxu0 %v8176_v46  ;;  %3544 = vmatpush1.bf16.msra.mxu1 %v8178_v49  ;;  %v7724_v46 = vcombine.low %v204_v32, %v208_v33  ;;  %v7733_v49 = vcombine.high %v212_v42, %v216_v43  ;;  %v264_v32 = vld [vmem:[#allocation5 + $0x370] sm:$0xff]  ;;  %v261_v33 = vld [vmem:[#allocation5 + $0x358] sm:$0xff] }
 0x194   :  { %3554 = vmatprep.subr.bf16.mxu0 %v7677_v50  ;;  %3718 = vmatprep.subr.bf16.mxu1 %v7679_v51  ;;  %v7735_v50 = vcombine.high %v213_v44, %v217_v45  ;;  %v220_v51 = vld [vmem:[#allocation5 + $0x210] sm:$0xff]  ;;  %v269_v43 = vld [vmem:[#allocation5 + $0x398] sm:$0xff] }
 0x195   :  { %v7740_v1 = vcombine.low %v220_v51, %v224_v52  ;;  %v272_v42 = vld [vmem:[#allocation5 + $0x3b0] sm:$0xff] }
 0x196   :  { %3382 = vmatmul.mubr.bf16.vlgmr.msra.gmra.mrb[0].mxu0 %v9626_v54  ;;  %3546 = vmatmul.mubr.bf16.vlgmr.msra.gmra.mrb[0].mxu1 %v9626_v54 }
 0x197   :  { %3555 = vmatpush1.bf16.msra.mxu0 %v7676_v58  ;;  %3719 = vmatpush1.bf16.msra.mxu1 %v7678_v59  ;;  %v7734_v58 = vcombine.low %v213_v44, %v217_v45  ;;  %v7741_v59 = vcombine.high %v220_v51, %v224_v52  ;;  %v273_v44 = vld [vmem:[#allocation5 + $0x3b8] sm:$0xff]  ;;  %v280_v51 = vld [vmem:[#allocation5 + $0x3f0] sm:$0xff] }
 0x198   :  { %3556 = vmatprep.subr.bf16.mxu0 %v7685_v60  ;;  %3720 = vmatprep.subr.bf16.mxu1 %v7687_v61  ;;  %v7743_v60 = vcombine.high %v221_v53, %v225_v55  ;;  %v228_v61 = vld [vmem:[#allocation5 + $0x250] sm:$0xff]  ;;  %v277_v52 = vld [vmem:[#allocation5 + $0x3d8] sm:$0xff] }
 0x199   :  { %3586 = vmatprep.mubr.bf16.mxu0 %v9598_v57  ;;  %3750 = vmatprep.mubr.bf16.mxu1 %v9598_v57  ;;  %v7711_v57 = vcombine.high %v189_v17, %v193_v18  ;;  %v7748_v9 = vcombine.low %v228_v61, %v232_v62  ;;  %v249_v17 = vld [vmem:[#allocation5 + $0x2f8] sm:$0xff] }
 0x19b   :  { %3557 = vmatpush1.bf16.msra.mxu0 %v7684_v2  ;;  %3721 = vmatpush1.bf16.msra.mxu1 %v7686_v3  ;;  %v7742_v2 = vcombine.low %v221_v53, %v225_v55  ;;  %v7749_v3 = vcombine.high %v228_v61, %v232_v62  ;;  %v281_v53 = vld [vmem:[#allocation5 + $0x3f8] sm:$0xff]  ;;  %v288_v61 = vld [vmem:[#allocation5 + $0x430] sm:$0xff] }
 0x19c   :  { %3558 = vmatprep.subr.bf16.mxu0 %v7693_v4  ;;  %3722 = vmatprep.subr.bf16.mxu1 %v7695_v5  ;;  %v7751_v4 = vcombine.high %v229_v63, %v233_v0  ;;  %v236_v5 = vld [vmem:[#allocation5 + $0x290] sm:$0xff]  ;;  %v285_v62 = vld [vmem:[#allocation5 + $0x418] sm:$0xff] }
 0x19d   :  { %v7756_v18 = vcombine.low %v236_v5, %v240_v6 }
 0x19f   :  { %3559 = vmatpush1.bf16.msra.mxu0 %v7692_v10  ;;  %3723 = vmatpush1.bf16.msra.mxu1 %v7694_v11  ;;  %v7750_v10 = vcombine.low %v229_v63, %v233_v0  ;;  %v7757_v11 = vcombine.high %v236_v5, %v240_v6  ;;  %v289_v63 = vld [vmem:[#allocation5 + $0x438] sm:$0xff]  ;;  %v296_v5 = vld [vmem:[#allocation5 + $0x470] sm:$0xff] }
 0x1a0   :  { %3560 = vmatprep.subr.bf16.mxu0 %v7701_v13  ;;  %3724 = vmatprep.subr.bf16.mxu1 %v7703_v14  ;;  %v7759_v13 = vcombine.high %v237_v7, %v241_v8  ;;  %v244_v14 = vld [vmem:[#allocation5 + $0x2d0] sm:$0xff]  ;;  %v293_v6 = vld [vmem:[#allocation5 + $0x458] sm:$0xff] }
 0x1a1   :  { %v7764_v27 = vcombine.low %v244_v14, %v248_v15 }
 0x1a3   :  { %3561 = vmatpush1.bf16.msra.mxu0 %v7700_v19  ;;  %3725 = vmatpush1.bf16.msra.mxu1 %v7702_v20  ;;  %v7758_v19 = vcombine.low %v237_v7, %v241_v8  ;;  %v7765_v20 = vcombine.high %v244_v14, %v248_v15  ;;  %v297_v7 = vld [vmem:[#allocation5 + $0x478] sm:$0xff]  ;;  %v304_v14 = vld [vmem:[#allocation5 + $0x4b0] sm:$0xff] }
 0x1a4   :  { %3562 = vmatprep.subr.bf16.mxu0 %v7709_v21  ;;  %3726 = vmatprep.subr.bf16.mxu1 %v7711_v57  ;;  %v7767_v21 = vcombine.high %v245_v16, %v249_v17  ;;  %v252_v57 = vld [vmem:[#allocation5 + $0x310] sm:$0xff]  ;;  %v301_v15 = vld [vmem:[#allocation5 + $0x498] sm:$0xff] }
 0x1a5   :  { %v7772_v36 = vcombine.low %v252_v57, %v256_v22 }
 0x1a7   :  { %3563 = vmatpush1.bf16.msra.mxu0 %v7708_v28  ;;  %3727 = vmatpush1.bf16.msra.mxu1 %v7710_v29  ;;  %v7766_v28 = vcombine.low %v245_v16, %v249_v17  ;;  %v7773_v29 = vcombine.high %v252_v57, %v256_v22  ;;  %v305_v16 = vld [vmem:[#allocation5 + $0x4b8] sm:$0xff]  ;;  %v312_v57 = vld [vmem:[#allocation5 + $0x4f0] sm:$0xff] }
 0x1a8   :  { %3564 = vmatprep.subr.bf16.mxu0 %v7717_v30  ;;  %3728 = vmatprep.subr.bf16.mxu1 %v7719_v31  ;;  %v7775_v30 = vcombine.high %v253_v24, %v257_v26  ;;  %v260_v31 = vld [vmem:[#allocation5 + $0x350] sm:$0xff]  ;;  %v309_v22 = vld [vmem:[#allocation5 + $0x4d8] sm:$0xff] }
 0x1a9   :  { %v7780_v45 = vcombine.low %v260_v31, %v264_v32 }
 0x1ab   :  { %3565 = vmatpush1.bf16.msra.mxu0 %v7716_v37  ;;  %3729 = vmatpush1.bf16.msra.mxu1 %v7718_v38  ;;  %v7774_v37 = vcombine.low %v253_v24, %v257_v26  ;;  %v7781_v38 = vcombine.high %v260_v31, %v264_v32  ;;  %v313_v24 = vld [vmem:[#allocation5 + $0x4f8] sm:$0xff] }
 0x1ac   :  { %3566 = vmatprep.subr.bf16.mxu0 %v7725_v40  ;;  %3730 = vmatprep.subr.bf16.mxu1 %v7727_v41  ;;  %v7783_v40 = vcombine.high %v261_v33, %v265_v35  ;;  %v268_v41 = vld [vmem:[#allocation5 + $0x390] sm:$0xff]  ;;  %v317_v31 = vld [vmem:[#allocation5 + $0x518] sm:$0xff] }
 0x1ad   :  { %v7788_v55 = vcombine.low %v268_v41, %v272_v42  ;;  %v321_v32 = vld [vmem:[#allocation5 + $0x538] sm:$0xff] }
 0x1af   :  { %3567 = vmatpush1.bf16.msra.mxu0 %v7724_v46  ;;  %3731 = vmatpush1.bf16.msra.mxu1 %v7726_v47  ;;  %v7782_v46 = vcombine.low %v261_v33, %v265_v35  ;;  %v7789_v47 = vcombine.high %v268_v41, %v272_v42  ;;  %v7830_v35 = vcombine.low %v309_v22, %v313_v24  ;;  %v329_v41 = vld [vmem:[#allocation5 + $0x578] sm:$0xff] }
 0x1b0   :  { %3568 = vmatprep.subr.bf16.mxu0 %v7733_v49  ;;  %3732 = vmatprep.subr.bf16.mxu1 %v7735_v50  ;;  %v7791_v49 = vcombine.high %v269_v43, %v273_v44  ;;  %v276_v50 = vld [vmem:[#allocation5 + $0x3d0] sm:$0xff] }
 0x1b1   :  { %v7796_v0 = vcombine.low %v276_v50, %v280_v51 }
 0x1b3   :  { %3569 = vmatpush1.bf16.msra.mxu0 %v7732_v56  ;;  %3733 = vmatpush1.bf16.msra.mxu1 %v7734_v58  ;;  %v7790_v56 = vcombine.low %v269_v43, %v273_v44  ;;  %v7797_v58 = vcombine.high %v276_v50, %v280_v51  ;;  %v7838_v43 = vcombine.low %v317_v31, %v321_v32  ;;  %v337_v50 = vld [vmem:[#allocation5 + $0x5b8] sm:$0xff] }
 0x1b4   :  { %3570 = vmatprep.subr.bf16.mxu0 %v7741_v59  ;;  %3734 = vmatprep.subr.bf16.mxu1 %v7743_v60  ;;  %v7799_v59 = vcombine.high %v277_v52, %v281_v53  ;;  %v284_v60 = vld [vmem:[#allocation5 + $0x410] sm:$0xff] }
 0x1b5   :  { %v7804_v8 = vcombine.low %v284_v60, %v288_v61 }
 0x1b7   :  { %3571 = vmatpush1.bf16.msra.mxu0 %v7740_v1  ;;  %3735 = vmatpush1.bf16.msra.mxu1 %v7742_v2  ;;  %v7798_v1 = vcombine.low %v277_v52, %v281_v53  ;;  %v7805_v2 = vcombine.high %v284_v60, %v288_v61  ;;  %v345_v60 = vld [vmem:[#allocation5 + $0x5f8] sm:$0xff] }
 0x1b8   :  { %3572 = vmatprep.subr.bf16.mxu0 %v7749_v3  ;;  %3736 = vmatprep.subr.bf16.mxu1 %v7751_v4  ;;  %v7807_v3 = vcombine.high %v285_v62, %v289_v63  ;;  %v292_v4 = vld [vmem:[#allocation5 + $0x450] sm:$0xff] }
 0x1b9   :  { %v7812_v17 = vcombine.low %v292_v4, %v296_v5 }
 0x1bb   :  { %3573 = vmatpush1.bf16.msra.mxu0 %v7748_v9  ;;  %3737 = vmatpush1.bf16.msra.mxu1 %v7750_v10  ;;  %v7806_v9 = vcombine.low %v285_v62, %v289_v63  ;;  %v7813_v10 = vcombine.high %v292_v4, %v296_v5  ;;  %v353_v4 = vld [vmem:[#allocation5 + $0x638] sm:$0xff] }
 0x1bc   :  { %3574 = vmatprep.subr.bf16.mxu0 %v7757_v11  ;;  %3738 = vmatprep.subr.bf16.mxu1 %v7759_v13  ;;  %v7815_v11 = vcombine.high %v293_v6, %v297_v7  ;;  %v300_v13 = vld [vmem:[#allocation5 + $0x490] sm:$0xff] }
 0x1bd   :  { %v7820_v26 = vcombine.low %v300_v13, %v304_v14 }
 0x1bf   :  { %3575 = vmatpush1.bf16.msra.mxu0 %v7756_v18  ;;  %3739 = vmatpush1.bf16.msra.mxu1 %v7758_v19  ;;  %v7814_v18 = vcombine.low %v293_v6, %v297_v7  ;;  %v7821_v19 = vcombine.high %v300_v13, %v304_v14  ;;  %v361_v13 = vld [vmem:[#allocation5 + $0x678] sm:$0xff] }
 0x1c0   :  { %3576 = vmatprep.subr.bf16.mxu0 %v7765_v20  ;;  %3740 = vmatprep.subr.bf16.mxu1 %v7767_v21  ;;  %v7823_v20 = vcombine.high %v301_v15, %v305_v16  ;;  %v308_v21 = vld [vmem:[#allocation5 + $0x4d0] sm:$0xff] }
 0x1c1   :  { %v7828_v33 = vcombine.low %v308_v21, %v312_v57 }
 0x1c3   :  { %3577 = vmatpush1.bf16.msra.mxu0 %v7764_v27  ;;  %3741 = vmatpush1.bf16.msra.mxu1 %v7766_v28  ;;  %v7829_v27 = vcombine.high %v308_v21, %v312_v57  ;;  %v7831_v28 = vcombine.high %v309_v22, %v313_v24  ;;  %v369_v21 = vld [vmem:[#allocation5 + $0x6b8] sm:$0xff] }
 0x1c4   :  { %3578 = vmatprep.subr.bf16.mxu0 %v7773_v29  ;;  %3742 = vmatprep.subr.bf16.mxu1 %v7775_v30  ;;  %v316_v29 = vld [vmem:[#allocation5 + $0x510] sm:$0xff] }
 0x1c5   :  { %v320_v30 = vld [vmem:[#allocation5 + $0x530] sm:$0xff] }
 0x1c6   :  { %v7836_v42 = vcombine.low %v316_v29, %v320_v30 }
 0x1c7   :  { %3579 = vmatpush1.bf16.msra.mxu0 %v7772_v36  ;;  %3743 = vmatpush1.bf16.msra.mxu1 %v7774_v37  ;;  %v7837_v36 = vcombine.high %v316_v29, %v320_v30  ;;  %v324_v37 = vld [vmem:[#allocation5 + $0x550] sm:$0xff]  ;;  %v377_v29 = vld [vmem:[#allocation5 + $0x6f8] sm:$0xff] }
 0x1c8   :  { %3580 = vmatprep.subr.bf16.mxu0 %v7781_v38  ;;  %3744 = vmatprep.subr.bf16.mxu1 %v7783_v40  ;;  %v328_v38 = vld [vmem:[#allocation5 + $0x570] sm:$0xff]  ;;  %v325_v40 = vld [vmem:[#allocation5 + $0x558] sm:$0xff] }
 0x1c9   :  { %v7845_v44 = vcombine.high %v324_v37, %v328_v38  ;;  %v7844_v51 = vcombine.low %v324_v37, %v328_v38  ;;  %v7846_v52 = vcombine.low %v325_v40, %v329_v41  ;;  %v385_v37 = vld [vmem:[#allocation5 + $0x738] sm:$0xff] }
 0x1cb   :  { %3581 = vmatpush1.bf16.msra.mxu0 %v7780_v45  ;;  %3745 = vmatpush1.bf16.msra.mxu1 %v7782_v46  ;;  %v7847_v45 = vcombine.high %v325_v40, %v329_v41  ;;  %v332_v46 = vld [vmem:[#allocation5 + $0x590] sm:$0xff] }
 0x1cc   :  { %3582 = vmatprep.subr.bf16.mxu0 %v7789_v47  ;;  %3746 = vmatprep.subr.bf16.mxu1 %v7791_v49  ;;  %v336_v47 = vld [vmem:[#allocation5 + $0x5b0] sm:$0xff]  ;;  %v333_v49 = vld [vmem:[#allocation5 + $0x598] sm:$0xff] }
 0x1cd   :  { %v7853_v53 = vcombine.high %v332_v46, %v336_v47  ;;  %v7852_v61 = vcombine.low %v332_v46, %v336_v47  ;;  %v7854_v62 = vcombine.low %v333_v49, %v337_v50  ;;  %v393_v46 = vld [vmem:[#allocation5 + $0x778] sm:$0xff] }
 0x1cf   :  { %3583 = vmatpush1.bf16.msra.mxu0 %v7788_v55  ;;  %3747 = vmatpush1.bf16.msra.mxu1 %v7790_v56  ;;  %v7855_v55 = vcombine.high %v333_v49, %v337_v50  ;;  %v340_v56 = vld [vmem:[#allocation5 + $0x5d0] sm:$0xff] }
 0x1d0   :  { %3584 = vmatprep.subr.bf16.mxu0 %v7797_v58  ;;  %3748 = vmatprep.subr.bf16.mxu1 %v7799_v59  ;;  %v344_v58 = vld [vmem:[#allocation5 + $0x5f0] sm:$0xff]  ;;  %v341_v59 = vld [vmem:[#allocation5 + $0x5d8] sm:$0xff] }
 0x1d1   :  { %v7861_v63 = vcombine.high %v340_v56, %v344_v58  ;;  %v7860_v5 = vcombine.low %v340_v56, %v344_v58  ;;  %v7862_v6 = vcombine.low %v341_v59, %v345_v60  ;;  %v401_v56 = vld [vmem:[#allocation5 + $0x7b8] sm:$0xff] }
 0x1d3   :  { %3585 = vmatpush1.bf16.msra.mxu0 %v7796_v0  ;;  %3749 = vmatpush1.bf16.msra.mxu1 %v7798_v1  ;;  %v7863_v0 = vcombine.high %v341_v59, %v345_v60  ;;  %v348_v1 = vld [vmem:[#allocation5 + $0x610] sm:$0xff] }
 0x1d4   :  { %3595 = vmatprep.subr.bf16.mxu0 %v7805_v2  ;;  %3759 = vmatprep.subr.bf16.mxu1 %v7807_v3  ;;  %v352_v2 = vld [vmem:[#allocation5 + $0x630] sm:$0xff]  ;;  %v349_v3 = vld [vmem:[#allocation5 + $0x618] sm:$0xff] }
 0x1d5   :  { %v7869_v7 = vcombine.high %v348_v1, %v352_v2  ;;  %v7868_v14 = vcombine.low %v348_v1, %v352_v2  ;;  %v409_v1 = vld [vmem:[#allocation5 + $0x7f8] sm:$0xff] }
 0x1d6   :  { %3587 = vmatmul.mubr.bf16.vlgmr.msra.gmra.mrb[4].mxu0 %v9602_v12  ;;  %3751 = vmatmul.mubr.bf16.vlgmr.msra.gmra.mrb[4].mxu1 %v9602_v12  ;;  %v7822_v12 = vcombine.low %v301_v15, %v305_v16  ;;  %v7870_v15 = vcombine.low %v349_v3, %v353_v4 }
 0x1d7   :  { %3596 = vmatpush1.bf16.msra.mxu0 %v7804_v8  ;;  %3760 = vmatpush1.bf16.msra.mxu1 %v7806_v9  ;;  %v7871_v8 = vcombine.high %v349_v3, %v353_v4  ;;  %v356_v9 = vld [vmem:[#allocation5 + $0x650] sm:$0xff] }
 0x1d8   :  { %3597 = vmatprep.subr.bf16.mxu0 %v7813_v10  ;;  %3761 = vmatprep.subr.bf16.mxu1 %v7815_v11  ;;  %v360_v10 = vld [vmem:[#allocation5 + $0x670] sm:$0xff]  ;;  %v357_v11 = vld [vmem:[#allocation5 + $0x658] sm:$0xff] }
 0x1d9   :  { %3627 = vmatprep.mubr.bf16.mxu0 %v9604_v23  ;;  %3791 = vmatprep.mubr.bf16.mxu1 %v9604_v23  ;;  %v7839_v23 = vcombine.high %v317_v31, %v321_v32  ;;  %v7877_v16 = vcombine.high %v356_v9, %v360_v10  ;;  %v7876_v57 = vcombine.low %v356_v9, %v360_v10  ;;  %v417_v9 = vld [vmem:[#allocation5 + $0x838] sm:$0xff] }
 0x1da   :  { %v7878_v22 = vcombine.low %v357_v11, %v361_v13 }
 0x1db   :  { %3598 = vmatpush1.bf16.msra.mxu0 %v7812_v17  ;;  %3762 = vmatpush1.bf16.msra.mxu1 %v7814_v18  ;;  %v7879_v17 = vcombine.high %v357_v11, %v361_v13  ;;  %v364_v18 = vld [vmem:[#allocation5 + $0x690] sm:$0xff] }
 0x1dc   :  { %3599 = vmatprep.subr.bf16.mxu0 %v7821_v19  ;;  %3763 = vmatprep.subr.bf16.mxu1 %v7823_v20  ;;  %v368_v19 = vld [vmem:[#allocation5 + $0x6b0] sm:$0xff]  ;;  %v365_v20 = vld [vmem:[#allocation5 + $0x698] sm:$0xff] }
 0x1dd   :  { %v7885_v24 = vcombine.high %v364_v18, %v368_v19  ;;  %v7884_v30 = vcombine.low %v364_v18, %v368_v19  ;;  %v7886_v31 = vcombine.low %v365_v20, %v369_v21  ;;  %v425_v18 = vld [vmem:[#allocation5 + $0x878] sm:$0xff] }
 0x1df   :  { %3600 = vmatpush1.bf16.msra.mxu0 %v7820_v26  ;;  %3764 = vmatpush1.bf16.msra.mxu1 %v7822_v12  ;;  %v7887_v26 = vcombine.high %v365_v20, %v369_v21  ;;  %v372_v12 = vld [vmem:[#allocation5 + $0x6d0] sm:$0xff] }
 0x1e0   :  { %3601 = vmatprep.subr.bf16.mxu0 %v7829_v27  ;;  %3765 = vmatprep.subr.bf16.mxu1 %v7831_v28  ;;  %v376_v27 = vld [vmem:[#allocation5 + $0x6f0] sm:$0xff]  ;;  %v373_v28 = vld [vmem:[#allocation5 + $0x6d8] sm:$0xff] }
 0x1e1   :  { %v7893_v32 = vcombine.high %v372_v12, %v376_v27  ;;  %v7892_v38 = vcombine.low %v372_v12, %v376_v27  ;;  %v7894_v40 = vcombine.low %v373_v28, %v377_v29  ;;  %v433_v12 = vld [vmem:[#allocation5 + $0x8b8] sm:$0xff] }
 0x1e3   :  { %3602 = vmatpush1.bf16.msra.mxu0 %v7828_v33  ;;  %3766 = vmatpush1.bf16.msra.mxu1 %v7830_v35  ;;  %v7895_v33 = vcombine.high %v373_v28, %v377_v29  ;;  %v380_v35 = vld [vmem:[#allocation5 + $0x710] sm:$0xff] }
 0x1e4   :  { %3603 = vmatprep.subr.bf16.mxu0 %v7837_v36  ;;  %3767 = vmatprep.subr.bf16.mxu1 %v7839_v23  ;;  %v384_v36 = vld [vmem:[#allocation5 + $0x730] sm:$0xff]  ;;  %v381_v23 = vld [vmem:[#allocation5 + $0x718] sm:$0xff] }
 0x1e5   :  { %v7901_v41 = vcombine.high %v380_v35, %v384_v36  ;;  %v7900_v47 = vcombine.low %v380_v35, %v384_v36  ;;  %v7902_v49 = vcombine.low %v381_v23, %v385_v37  ;;  %v441_v35 = vld [vmem:[#allocation5 + $0x8f8] sm:$0xff] }
 0x1e7   :  { %3604 = vmatpush1.bf16.msra.mxu0 %v7836_v42  ;;  %3768 = vmatpush1.bf16.msra.mxu1 %v7838_v43  ;;  %v7903_v42 = vcombine.high %v381_v23, %v385_v37  ;;  %v388_v43 = vld [vmem:[#allocation5 + $0x750] sm:$0xff] }
 0x1e8   :  { %3605 = vmatprep.subr.bf16.mxu0 %v7845_v44  ;;  %3769 = vmatprep.subr.bf16.mxu1 %v7847_v45  ;;  %v392_v44 = vld [vmem:[#allocation5 + $0x770] sm:$0xff]  ;;  %v389_v45 = vld [vmem:[#allocation5 + $0x758] sm:$0xff] }
 0x1e9   :  { %v7909_v50 = vcombine.high %v388_v43, %v392_v44  ;;  %v7908_v58 = vcombine.low %v388_v43, %v392_v44  ;;  %v7910_v59 = vcombine.low %v389_v45, %v393_v46 }
 0x1eb   :  { %3606 = vmatpush1.bf16.msra.mxu0 %v7844_v51  ;;  %3770 = vmatpush1.bf16.msra.mxu1 %v7846_v52  ;;  %v7911_v51 = vcombine.high %v389_v45, %v393_v46  ;;  %v396_v52 = vld [vmem:[#allocation5 + $0x790] sm:$0xff] }
 0x1ec   :  { %3607 = vmatprep.subr.bf16.mxu0 %v7853_v53  ;;  %3771 = vmatprep.subr.bf16.mxu1 %v7855_v55  ;;  %v400_v53 = vld [vmem:[#allocation5 + $0x7b0] sm:$0xff]  ;;  %v397_v55 = vld [vmem:[#allocation5 + $0x798] sm:$0xff] }
 0x1ed   :  { %v7917_v60 = vcombine.high %v396_v52, %v400_v53  ;;  %v7916_v2 = vcombine.low %v396_v52, %v400_v53  ;;  %v7918_v3 = vcombine.low %v397_v55, %v401_v56  ;;  %v452_v46 = vld [vmem:[#allocation5 + $0x950] sm:$0xff] }
 0x1ef   :  { %3608 = vmatpush1.bf16.msra.mxu0 %v7852_v61  ;;  %3772 = vmatpush1.bf16.msra.mxu1 %v7854_v62  ;;  %v7919_v61 = vcombine.high %v397_v55, %v401_v56  ;;  %v404_v62 = vld [vmem:[#allocation5 + $0x7d0] sm:$0xff] }
 0x1f0   :  { %3609 = vmatprep.subr.bf16.mxu0 %v7861_v63  ;;  %3773 = vmatprep.subr.bf16.mxu1 %v7863_v0  ;;  %v408_v63 = vld [vmem:[#allocation5 + $0x7f0] sm:$0xff]  ;;  %v405_v0 = vld [vmem:[#allocation5 + $0x7d8] sm:$0xff] }
 0x1f1   :  { %v7925_v4 = vcombine.high %v404_v62, %v408_v63  ;;  %v7924_v10 = vcombine.low %v404_v62, %v408_v63  ;;  %v7926_v11 = vcombine.low %v405_v0, %v409_v1  ;;  %v460_v56 = vld [vmem:[#allocation5 + $0x990] sm:$0xff] }
 0x1f3   :  { %3610 = vmatpush1.bf16.msra.mxu0 %v7860_v5  ;;  %3774 = vmatpush1.bf16.msra.mxu1 %v7862_v6  ;;  %v7927_v5 = vcombine.high %v405_v0, %v409_v1  ;;  %v412_v6 = vld [vmem:[#allocation5 + $0x810] sm:$0xff] }
 0x1f4   :  { %3611 = vmatprep.subr.bf16.mxu0 %v7869_v7  ;;  %3775 = vmatprep.subr.bf16.mxu1 %v7871_v8  ;;  %v416_v7 = vld [vmem:[#allocation5 + $0x830] sm:$0xff]  ;;  %v413_v8 = vld [vmem:[#allocation5 + $0x818] sm:$0xff] }
 0x1f5   :  { %v7933_v13 = vcombine.high %v412_v6, %v416_v7  ;;  %v7932_v19 = vcombine.low %v412_v6, %v416_v7  ;;  %v7934_v20 = vcombine.low %v413_v8, %v417_v9  ;;  %v468_v1 = vld [vmem:[#allocation5 + $0x9d0] sm:$0xff] }
 0x1f7   :  { %3612 = vmatpush1.bf16.msra.mxu0 %v7868_v14  ;;  %3776 = vmatpush1.bf16.msra.mxu1 %v7870_v15  ;;  %v7935_v14 = vcombine.high %v413_v8, %v417_v9  ;;  %v420_v15 = vld [vmem:[#allocation5 + $0x850] sm:$0xff] }
 0x1f8   :  { %3613 = vmatprep.subr.bf16.mxu0 %v7877_v16  ;;  %3777 = vmatprep.subr.bf16.mxu1 %v7879_v17  ;;  %v424_v16 = vld [vmem:[#allocation5 + $0x870] sm:$0xff]  ;;  %v421_v17 = vld [vmem:[#allocation5 + $0x858] sm:$0xff] }
 0x1f9   :  { %v7941_v21 = vcombine.high %v420_v15, %v424_v16  ;;  %v7940_v27 = vcombine.low %v420_v15, %v424_v16  ;;  %v7942_v28 = vcombine.low %v421_v17, %v425_v18  ;;  %v476_v9 = vld [vmem:[#allocation5 + $0xa10] sm:$0xff] }
 0x1fb   :  { %3614 = vmatpush1.bf16.msra.mxu0 %v7876_v57  ;;  %3778 = vmatpush1.bf16.msra.mxu1 %v7878_v22  ;;  %v7943_v57 = vcombine.high %v421_v17, %v425_v18  ;;  %v428_v22 = vld [vmem:[#allocation5 + $0x890] sm:$0xff] }
 0x1fc   :  { %3615 = vmatprep.subr.bf16.mxu0 %v7885_v24  ;;  %3779 = vmatprep.subr.bf16.mxu1 %v7887_v26  ;;  %v432_v24 = vld [vmem:[#allocation5 + $0x8b0] sm:$0xff]  ;;  %v429_v26 = vld [vmem:[#allocation5 + $0x898] sm:$0xff] }
 0x1fd   :  { %v7949_v29 = vcombine.high %v428_v22, %v432_v24  ;;  %v7948_v36 = vcombine.low %v428_v22, %v432_v24  ;;  %v484_v18 = vld [vmem:[#allocation5 + $0xa50] sm:$0xff] }
 0x1ff   :  { %3616 = vmatpush1.bf16.msra.mxu0 %v7884_v30  ;;  %3780 = vmatpush1.bf16.msra.mxu1 %v7886_v31  ;;  %v7951_v30 = vcombine.high %v429_v26, %v433_v12  ;;  %v436_v31 = vld [vmem:[#allocation5 + $0x8d0] sm:$0xff] }
 0x200   :  { %3617 = vmatprep.subr.bf16.mxu0 %v7893_v32  ;;  %3781 = vmatprep.subr.bf16.mxu1 %v7895_v33  ;;  %v440_v32 = vld [vmem:[#allocation5 + $0x8f0] sm:$0xff]  ;;  %v437_v33 = vld [vmem:[#allocation5 + $0x8d8] sm:$0xff] }
 0x201   :  { %v7957_v23 = vcombine.high %v436_v31, %v440_v32  ;;  %v7959_v37 = vcombine.high %v437_v33, %v441_v35  ;;  %v7956_v43 = vcombine.low %v436_v31, %v440_v32  ;;  %v7958_v44 = vcombine.low %v437_v33, %v441_v35  ;;  %v500_v35 = vld [vmem:[#allocation5 + $0xad0] sm:$0xff] }
 0x203   :  { %3618 = vmatpush1.bf16.msra.mxu0 %v7892_v38  ;;  %3782 = vmatpush1.bf16.msra.mxu1 %v7894_v40  ;;  %v444_v38 = vld [vmem:[#allocation5 + $0x910] sm:$0xff] }
 0x204   :  { %3619 = vmatprep.subr.bf16.mxu0 %v7901_v41  ;;  %3783 = vmatprep.subr.bf16.mxu1 %v7903_v42  ;;  %v448_v40 = vld [vmem:[#allocation5 + $0x930] sm:$0xff]  ;;  %v445_v41 = vld [vmem:[#allocation5 + $0x918] sm:$0xff] }
 0x205   :  { %v449_v42 = vld [vmem:[#allocation5 + $0x938] sm:$0xff]  ;;  %v7965_v45 = vcombine.high %v444_v38, %v448_v40 }
 0x206   :  { %v7966_v52 = vcombine.low %v445_v41, %v449_v42 }
 0x207   :  { %3620 = vmatpush1.bf16.msra.mxu0 %v7900_v47  ;;  %3784 = vmatpush1.bf16.msra.mxu1 %v7902_v49  ;;  %v456_v47 = vld [vmem:[#allocation5 + $0x970] sm:$0xff]  ;;  %v453_v49 = vld [vmem:[#allocation5 + $0x958] sm:$0xff] }
 0x208   :  { %3621 = vmatprep.subr.bf16.mxu0 %v7909_v50  ;;  %3785 = vmatprep.subr.bf16.mxu1 %v7911_v51  ;;  %v457_v50 = vld [vmem:[#allocation5 + $0x978] sm:$0xff]  ;;  %v7964_v51 = vcombine.low %v444_v38, %v448_v40  ;;  %v7973_v53 = vcombine.high %v452_v46, %v456_v47 }
 0x209   :  { %v7975_v55 = vcombine.high %v453_v49, %v457_v50  ;;  %v7974_v62 = vcombine.low %v453_v49, %v457_v50  ;;  %v516_v50 = vld [vmem:[#allocation5 + $0xb50] sm:$0xff] }
 0x20b   :  { %3622 = vmatpush1.bf16.msra.mxu0 %v7908_v58  ;;  %3786 = vmatpush1.bf16.msra.mxu1 %v7910_v59  ;;  %v464_v58 = vld [vmem:[#allocation5 + $0x9b0] sm:$0xff]  ;;  %v461_v59 = vld [vmem:[#allocation5 + $0x998] sm:$0xff] }
 0x20c   :  { %3623 = vmatprep.subr.bf16.mxu0 %v7917_v60  ;;  %3787 = vmatprep.subr.bf16.mxu1 %v7919_v61  ;;  %v465_v60 = vld [vmem:[#allocation5 + $0x9b8] sm:$0xff]  ;;  %v7972_v61 = vcombine.low %v452_v46, %v456_v47  ;;  %v7981_v63 = vcombine.high %v460_v56, %v464_v58 }
 0x20d   :  { %v7983_v0 = vcombine.high %v461_v59, %v465_v60  ;;  %v7982_v6 = vcombine.low %v461_v59, %v465_v60  ;;  %v524_v60 = vld [vmem:[#allocation5 + $0xb90] sm:$0xff] }
 0x20f   :  { %3624 = vmatpush1.bf16.msra.mxu0 %v7916_v2  ;;  %3788 = vmatpush1.bf16.msra.mxu1 %v7918_v3  ;;  %v472_v2 = vld [vmem:[#allocation5 + $0x9f0] sm:$0xff]  ;;  %v469_v3 = vld [vmem:[#allocation5 + $0x9d8] sm:$0xff] }
 0x210   :  { %3625 = vmatprep.subr.bf16.mxu0 %v7925_v4  ;;  %3789 = vmatprep.subr.bf16.mxu1 %v7927_v5  ;;  %v473_v4 = vld [vmem:[#allocation5 + $0x9f8] sm:$0xff]  ;;  %v7980_v5 = vcombine.low %v460_v56, %v464_v58  ;;  %v7989_v7 = vcombine.high %v468_v1, %v472_v2 }
 0x211   :  { %v7991_v8 = vcombine.high %v469_v3, %v473_v4  ;;  %v7990_v15 = vcombine.low %v469_v3, %v473_v4  ;;  %v532_v4 = vld [vmem:[#allocation5 + $0xbd0] sm:$0xff] }
 0x213   :  { %3626 = vmatpush1.bf16.msra.mxu0 %v7924_v10  ;;  %3790 = vmatpush1.bf16.msra.mxu1 %v7926_v11  ;;  %v480_v10 = vld [vmem:[#allocation5 + $0xa30] sm:$0xff]  ;;  %v477_v11 = vld [vmem:[#allocation5 + $0xa18] sm:$0xff] }
 0x214   :  { %3636 = vmatprep.subr.bf16.mxu0 %v7933_v13  ;;  %3800 = vmatprep.subr.bf16.mxu1 %v7935_v14  ;;  %v481_v13 = vld [vmem:[#allocation5 + $0xa38] sm:$0xff]  ;;  %v7988_v14 = vcombine.low %v468_v1, %v472_v2  ;;  %v7997_v16 = vcombine.high %v476_v9, %v480_v10 }
 0x215   :  { %v7999_v17 = vcombine.high %v477_v11, %v481_v13  ;;  %v7998_v22 = vcombine.low %v477_v11, %v481_v13  ;;  %v540_v13 = vld [vmem:[#allocation5 + $0xc10] sm:$0xff] }
 0x216   :  { %3628 = vmatmul.mubr.bf16.vlgmr.msra.gmra.mrb[4].mxu0 %v9610_v25  ;;  %3792 = vmatmul.mubr.bf16.vlgmr.msra.gmra.mrb[4].mxu1 %v9610_v25  ;;  %v7950_v25 = vcombine.low %v429_v26, %v433_v12  ;;  %v492_v12 = vld [vmem:[#allocation5 + $0xa90] sm:$0xff] }
 0x217   :  { %3637 = vmatpush1.bf16.msra.mxu0 %v7932_v19  ;;  %3801 = vmatpush1.bf16.msra.mxu1 %v7934_v20  ;;  %v488_v19 = vld [vmem:[#allocation5 + $0xa70] sm:$0xff]  ;;  %v485_v20 = vld [vmem:[#allocation5 + $0xa58] sm:$0xff] }
 0x218   :  { %3638 = vmatprep.subr.bf16.mxu0 %v7941_v21  ;;  %3802 = vmatprep.subr.bf16.mxu1 %v7943_v57  ;;  %v489_v21 = vld [vmem:[#allocation5 + $0xa78] sm:$0xff]  ;;  %v7996_v57 = vcombine.low %v476_v9, %v480_v10  ;;  %v8005_v24 = vcombine.high %v484_v18, %v488_v19 }
 0x219   :  { %3668 = vmatprep.mubr.bf16.mxu0 %v9612_v34  ;;  %3832 = vmatprep.mubr.bf16.mxu1 %v9612_v34  ;;  %v7967_v34 = vcombine.high %v445_v41, %v449_v42  ;;  %v8007_v26 = vcombine.high %v485_v20, %v489_v21  ;;  %v8006_v31 = vcombine.low %v485_v20, %v489_v21  ;;  %v508_v42 = vld [vmem:[#allocation5 + $0xb10] sm:$0xff] }
 0x21a   :  { %v548_v21 = vld [vmem:[#allocation5 + $0xc50] sm:$0xff] }
 0x21b   :  { %3639 = vmatpush1.bf16.msra.mxu0 %v7940_v27  ;;  %3803 = vmatpush1.bf16.msra.mxu1 %v7942_v28  ;;  %v496_v27 = vld [vmem:[#allocation5 + $0xab0] sm:$0xff]  ;;  %v493_v28 = vld [vmem:[#allocation5 + $0xa98] sm:$0xff] }
 0x21c   :  { %3640 = vmatprep.subr.bf16.mxu0 %v7949_v29  ;;  %3804 = vmatprep.subr.bf16.mxu1 %v7951_v30  ;;  %v497_v29 = vld [vmem:[#allocation5 + $0xab8] sm:$0xff]  ;;  %v8004_v30 = vcombine.low %v484_v18, %v488_v19  ;;  %v8013_v32 = vcombine.high %v492_v12, %v496_v27 }
 0x21d   :  { %v8015_v33 = vcombine.high %v493_v28, %v497_v29  ;;  %v8014_v38 = vcombine.low %v493_v28, %v497_v29  ;;  %v556_v29 = vld [vmem:[#allocation5 + $0xc90] sm:$0xff] }
 0x21f   :  { %3641 = vmatpush1.bf16.msra.mxu0 %v7948_v36  ;;  %3805 = vmatpush1.bf16.msra.mxu1 %v7950_v25  ;;  %v504_v36 = vld [vmem:[#allocation5 + $0xaf0] sm:$0xff]  ;;  %v501_v25 = vld [vmem:[#allocation5 + $0xad8] sm:$0xff] }
 0x220   :  { %3642 = vmatprep.subr.bf16.mxu0 %v7957_v23  ;;  %3806 = vmatprep.subr.bf16.mxu1 %v7959_v37  ;;  %v505_v23 = vld [vmem:[#allocation5 + $0xaf8] sm:$0xff]  ;;  %v8012_v37 = vcombine.low %v492_v12, %v496_v27  ;;  %v8021_v40 = vcombine.high %v500_v35, %v504_v36 }
 0x221   :  { %v8023_v41 = vcombine.high %v501_v25, %v505_v23  ;;  %v8022_v46 = vcombine.low %v501_v25, %v505_v23  ;;  %v564_v23 = vld [vmem:[#allocation5 + $0xcd0] sm:$0xff] }
 0x223   :  { %3643 = vmatpush1.bf16.msra.mxu0 %v7956_v43  ;;  %3807 = vmatpush1.bf16.msra.mxu1 %v7958_v44  ;;  %v512_v43 = vld [vmem:[#allocation5 + $0xb30] sm:$0xff]  ;;  %v509_v44 = vld [vmem:[#allocation5 + $0xb18] sm:$0xff] }
 0x224   :  { %3644 = vmatprep.subr.bf16.mxu0 %v7965_v45  ;;  %3808 = vmatprep.subr.bf16.mxu1 %v7967_v34  ;;  %v513_v45 = vld [vmem:[#allocation5 + $0xb38] sm:$0xff]  ;;  %v8020_v34 = vcombine.low %v500_v35, %v504_v36  ;;  %v8029_v47 = vcombine.high %v508_v42, %v512_v43 }
 0x225   :  { %v8031_v49 = vcombine.high %v509_v44, %v513_v45  ;;  %v8030_v56 = vcombine.low %v509_v44, %v513_v45  ;;  %v572_v44 = vld [vmem:[#allocation5 + $0xd10] sm:$0xff] }
 0x226   :  { %v576_v45 = vld [vmem:[#allocation5 + $0xd30] sm:$0xff] }
 0x227   :  { %3645 = vmatpush1.bf16.msra.mxu0 %v7964_v51  ;;  %3809 = vmatpush1.bf16.msra.mxu1 %v7966_v52  ;;  %v520_v51 = vld [vmem:[#allocation5 + $0xb70] sm:$0xff]  ;;  %v517_v52 = vld [vmem:[#allocation5 + $0xb58] sm:$0xff] }
 0x228   :  { %3646 = vmatprep.subr.bf16.mxu0 %v7973_v53  ;;  %3810 = vmatprep.subr.bf16.mxu1 %v7975_v55  ;;  %v521_v53 = vld [vmem:[#allocation5 + $0xb78] sm:$0xff]  ;;  %v8028_v55 = vcombine.low %v508_v42, %v512_v43  ;;  %v8037_v58 = vcombine.high %v516_v50, %v520_v51 }
 0x229   :  { %v8039_v59 = vcombine.high %v517_v52, %v521_v53  ;;  %v8038_v1 = vcombine.low %v517_v52, %v521_v53  ;;  %v9648_v52 = vld [vmem:[#allocation5 + $0xd58] sm:$0xff] }
 0x22b   :  { %3647 = vmatpush1.bf16.msra.mxu0 %v7972_v61  ;;  %3811 = vmatpush1.bf16.msra.mxu1 %v7974_v62  ;;  %v528_v61 = vld [vmem:[#allocation5 + $0xbb0] sm:$0xff]  ;;  %v525_v62 = vld [vmem:[#allocation5 + $0xb98] sm:$0xff] }
 0x22c   :  { %3648 = vmatprep.subr.bf16.mxu0 %v7981_v63  ;;  %3812 = vmatprep.subr.bf16.mxu1 %v7983_v0  ;;  %v529_v63 = vld [vmem:[#allocation5 + $0xbb8] sm:$0xff]  ;;  %v8036_v0 = vcombine.low %v516_v50, %v520_v51  ;;  %v8045_v2 = vcombine.high %v524_v60, %v528_v61  ;;  %v8093_v50 = vcombine.high %v572_v44, %v576_v45  ;;  %v9644_v51 = vld [vmem:[#allocation5 + $0xd50] sm:$0xff] }
 0x22d   :  { %v8047_v3 = vcombine.high %v525_v62, %v529_v63  ;;  %v8046_v9 = vcombine.low %v525_v62, %v529_v63  ;;  %v8092_v62 = vcombine.low %v572_v44, %v576_v45  ;;  %v9662_v63 = vld [vmem:[#allocation5 + $0xdf0] sm:$0xff] }
 0x22f   :  { %3649 = vmatpush1.bf16.msra.mxu0 %v7980_v5  ;;  %3813 = vmatpush1.bf16.msra.mxu1 %v7982_v6  ;;  %v536_v5 = vld [vmem:[#allocation5 + $0xbf0] sm:$0xff]  ;;  %v533_v6 = vld [vmem:[#allocation5 + $0xbd8] sm:$0xff] }
 0x230   :  { %3650 = vmatprep.subr.bf16.mxu0 %v7989_v7  ;;  %3814 = vmatprep.subr.bf16.mxu1 %v7991_v8  ;;  %v537_v7 = vld [vmem:[#allocation5 + $0xbf8] sm:$0xff]  ;;  %v8044_v8 = vcombine.low %v524_v60, %v528_v61  ;;  %v8053_v10 = vcombine.high %v532_v4, %v536_v5  ;;  %v9660_v61 = vld [vmem:[#allocation5 + $0xdd0] sm:$0xff] }
 0x231   :  { %v8055_v11 = vcombine.high %v533_v6, %v537_v7  ;;  %v8054_v18 = vcombine.low %v533_v6, %v537_v7  ;;  %v9658_v60 = vld [vmem:[#allocation5 + $0xdb8] sm:$0xff] }
 0x232   :  { %v9674_v6 = vld [vmem:[#allocation5 + $0xe18] sm:$0xff] }
 0x233   :  { %3651 = vmatpush1.bf16.msra.mxu0 %v7988_v14  ;;  %3815 = vmatpush1.bf16.msra.mxu1 %v7990_v15  ;;  %v544_v14 = vld [vmem:[#allocation5 + $0xc30] sm:$0xff]  ;;  %v541_v15 = vld [vmem:[#allocation5 + $0xc18] sm:$0xff] }
 0x234   :  { %3652 = vmatprep.subr.bf16.mxu0 %v7997_v16  ;;  %3816 = vmatprep.subr.bf16.mxu1 %v7999_v17  ;;  %v545_v16 = vld [vmem:[#allocation5 + $0xc38] sm:$0xff]  ;;  %v8052_v17 = vcombine.low %v532_v4, %v536_v5  ;;  %v8061_v19 = vcombine.high %v540_v13, %v544_v14  ;;  %v9670_v4 = vld [vmem:[#allocation5 + $0xe10] sm:$0xff] }
 0x235   :  { %v8063_v20 = vcombine.high %v541_v15, %v545_v16  ;;  %v8062_v12 = vcombine.low %v541_v15, %v545_v16  ;;  %v9672_v5 = vld [vmem:[#allocation5 + $0xe30] sm:$0xff] }
 0x237   :  { %3653 = vmatpush1.bf16.msra.mxu0 %v7996_v57  ;;  %3817 = vmatpush1.bf16.msra.mxu1 %v7998_v22  ;;  %v552_v57 = vld [vmem:[#allocation5 + $0xc70] sm:$0xff]  ;;  %v549_v22 = vld [vmem:[#allocation5 + $0xc58] sm:$0xff] }
 0x238   :  { %3654 = vmatprep.subr.bf16.mxu0 %v8005_v24  ;;  %3818 = vmatprep.subr.bf16.mxu1 %v8007_v26  ;;  %v553_v24 = vld [vmem:[#allocation5 + $0xc78] sm:$0xff]  ;;  %v8060_v26 = vcombine.low %v540_v13, %v544_v14  ;;  %v8069_v27 = vcombine.high %v548_v21, %v552_v57  ;;  %v9686_v13 = vld [vmem:[#allocation5 + $0xe50] sm:$0xff] }
 0x239   :  { %v8071_v28 = vcombine.high %v549_v22, %v553_v24  ;;  %v8070_v35 = vcombine.low %v549_v22, %v553_v24  ;;  %v9688_v14 = vld [vmem:[#allocation5 + $0xe70] sm:$0xff] }
 0x23b   :  { %3655 = vmatpush1.bf16.msra.mxu0 %v8004_v30  ;;  %3819 = vmatpush1.bf16.msra.mxu1 %v8006_v31  ;;  %v560_v30 = vld [vmem:[#allocation5 + $0xcb0] sm:$0xff]  ;;  %v557_v31 = vld [vmem:[#allocation5 + $0xc98] sm:$0xff] }
 0x23c   :  { %3656 = vmatprep.subr.bf16.mxu0 %v8013_v32  ;;  %3820 = vmatprep.subr.bf16.mxu1 %v8015_v33  ;;  %v561_v32 = vld [vmem:[#allocation5 + $0xcb8] sm:$0xff]  ;;  %v8068_v33 = vcombine.low %v548_v21, %v552_v57  ;;  %v8077_v36 = vcombine.high %v556_v29, %v560_v30  ;;  %v9702_v21 = vld [vmem:[#allocation5 + $0xe90] sm:$0xff]  ;;  %v8116_v57 = vcombine.low %v9660_v61, %v9662_v63 }
 0x23d   :  { %v8079_v25 = vcombine.high %v557_v31, %v561_v32 }
 0x23f   :  { %3657 = vmatpush1.bf16.msra.mxu0 %v8012_v37  ;;  %3821 = vmatpush1.bf16.msra.mxu1 %v8014_v38  ;;  %v568_v37 = vld [vmem:[#allocation5 + $0xcf0] sm:$0xff]  ;;  %v565_v38 = vld [vmem:[#allocation5 + $0xcd8] sm:$0xff] }
 0x240   :  { %3658 = vmatprep.subr.bf16.mxu0 %v8021_v40  ;;  %3822 = vmatprep.subr.bf16.mxu1 %v8023_v41  ;;  %v569_v40 = vld [vmem:[#allocation5 + $0xcf8] sm:$0xff]  ;;  %v8076_v41 = vcombine.low %v556_v29, %v560_v30  ;;  %v8085_v42 = vcombine.high %v564_v23, %v568_v37  ;;  %v8124_v29 = vcombine.low %v9670_v4, %v9672_v5 }
 0x241   :  { %v8087_v43 = vcombine.high %v565_v38, %v569_v40 }
 0x243   :  { %3659 = vmatpush1.bf16.msra.mxu0 %v8020_v34  ;;  %3823 = vmatpush1.bf16.msra.mxu1 %v8022_v46  ;;  %v573_v34 = vld [vmem:[#allocation5 + $0xd18] sm:$0xff] }
 0x244   :  { %3660 = vmatprep.subr.bf16.mxu0 %v8029_v47  ;;  %3824 = vmatprep.subr.bf16.mxu1 %v8031_v49  ;;  %v577_v46 = vld [vmem:[#allocation5 + $0xd38] sm:$0xff]  ;;  %v8084_v47 = vcombine.low %v564_v23, %v568_v37  ;;  %v8086_v49 = vcombine.low %v565_v38, %v569_v40 }
 0x245   :  { %v8095_v53 = vcombine.high %v573_v34, %v577_v46 }
 0x247   :  { %3661 = vmatpush1.bf16.msra.mxu0 %v8028_v55  ;;  %3825 = vmatpush1.bf16.msra.mxu1 %v8030_v56  ;;  %v9650_v55 = vld [vmem:[#allocation5 + $0xd78] sm:$0xff]  ;;  %v9652_v56 = vld [vmem:[#allocation5 + $0xd90] sm:$0xff] }
 0x248   :  { %3662 = vmatprep.subr.bf16.mxu0 %v8037_v58  ;;  %3826 = vmatprep.subr.bf16.mxu1 %v8039_v59  ;;  %v9654_v58 = vld [vmem:[#allocation5 + $0xdb0] sm:$0xff]  ;;  %v9656_v59 = vld [vmem:[#allocation5 + $0xd98] sm:$0xff] }
 0x249   :  { %v8108_v15 = vcombine.low %v9652_v56, %v9654_v58  ;;  %v8110_v16 = vcombine.low %v9656_v59, %v9658_v60 }
 0x24b   :  { %3663 = vmatpush1.bf16.msra.mxu0 %v8036_v0  ;;  %3827 = vmatpush1.bf16.msra.mxu1 %v8038_v1  ;;  %v9664_v0 = vld [vmem:[#allocation5 + $0xdd8] sm:$0xff] }
 0x24c   :  { %3664 = vmatprep.subr.bf16.mxu0 %v8045_v2  ;;  %3828 = vmatprep.subr.bf16.mxu1 %v8047_v3  ;;  %v9666_v1 = vld [vmem:[#allocation5 + $0xdf8] sm:$0xff]  ;;  %v8094_v2 = vcombine.low %v573_v34, %v577_v46 }
 0x24d   :  { %v8118_v22 = vcombine.low %v9664_v0, %v9666_v1  ;;  %v8119_v24 = vcombine.high %v9664_v0, %v9666_v1 }
 0x24f   :  { %3665 = vmatpush1.bf16.msra.mxu0 %v8044_v8  ;;  %3829 = vmatpush1.bf16.msra.mxu1 %v8046_v9  ;;  %v8102_v8 = vcombine.low %v9648_v52, %v9650_v55  ;;  %v8103_v9 = vcombine.high %v9648_v52, %v9650_v55 }
 0x250   :  { %3666 = vmatprep.subr.bf16.mxu0 %v8053_v10  ;;  %3830 = vmatprep.subr.bf16.mxu1 %v8055_v11  ;;  %v8109_v10 = vcombine.high %v9652_v56, %v9654_v58  ;;  %v9684_v11 = vld [vmem:[#allocation5 + $0xe38] sm:$0xff] }
 0x251   :  { %v8126_v30 = vcombine.low %v9674_v6, %v9684_v11 }
 0x253   :  { %3667 = vmatpush1.bf16.msra.mxu0 %v8052_v17  ;;  %3831 = vmatpush1.bf16.msra.mxu1 %v8054_v18  ;;  %v8111_v17 = vcombine.high %v9656_v59, %v9658_v60  ;;  %v8117_v18 = vcombine.high %v9660_v61, %v9662_v63 }
 0x254   :  { %3677 = vmatprep.subr.bf16.mxu0 %v8061_v19  ;;  %3841 = vmatprep.subr.bf16.mxu1 %v8063_v20  ;;  %v9698_v19 = vld [vmem:[#allocation5 + $0xe58] sm:$0xff] }
 0x255   :  { %v9700_v20 = vld [vmem:[#allocation5 + $0xe78] sm:$0xff] }
 0x256   :  { %3669 = vmatmul.mubr.bf16.vlgmr.msra.gmra.mrb[4].mxu0 %v9618_v39  ;;  %3833 = vmatmul.mubr.bf16.vlgmr.msra.gmra.mrb[4].mxu1 %v9618_v39  ;;  %v8078_v39 = vcombine.low %v557_v31, %v561_v32  ;;  %v8127_v31 = vcombine.high %v9674_v6, %v9684_v11 }
 0x257   :  { %3678 = vmatpush1.bf16.msra.mxu0 %v8060_v26  ;;  %3842 = vmatpush1.bf16.msra.mxu1 %v8062_v12  ;;  %v8125_v26 = vcombine.high %v9670_v4, %v9672_v5  ;;  %v9712_v12 = vld [vmem:[#allocation5 + $0xeb0] sm:$0xff] }
 0x258   :  { %3679 = vmatprep.subr.bf16.mxu0 %v8069_v27  ;;  %3843 = vmatprep.subr.bf16.mxu1 %v8071_v28  ;;  %v9714_v27 = vld [vmem:[#allocation5 + $0xe98] sm:$0xff] }
 0x259   :  { %3709 = vmatprep.mubr.bf16.mxu0 %v9620_v48  ;;  %3873 = vmatprep.mubr.bf16.mxu1 %v9620_v48  ;;  %v9646_v48 = vld [vmem:[#allocation5 + $0xd70] sm:$0xff]  ;;  %v9716_v28 = vld [vmem:[#allocation5 + $0xeb8] sm:$0xff] }
 0x25a   :  { %v8101_v3 = vcombine.high %v9644_v51, %v9646_v48  ;;  %v8100_v7 = vcombine.low %v9644_v51, %v9646_v48 }
 0x25b   :  { %3680 = vmatpush1.bf16.msra.mxu0 %v8068_v33  ;;  %3844 = vmatpush1.bf16.msra.mxu1 %v8070_v35  ;;  %v8132_v33 = vcombine.low %v9686_v13, %v9688_v14  ;;  %v8133_v35 = vcombine.high %v9686_v13, %v9688_v14  ;;  %v10118_v14 = vcombine.high %v9714_v27, %v9716_v28 }
 0x25c   :  { %3681 = vmatprep.subr.bf16.mxu0 %v8077_v36  ;;  %3845 = vmatprep.subr.bf16.mxu1 %v8079_v25  ;;  %v8134_v36 = vcombine.low %v9698_v19, %v9700_v20  ;;  %v8135_v25 = vcombine.high %v9698_v19, %v9700_v20  ;;  %v637_v20 = vld [vmem:[#allocation5 + $0xf18] sm:$0xff] }
 0x25f   :  { %3682 = vmatpush1.bf16.msra.mxu0 %v8076_v41  ;;  %3846 = vmatpush1.bf16.msra.mxu1 %v8078_v39  ;;  %v8141_v41 = vcombine.high %v9702_v21, %v9712_v12 }
 0x260   :  { %3683 = vmatprep.subr.bf16.mxu0 %v8085_v42  ;;  %3847 = vmatprep.subr.bf16.mxu1 %v8087_v43 }
 0x263   :  { %3684 = vmatpush1.bf16.msra.mxu0 %v8084_v47  ;;  %3848 = vmatpush1.bf16.msra.mxu1 %v8086_v49 }
 0x264   :  { %3685 = vmatprep.subr.bf16.mxu0 %v8093_v50  ;;  %3849 = vmatprep.subr.bf16.mxu1 %v8095_v53 }
 0x267   :  { %3686 = vmatpush1.bf16.msra.mxu0 %v8092_v62  ;;  %3850 = vmatpush1.bf16.msra.mxu1 %v8094_v2 }
 0x268   :  { %3687 = vmatprep.subr.bf16.mxu0 %v8101_v3  ;;  %3851 = vmatprep.subr.bf16.mxu1 %v8103_v9 }
 0x269   :  { %v9724_v32 = vpop.f32.mrb[0].mxu0  ;;  %v9737_v38 = vpop.f32.mrb[0].mxu1 }
 0x26a   :  { %v3882_v23 = vrot.slane %v9724_v32, 4  ;;  %v3939_v37 = vmul.f32 %v9724_v32, %v9724_v32  ;;  %v9739_v40 = vpop.f32.mrb[1].mxu0  ;;  %v3894_v42 = vrot.slane %v9737_v38, 4  ;;  %v3941_v43 = vmul.f32 %v9737_v38, %v9737_v38  ;;  %v9751_v34 = vpop.f32.mrb[1].mxu1 }
 0x26b   :  { %v3888_v44 = vrot.slane %v9739_v40, 4  ;;  %v3940_v45 = vmul.f32 %v9739_v40, %v9739_v40  ;;  %v3387_v46 = vpop.f32.mrb[2].mxu0  ;;  %3688 = vmatpush1.bf16.msra.mxu0 %v8100_v7  ;;  %v3900_v50 = vrot.slane %v9751_v34, 4  ;;  %v3942_v51 = vmul.f32 %v9751_v34, %v9751_v34  ;;  %v3551_v48 = vpop.f32.mrb[2].mxu1  ;;  %3852 = vmatpush1.bf16.msra.mxu1 %v8102_v8 }
 0x26c   :  { %v3883_v47 = vadd.f32 %v3882_v23, %v9724_v32  ;;  %v3947_v49 = vrot.slane %v3939_v37, 4  ;;  %v3388_v52 = vpop.f32.mrb[3].mxu0  ;;  %3689 = vmatprep.subr.bf16.mxu0 %v8109_v10  ;;  %v3895_v53 = vadd.f32 %v3894_v42, %v9737_v38  ;;  %v3959_v55 = vrot.slane %v3941_v43, 4  ;;  %v3552_v62 = vpop.f32.mrb[3].mxu1  ;;  %3853 = vmatprep.subr.bf16.mxu1 %v8111_v17 }
 0x26d   :  { %v3889_v56 = vadd.f32 %v3888_v44, %v9739_v40  ;;  %v3953_v58 = vrot.slane %v3940_v45, 4  ;;  %v3901_v7 = vadd.f32 %v3900_v50, %v9751_v34  ;;  %v3965_v9 = vrot.slane %v3942_v51, 4 }
 0x26e   :  { %v3884_v2 = vrot.slane %v3883_v47, 2  ;;  %v3948_v3 = vadd.f32 %v3947_v49, %v3939_v37  ;;  %v3896_v23 = vrot.slane %v3895_v53, 2  ;;  %v3960_v46 = vadd.f32 %v3959_v55, %v3941_v43 }
 0x26f   :  { %v3890_v39 = vrot.slane %v3889_v56, 2  ;;  %v3954_v48 = vadd.f32 %v3953_v58, %v3940_v45  ;;  %3690 = vmatpush1.bf16.msra.mxu0 %v8108_v15  ;;  %v3902_v52 = vrot.slane %v3901_v7, 2  ;;  %v3966_v42 = vadd.f32 %v3965_v9, %v3942_v51  ;;  %3854 = vmatpush1.bf16.msra.mxu1 %v8110_v16 }
 0x270   :  { %v3885_v8 = vadd.f32 %v3884_v2, %v3883_v47  ;;  %v3949_v10 = vrot.slane %v3948_v3, 2  ;;  %3691 = vmatprep.subr.bf16.mxu0 %v8117_v18  ;;  %v3897_v17 = vadd.f32 %v3896_v23, %v3895_v53  ;;  %v3961_v37 = vrot.slane %v3960_v46, 2  ;;  %3855 = vmatprep.subr.bf16.mxu1 %v8119_v24  ;;  %v628_v23 = vld [vmem:[#allocation5 + $0xed0] sm:$0xff] }
 0x271   :  { %v3891_v44 = vadd.f32 %v3890_v39, %v3889_v56  ;;  %v3955_v49 = vrot.slane %v3954_v48, 2  ;;  %v3903_v15 = vadd.f32 %v3902_v52, %v3901_v7  ;;  %v3967_v47 = vrot.slane %v3966_v42, 2 }
 0x272   :  { %v3886_v43 = vrot.slane %v3885_v8, 1  ;;  %v3950_v45 = vadd.f32 %v3949_v10, %v3948_v3  ;;  %v3898_v50 = vrot.slane %v3897_v17, 1  ;;  %v3962_v55 = vadd.f32 %v3961_v37, %v3960_v46  ;;  %v632_v46 = vld [vmem:[#allocation5 + $0xef0] sm:$0xff] }
 0x273   :  { %v3892_v51 = vrot.slane %v3891_v44, 1  ;;  %v3956_v58 = vadd.f32 %v3955_v49, %v3954_v48  ;;  %3692 = vmatpush1.bf16.msra.mxu0 %v8116_v57  ;;  %v3904_v16 = vrot.slane %v3903_v15, 1  ;;  %v3968_v18 = vadd.f32 %v3967_v47, %v3966_v42  ;;  %3856 = vmatpush1.bf16.msra.mxu1 %v8118_v22  ;;  %v633_v48 = vld [vmem:[#allocation5 + $0xef8] sm:$0xff]  ;;  %v636_v49 = vld [vmem:[#allocation5 + $0xf10] sm:$0xff] }
 0x274   :  { %v3887_v59 = vadd.f32 %v3886_v43, %v3885_v8  ;;  %v3951_v60 = vrot.slane %v3950_v45, 1  ;;  %3693 = vmatprep.subr.bf16.mxu0 %v8125_v26  ;;  %v3899_v24 = vadd.f32 %v3898_v50, %v3897_v17  ;;  %v3963_v39 = vrot.slane %v3962_v55, 1  ;;  %3857 = vmatprep.subr.bf16.mxu1 %v8127_v31  ;;  %v640_v43 = vld [vmem:[#allocation5 + $0xf30] sm:$0xff] }
 0x275   :  { %v3893_v53 = vadd.f32 %v3892_v51, %v3891_v44  ;;  %v3957_v56 = vrot.slane %v3956_v58, 1  ;;  %v3905_v57 = vadd.f32 %v3904_v16, %v3903_v15  ;;  %v3969_v62 = vrot.slane %v3968_v18, 1  ;;  %v645_v51 = vld [vmem:[#allocation5 + $0xf58] sm:$0xff] }
 0x276   :  { %v9778_v61 = vmul.f32 0.125, %v3887_v59  ;;  %v3952_v63 = vadd.f32 %v3951_v60, %v3950_v45  ;;  %v9780_v2 = vmul.f32 0.125, %v3899_v24  ;;  %v3964_v0 = vadd.f32 %v3963_v39, %v3962_v55  ;;  %v648_v55 = vld [vmem:[#allocation5 + $0xf70] sm:$0xff] }
 0x277   :  { %v9782_v1 = vmul.f32 0.125, %v3893_v53  ;;  %v3958_v22 = vadd.f32 %v3957_v56, %v3956_v58  ;;  %3694 = vmatpush1.bf16.msra.mxu0 %v8124_v29  ;;  %v9789_v31 = vmul.f32 0.125, %v3905_v57  ;;  %v3970_v7 = vadd.f32 %v3969_v62, %v3968_v18  ;;  %3858 = vmatpush1.bf16.msra.mxu1 %v8126_v30  ;;  %v649_v58 = vld [vmem:[#allocation5 + $0xf78] sm:$0xff]  ;;  %v652_v56 = vld [vmem:[#allocation5 + $0xf90] sm:$0xff] }
 0x278   :  { %v3995_v26 = vmul.f32 0.125, %v3952_v63  ;;  %v4003_v3 = vmul.f32 %v9778_v61, %v9778_v61  ;;  %3695 = vmatprep.subr.bf16.mxu0 %v8133_v35  ;;  %v3997_v9 = vmul.f32 0.125, %v3964_v0  ;;  %v4005_v4 = vmul.f32 %v9780_v2, %v9780_v2  ;;  %3859 = vmatprep.subr.bf16.mxu1 %v8135_v25  ;;  %v629_v35 = vld [vmem:[#allocation5 + $0xed8] sm:$0xff]  ;;  %v656_v63 = vld [vmem:[#allocation5 + $0xfb0] sm:$0xff] }
 0x279   :  { %v3996_v5 = vmul.f32 0.125, %v3958_v22  ;;  %v4004_v29 = vmul.f32 %v9782_v1, %v9782_v1  ;;  %v3998_v11 = vmul.f32 0.125, %v3970_v7  ;;  %v4006_v30 = vmul.f32 %v9789_v31, %v9789_v31  ;;  %v653_v57 = vld [vmem:[#allocation5 + $0xf98] sm:$0xff] }
 0x27a   :  { %v4011_v6 = vsub.f32 %v3995_v26, %v4003_v3  ;;  %v4013_v8 = vsub.f32 %v3997_v9, %v4005_v4  ;;  %v8140_v52 = vcombine.low %v9702_v21, %v9712_v12  ;;  %v8142_v17 = vcombine.low %v9714_v27, %v9716_v28  ;;  %v644_v28 = vld [vmem:[#allocation5 + $0xf50] sm:$0xff]  ;;  %v657_v62 = vld [vmem:[#allocation5 + $0xfb8] sm:$0xff] }
 0x27b   :  { %v4012_v10 = vsub.f32 %v3996_v5, %v4004_v29  ;;  %3696 = vmatpush1.bf16.msra.mxu0 %v8132_v33  ;;  %v4014_v25 = vsub.f32 %v3998_v11, %v4006_v30  ;;  %3860 = vmatpush1.bf16.msra.mxu1 %v8134_v36  ;;  %v8149_v37 = vcombine.high %v628_v23, %v632_v46  ;;  %v641_v36 = vld [vmem:[#allocation5 + $0xf38] sm:$0xff]  ;;  %v9443_v59 = vmov 1966171168   ;;  %v660_v4 = vld [vmem:[#allocation5 + $0xfd0] sm:$0xff] }
 0x27c   :  { %v4019_v42 = vmax.f32 %v4011_v6, 0.0  ;;  %3697 = vmatprep.subr.bf16.mxu0 %v8141_v41  ;;  %v4021_v44 = vmax.f32 %v4013_v8, 0.0  ;;  %3861 = vmatprep.subr.bf16.mxu1 %v10118_v14  ;;  %v8151_v33 = vcombine.high %v629_v35, %v633_v48  ;;  %v8148_v12 = vcombine.low %v628_v23, %v632_v46  ;;  %v664_v5 = vld [vmem:[#allocation5 + $0xff0] sm:$0xff]  ;;  %v661_v23 = vld [vmem:[#allocation5 + $0xfd8] sm:$0xff] }
 0x27d   :  { %v4020_v13 = vmax.f32 %v4012_v10, 0.0  ;;  %v4022_v19 = vmax.f32 %v4014_v25, 0.0  ;;  %v8150_v41 = vcombine.low %v629_v35, %v633_v48  ;;  %v8157_v50 = vcombine.high %v636_v49, %v640_v43  ;;  %v665_v46 = vld [vmem:[#allocation5 + $0xff8] sm:$0xff] }
 0x27e   :  { %v4027_v45 = vadd.f32 1e-05, %v4019_v42  ;;  %v4029_v15 = vadd.f32 1e-05, %v4021_v44  ;;  %v8159_v27 = vcombine.high %v637_v20, %v641_v36  ;;  %v4056_v60 = vunpack.c.l.s4 %v9443_v59  ;;  %v8654_v59 = vld [vmem:[#allocation7 + $0x88] ss:$16 sps:$4 sm:$0xff]  }
 0x27f   :  { %v4028_v21 = vadd.f32 1e-05, %v4020_v13  ;;  %3698 = vmatpush1.bf16.msra.mxu0 %v8140_v52  ;;  %v4030_v47 = vadd.f32 1e-05, %v4022_v19  ;;  %3862 = vmatpush1.bf16.msra.mxu1 %v8142_v17  ;;  %v4058_v16 = vlaneseq  ;;  %v8156_v18 = vcombine.low %v636_v49, %v640_v43  ;;  %v8632_v49 = vld [vmem:[#allocation7 + $0xc] ss:$16 sps:$4 sm:$0xff]  }
 0x280   :  { %9123 = vrsqrt.f32 %v4027_v45  ;;  %3699 = vmatprep.subr.bf16.mxu0 %v8149_v37  ;;  %3863 = vmatprep.subr.bf16.mxu1 %v8151_v33  ;;  %v8158_v24 = vcombine.low %v637_v20, %v641_v36  ;;  %v8165_v39 = vcombine.high %v644_v28, %v648_v55  ;;  %v8167_v53 = vcombine.high %v645_v51, %v649_v58  ;;  %v8629_v33 = vld [vmem:[#allocation7 + $0x4] ss:$16 sps:$4 sm:$0xff]   ;;  %v8627_v43 = vld [vmem:[#allocation7] ss:$16 sps:$4 sm:$0xff]   ;;  %v8630_v45 = vld [vmem:[#allocation7 + $0x8] ss:$16 sps:$4 sm:$0xff]  }
 0x281   :  { %9125 = vrsqrt.f32 %v4029_v15  ;;  %v4057_v0 = vunpack.c.0.s8 %v4056_v60  ;;  %v9822_v22 = vshrl.u32 %v4058_v16, 7  ;;  %v8164_v26 = vcombine.low %v644_v28, %v648_v55  ;;  %v8635_v19 = vld [vmem:[#allocation7 + $0x24] ss:$16 sps:$4 sm:$0xff]   ;;  %v8638_v20 = vld [vmem:[#allocation7 + $0x2c] ss:$16 sps:$4 sm:$0xff]  }
 0x282   :  { %9127 = vrsqrt.f32 %v4028_v21  ;;  %v8166_v3 = vcombine.low %v645_v51, %v649_v58  ;;  %v8173_v7 = vcombine.high %v652_v56, %v656_v63  ;;  %v8175_v9 = vcombine.high %v653_v57, %v657_v62  ;;  %v8633_v36 = vld [vmem:[#allocation7 + $0x20] ss:$16 sps:$4 sm:$0xff]   ;;  %v8636_v15 = vld [vmem:[#allocation7 + $0x28] ss:$16 sps:$4 sm:$0xff]   ;;  %v8641_v21 = vld [vmem:[#allocation7 + $0x44] ss:$16 sps:$4 sm:$0xff]  }
 0x283   :  { %9129 = vrsqrt.f32 %v4030_v47  ;;  %3700 = vmatpush1.bf16.msra.mxu0 %v8148_v12  ;;  %3864 = vmatpush1.bf16.msra.mxu1 %v8150_v41  ;;  %v9825_v11 = vsub.s32 %v4057_v0, %v9822_v22  ;;  %v8172_v30 = vcombine.low %v652_v56, %v656_v63  ;;  %v8174_v48 = vcombine.low %v653_v57, %v657_v62  ;;  %v8644_v12 = vld [vmem:[#allocation7 + $0x4c] ss:$16 sps:$4 sm:$0xff]   ;;  %v8639_v41 = vld [vmem:[#allocation7 + $0x40] ss:$16 sps:$4 sm:$0xff]   ;;  %v8647_v47 = vld [vmem:[#allocation7 + $0x64] ss:$16 sps:$4 sm:$0xff]  }
 0x284   :  { %3701 = vmatprep.subr.bf16.mxu0 %v8157_v50  ;;  %3865 = vmatprep.subr.bf16.mxu1 %v8159_v27  ;;  %v8181_v8 = vcombine.high %v660_v4, %v664_v5  ;;  %v8183_v42 = vcombine.high %v661_v23, %v665_v46  ;;  %v8180_v37 = vcombine.low %v660_v4, %v664_v5  ;;  %v8645_v50 = vld [vmem:[#allocation7 + $0x60] ss:$16 sps:$4 sm:$0xff]   ;;  %v8648_v27 = vld [vmem:[#allocation7 + $0x68] ss:$16 sps:$4 sm:$0xff]   ;;  %v8650_v28 = vld [vmem:[#allocation7 + $0x6c] ss:$16 sps:$4 sm:$0xff]  }
 0x285   :  { %v8182_v13 = vcombine.low %v661_v23, %v665_v46  ;;  %v8653_v55 = vld [vmem:[#allocation7 + $0x84] ss:$16 sps:$4 sm:$0xff]   ;;  %v8656_v51 = vld [vmem:[#allocation7 + $0x8c] ss:$16 sps:$4 sm:$0xff]   ;;  %v8651_v58 = vld [vmem:[#allocation7 + $0x80] ss:$16 sps:$4 sm:$0xff]  }
 0x286   :  { %v8659_v60 = vld [vmem:[#allocation7 + $0xa4] ss:$16 sps:$4 sm:$0xff]   ;;  %v8662_v16 = vld [vmem:[#allocation7 + $0xac] ss:$16 sps:$4 sm:$0xff]   ;;  %v8663_v56 = vld [vmem:[#allocation7 + $0xc0] ss:$16 sps:$4 sm:$0xff]  }
 0x287   :  { %3702 = vmatpush1.bf16.msra.mxu0 %v8156_v18  ;;  %3866 = vmatpush1.bf16.msra.mxu1 %v8158_v24  ;;  %v8657_v18 = vld [vmem:[#allocation7 + $0xa0] ss:$16 sps:$4 sm:$0xff]   ;;  %v8660_v24 = vld [vmem:[#allocation7 + $0xa8] ss:$16 sps:$4 sm:$0xff]   ;;  %v8671_v57 = vld [vmem:[#allocation7 + $0xe4] ss:$16 sps:$4 sm:$0xff]  }
 0x288   :  { %3703 = vmatprep.subr.bf16.mxu0 %v8165_v39  ;;  %3867 = vmatprep.subr.bf16.mxu1 %v8167_v53  ;;  %v8665_v39 = vld [vmem:[#allocation7 + $0xc4] ss:$16 sps:$4 sm:$0xff]   ;;  %v8668_v53 = vld [vmem:[#allocation7 + $0xcc] ss:$16 sps:$4 sm:$0xff]   ;;  %v8666_v63 = vld [vmem:[#allocation7 + $0xc8] ss:$16 sps:$4 sm:$0xff]  }
 0x289   :  { %v8674_v62 = vld [vmem:[#allocation7 + $0xec] ss:$16 sps:$4 sm:$0xff]   ;;  %v8669_v0 = vld [vmem:[#allocation7 + $0xe0] ss:$16 sps:$4 sm:$0xff]   ;;  %v8678_v4 = vld [vmem:[#allocation7 + $0x108] ss:$16 sps:$4 sm:$0xff]  }
 0x28a   :  { %v9124_v29 = vpop.eup %9123  ;;  %v8683_v5 = vld [vmem:[#allocation7 + $0x124] ss:$16 sps:$4 sm:$0xff]   ;;  %v8681_v23 = vld [vmem:[#allocation7 + $0x120] ss:$16 sps:$4 sm:$0xff]   ;;  %v8684_v46 = vld [vmem:[#allocation7 + $0x128] ss:$16 sps:$4 sm:$0xff]  }
 0x28b   :  { %v9126_v6 = vpop.eup %9125  ;;  %3704 = vmatpush1.bf16.msra.mxu0 %v8164_v26  ;;  %3868 = vmatpush1.bf16.msra.mxu1 %v8166_v3  ;;  %v8672_v26 = vld [vmem:[#allocation7 + $0xe8] ss:$16 sps:$4 sm:$0xff]   ;;  %v8677_v3 = vld [vmem:[#allocation7 + $0x104] ss:$16 sps:$4 sm:$0xff]  }
 0x28c   :  { %v9128_v35 = vpop.eup %9127  ;;  %3705 = vmatprep.subr.bf16.mxu0 %v8173_v7  ;;  %3869 = vmatprep.subr.bf16.mxu1 %v8175_v9  ;;  %v8680_v7 = vld [vmem:[#allocation7 + $0x10c] ss:$16 sps:$4 sm:$0xff]   ;;  %v8675_v9 = vld [vmem:[#allocation7 + $0x100] ss:$16 sps:$4 sm:$0xff]  }
 0x28d   :  { %v9130_v10 = vpop.eup %9129  ;;  %v4051_v52 = vcombine.low %v9124_v29, %v9128_v35  ;;  %v8686_v29 = vld [vmem:[#allocation7 + $0x12c] ss:$16 sps:$4 sm:$0xff]   ;;  %v8687_v35 = vld [vmem:[#allocation7 + $0x140] ss:$16 sps:$4 sm:$0xff]  }
 0x28e   :  { %v4052_v25 = vcombine.low %v9126_v6, %v9130_v10  ;;  %v8689_v6 = vld [vmem:[#allocation7 + $0x144] ss:$16 sps:$4 sm:$0xff]   ;;  %v8698_v10 = vld [vmem:[#allocation7 + $0x16c] ss:$16 sps:$4 sm:$0xff]  }
 0x28f   :  { %v9828_v17 = vrot.slane %v4051_v52, %v9825_v11  ;;  %3706 = vmatpush1.bf16.msra.mxu0 %v8172_v30  ;;  %3870 = vmatpush1.bf16.msra.mxu1 %v8174_v48  ;;  %v8692_v30 = vld [vmem:[#allocation7 + $0x14c] ss:$16 sps:$4 sm:$0xff]   ;;  %v8690_v48 = vld [vmem:[#allocation7 + $0x148] ss:$16 sps:$4 sm:$0xff]   ;;  %v8693_v52 = vld [vmem:[#allocation7 + $0x160] ss:$16 sps:$4 sm:$0xff]  }
 0x290   :  { %v9831_v44 = vrot.slane %v4052_v25, %v9825_v11  ;;  %3707 = vmatprep.subr.bf16.mxu0 %v8181_v8  ;;  %3871 = vmatprep.subr.bf16.mxu1 %v8183_v42  ;;  %v8695_v8 = vld [vmem:[#allocation7 + $0x164] ss:$16 sps:$4 sm:$0xff]   ;;  %v8696_v42 = vld [vmem:[#allocation7 + $0x168] ss:$16 sps:$4 sm:$0xff]  }
 0x291   :  { %v8701_v25 = vld [vmem:[#allocation7 + $0x184] ss:$16 sps:$4 sm:$0xff]  }
 0x292   :  { %v4083_v14 = vcombine.low %v9828_v17, %v9831_v44  ;;  %v4125_v17 = vsub.s32 5, %v9822_v22  ;;  %v4129_v44 = vsub.s32 6, %v9822_v22 }
 0x293   :  { %3708 = vmatpush1.bf16.msra.mxu0 %v8180_v37  ;;  %3872 = vmatpush1.bf16.msra.mxu1 %v8182_v13  ;;  %v8704_v37 = vld [vmem:[#allocation7 + $0x18c] ss:$16 sps:$4 sm:$0xff]   ;;  %v8699_v13 = vld [vmem:[#allocation7 + $0x180] ss:$16 sps:$4 sm:$0xff]  }
 0x294   :  { %5069 = vmatprep.subr.bf16.mxu0 %v8629_v33  ;;  %5151 = vmatprep.subr.bf16.mxu1 %v8632_v49  ;;  %v8702_v33 = vld [vmem:[#allocation7 + $0x188] ss:$16 sps:$4 sm:$0xff]   ;;  %v8705_v49 = vld [vmem:[#allocation7 + $0x1a0] ss:$16 sps:$4 sm:$0xff]  }
 0x296   :  { %3710 = vmatmul.mubr.bf16.vlgmr.msra.gmra.mrb[4].mxu0 %v9626_v54  ;;  %3874 = vmatmul.mubr.bf16.vlgmr.msra.gmra.mrb[4].mxu1 %v9626_v54  ;;  %v8642_v54 = vld [vmem:[#allocation7 + $0x48] ss:$16 sps:$4 sm:$0xff]  }
 0x297   :  { %5070 = vmatpush1.bf16.msra.mxu0 %v8627_v43  ;;  %5152 = vmatpush1.bf16.msra.mxu1 %v8630_v45  ;;  %v8707_v43 = vld [vmem:[#allocation7 + $0x1a4] ss:$16 sps:$4 sm:$0xff]   ;;  %v8710_v45 = vld [vmem:[#allocation7 + $0x1ac] ss:$16 sps:$4 sm:$0xff]  }
 0x298   :  { %5071 = vmatprep.subr.bf16.mxu0 %v8635_v19  ;;  %5153 = vmatprep.subr.bf16.mxu1 %v8638_v20  ;;  %v8713_v19 = vld [vmem:[#allocation7 + $0x1c4] ss:$16 sps:$4 sm:$0xff]   ;;  %v8708_v20 = vld [vmem:[#allocation7 + $0x1a8] ss:$16 sps:$4 sm:$0xff]  }
 0x29b   :  { %5072 = vmatpush1.bf16.msra.mxu0 %v8633_v36  ;;  %5154 = vmatpush1.bf16.msra.mxu1 %v8636_v15  ;;  %v8716_v36 = vld [vmem:[#allocation7 + $0x1cc] ss:$16 sps:$4 sm:$0xff]   ;;  %v8711_v15 = vld [vmem:[#allocation7 + $0x1c0] ss:$16 sps:$4 sm:$0xff]  }
 0x29c   :  { %5073 = vmatprep.subr.bf16.mxu0 %v8641_v21  ;;  %5155 = vmatprep.subr.bf16.mxu1 %v8644_v12  ;;  %v8719_v21 = vld [vmem:[#allocation7 + $0x1e4] ss:$16 sps:$4 sm:$0xff]   ;;  %v8714_v12 = vld [vmem:[#allocation7 + $0x1c8] ss:$16 sps:$4 sm:$0xff]  }
 0x29f   :  { %5074 = vmatpush1.bf16.msra.mxu0 %v8639_v41  ;;  %5156 = vmatpush1.bf16.msra.mxu1 %v8642_v54  ;;  %v8722_v41 = vld [vmem:[#allocation7 + $0x1ec] ss:$16 sps:$4 sm:$0xff]   ;;  %v8717_v54 = vld [vmem:[#allocation7 + $0x1e0] ss:$16 sps:$4 sm:$0xff]  }
 0x2a0   :  { %5075 = vmatprep.subr.bf16.mxu0 %v8647_v47  ;;  %5157 = vmatprep.subr.bf16.mxu1 %v8650_v28  ;;  %v8720_v47 = vld [vmem:[#allocation7 + $0x1e8] ss:$16 sps:$4 sm:$0xff]  }
 0x2a3   :  { %5076 = vmatpush1.bf16.msra.mxu0 %v8645_v50  ;;  %5158 = vmatpush1.bf16.msra.mxu1 %v8648_v27  ;;  %v8725_v50 = vld [vmem:[#allocation7 + $0x204] ss:$16 sps:$4 sm:$0xff]   ;;  %v8728_v27 = vld [vmem:[#allocation7 + $0x20c] ss:$16 sps:$4 sm:$0xff]  }
 0x2a4   :  { %5077 = vmatprep.subr.bf16.mxu0 %v8653_v55  ;;  %5159 = vmatprep.subr.bf16.mxu1 %v8656_v51 }
 0x2a7   :  { %5078 = vmatpush1.bf16.msra.mxu0 %v8651_v58  ;;  %5160 = vmatpush1.bf16.msra.mxu1 %v8654_v59 }
 0x2a8   :  { %5079 = vmatprep.subr.bf16.mxu0 %v8659_v60  ;;  %5161 = vmatprep.subr.bf16.mxu1 %v8662_v16 }
 0x2ab   :  { %5080 = vmatpush1.bf16.msra.mxu0 %v8657_v18  ;;  %5162 = vmatpush1.bf16.msra.mxu1 %v8660_v24 }
 0x2ac   :  { %5081 = vmatprep.subr.bf16.mxu0 %v8665_v39  ;;  %5163 = vmatprep.subr.bf16.mxu1 %v8668_v53 }
 0x2af   :  { %5082 = vmatpush1.bf16.msra.mxu0 %v8663_v56  ;;  %5164 = vmatpush1.bf16.msra.mxu1 %v8666_v63 }
 0x2b0   :  { %5083 = vmatprep.subr.bf16.mxu0 %v8671_v57  ;;  %5165 = vmatprep.subr.bf16.mxu1 %v8674_v62 }
 0x2b3   :  { %5084 = vmatpush1.bf16.msra.mxu0 %v8669_v0  ;;  %5166 = vmatpush1.bf16.msra.mxu1 %v8672_v26 }
 0x2b4   :  { %5085 = vmatprep.subr.bf16.mxu0 %v8677_v3  ;;  %5167 = vmatprep.subr.bf16.mxu1 %v8680_v7 }
 0x2b7   :  { %5086 = vmatpush1.bf16.msra.mxu0 %v8675_v9  ;;  %5168 = vmatpush1.bf16.msra.mxu1 %v8678_v4 }
 0x2b8   :  { %5087 = vmatprep.subr.bf16.mxu0 %v8683_v5  ;;  %5169 = vmatprep.subr.bf16.mxu1 %v8686_v29 }
 0x2bb   :  { %5088 = vmatpush1.bf16.msra.mxu0 %v8681_v23  ;;  %5170 = vmatpush1.bf16.msra.mxu1 %v8684_v46 }
 0x2bc   :  { %5089 = vmatprep.subr.bf16.mxu0 %v8689_v6  ;;  %5171 = vmatprep.subr.bf16.mxu1 %v8692_v30 }
 0x2bf   :  { %5090 = vmatpush1.bf16.msra.mxu0 %v8687_v35  ;;  %5172 = vmatpush1.bf16.msra.mxu1 %v8690_v48 }
 0x2c0   :  { %5091 = vmatprep.subr.bf16.mxu0 %v8695_v8  ;;  %5173 = vmatprep.subr.bf16.mxu1 %v8698_v10 }
 0x2c3   :  { %5092 = vmatpush1.bf16.msra.mxu0 %v8693_v52  ;;  %5174 = vmatpush1.bf16.msra.mxu1 %v8696_v42 }
 0x2c4   :  { %5093 = vmatprep.subr.bf16.mxu0 %v8701_v25  ;;  %5175 = vmatprep.subr.bf16.mxu1 %v8704_v37 }
 0x2c7   :  { %5094 = vmatpush1.bf16.msra.mxu0 %v8699_v13  ;;  %5176 = vmatpush1.bf16.msra.mxu1 %v8702_v33 }
 0x2c8   :  { %5095 = vmatprep.subr.bf16.mxu0 %v8707_v43  ;;  %5177 = vmatprep.subr.bf16.mxu1 %v8710_v45 }
 0x2cb   :  { %5096 = vmatpush1.bf16.msra.mxu0 %v8705_v49  ;;  %5178 = vmatpush1.bf16.msra.mxu1 %v8708_v20 }
 0x2cc   :  { %5097 = vmatprep.subr.bf16.mxu0 %v8713_v19  ;;  %5179 = vmatprep.subr.bf16.mxu1 %v8716_v36 }
 0x2cf   :  { %5098 = vmatpush1.bf16.msra.mxu0 %v8711_v15  ;;  %5180 = vmatpush1.bf16.msra.mxu1 %v8714_v12 }
 0x2d0   :  { %5099 = vmatprep.subr.bf16.mxu0 %v8719_v21  ;;  %5181 = vmatprep.subr.bf16.mxu1 %v8722_v41 }
 0x2d3   :  { %5100 = vmatpush1.bf16.msra.mxu0 %v8717_v54  ;;  %5182 = vmatpush1.bf16.msra.mxu1 %v8720_v47 }
 0x2d4   :  { %5110 = vmatprep.subr.bf16.mxu0 %v8725_v50  ;;  %5192 = vmatprep.subr.bf16.mxu1 %v8728_v27 }
 0x369   :  { %v9837_v28 = vpop.f32.mrb[4].mxu0  ;;  %v9842_v58 = vpop.f32.mrb[4].mxu1 }
 0x36a   :  { %v3906_v55 = vrot.slane %v9837_v28, 4  ;;  %v3943_v51 = vmul.f32 %v9837_v28, %v9837_v28  ;;  %v9844_v59 = vpop.f32.mrb[5].mxu0  ;;  %v3918_v60 = vrot.slane %v9842_v58, 4  ;;  %v3945_v16 = vmul.f32 %v9842_v58, %v9842_v58  ;;  %v9852_v39 = vpop.f32.mrb[5].mxu1 }
 0x36b   :  { %v3912_v18 = vrot.slane %v9844_v59, 4  ;;  %v3944_v24 = vmul.f32 %v9844_v59, %v9844_v59  ;;  %v3715_v53 = vpop.f32.mrb[6].mxu0  ;;  %v3924_v57 = vrot.slane %v9852_v39, 4  ;;  %v3946_v62 = vmul.f32 %v9852_v39, %v9852_v39  ;;  %v3879_v0 = vpop.f32.mrb[6].mxu1 }
 0x36c   :  { %v3907_v56 = vadd.f32 %v3906_v55, %v9837_v28  ;;  %v3971_v63 = vrot.slane %v3943_v51, 4  ;;  %v3716_v26 = vpop.f32.mrb[7].mxu0  ;;  %v3919_v3 = vadd.f32 %v3918_v60, %v9842_v58  ;;  %v3983_v7 = vrot.slane %v3945_v16, 4  ;;  %v3880_v5 = vpop.f32.mrb[7].mxu1 }
 0x36d   :  { %v3913_v9 = vadd.f32 %v3912_v18, %v9844_v59  ;;  %v3977_v4 = vrot.slane %v3944_v24, 4  ;;  %v3925_v46 = vadd.f32 %v3924_v57, %v9852_v39  ;;  %v3989_v6 = vrot.slane %v3946_v62, 4 }
 0x36e   :  { %v3908_v29 = vrot.slane %v3907_v56, 2  ;;  %v3972_v23 = vadd.f32 %v3971_v63, %v3943_v51  ;;  %v3920_v30 = vrot.slane %v3919_v3, 2  ;;  %v3984_v35 = vadd.f32 %v3983_v7, %v3945_v16 }
 0x36f   :  { %v3914_v48 = vrot.slane %v3913_v9, 2  ;;  %v3978_v8 = vadd.f32 %v3977_v4, %v3944_v24  ;;  %v3926_v42 = vrot.slane %v3925_v46, 2  ;;  %v3990_v25 = vadd.f32 %v3989_v6, %v3946_v62 }
 0x370   :  { %v3909_v10 = vadd.f32 %v3908_v29, %v3907_v56  ;;  %v3973_v52 = vrot.slane %v3972_v23, 2  ;;  %v3921_v37 = vadd.f32 %v3920_v30, %v3919_v3  ;;  %v3985_v13 = vrot.slane %v3984_v35, 2 }
 0x371   :  { %v3915_v33 = vadd.f32 %v3914_v48, %v3913_v9  ;;  %v3979_v49 = vrot.slane %v3978_v8, 2  ;;  %v3927_v19 = vadd.f32 %v3926_v42, %v3925_v46  ;;  %v3991_v20 = vrot.slane %v3990_v25, 2 }
 0x372   :  { %v3910_v43 = vrot.slane %v3909_v10, 1  ;;  %v3974_v45 = vadd.f32 %v3973_v52, %v3972_v23  ;;  %v3922_v36 = vrot.slane %v3921_v37, 1  ;;  %v3986_v15 = vadd.f32 %v3985_v13, %v3984_v35 }
 0x373   :  { %v3916_v21 = vrot.slane %v3915_v33, 1  ;;  %v3980_v12 = vadd.f32 %v3979_v49, %v3978_v8  ;;  %v3928_v47 = vrot.slane %v3927_v19, 1  ;;  %v3992_v50 = vadd.f32 %v3991_v20, %v3990_v25 }
 0x374   :  { %v3911_v41 = vadd.f32 %v3910_v43, %v3909_v10  ;;  %v3975_v54 = vrot.slane %v3974_v45, 1  ;;  %v3923_v27 = vadd.f32 %v3922_v36, %v3921_v37  ;;  %v3987_v55 = vrot.slane %v3986_v15, 1 }
 0x375   :  { %v3917_v51 = vadd.f32 %v3916_v21, %v3915_v33  ;;  %v3981_v60 = vrot.slane %v3980_v12, 1  ;;  %v3929_v24 = vadd.f32 %v3928_v47, %v3927_v19  ;;  %v3993_v53 = vrot.slane %v3992_v50, 1  ;;  %v152_v47 = vld [vmem:[#allocation14] sm:$0xff] }
 0x376   :  { %v9861_v16 = vmul.f32 0.125, %v3911_v41  ;;  %v3976_v18 = vadd.f32 %v3975_v54, %v3974_v45  ;;  %v9863_v56 = vmul.f32 0.125, %v3923_v27  ;;  %v3988_v63 = vadd.f32 %v3987_v55, %v3986_v15 }
 0x377   :  { %v9865_v57 = vmul.f32 0.125, %v3917_v51  ;;  %v3982_v62 = vadd.f32 %v3981_v60, %v3980_v12  ;;  %v3938_v3 = vmul.f32 0.125, %v3929_v24  ;;  %v3994_v7 = vadd.f32 %v3993_v53, %v3992_v50 }
 0x378   :  { %v3999_v0 = vmul.f32 0.125, %v3976_v18  ;;  %v4007_v26 = vmul.f32 %v9861_v16, %v9861_v16  ;;  %v4001_v9 = vmul.f32 0.125, %v3988_v63  ;;  %v4009_v4 = vmul.f32 %v9863_v56, %v9863_v56 }
 0x379   :  { %v4000_v5 = vmul.f32 0.125, %v3982_v62  ;;  %v4008_v29 = vmul.f32 %v9865_v57, %v9865_v57  ;;  %v4002_v46 = vmul.f32 0.125, %v3994_v7  ;;  %v4010_v6 = vmul.f32 %v3938_v3, %v3938_v3 }
 0x37a   :  { %v4015_v23 = vsub.f32 %v3999_v0, %v4007_v26  ;;  %v4017_v30 = vsub.f32 %v4001_v9, %v4009_v4  ;;  %v4091_v41 = vrot.slane %v4083_v14, %v9825_v11  ;;  %v9881_v50 = vsub.s32 0, %v9822_v22 }
 0x37b   :  { %v4016_v35 = vsub.f32 %v4000_v5, %v4008_v29  ;;  %v4018_v8 = vsub.f32 %v4002_v46, %v4010_v6  ;;  %v9884_v55 = vsub.s32 1, %v9822_v22  ;;  %v9887_v51 = vsub.s32 2, %v9822_v22 }
 0x37c   :  { %v4023_v48 = vmax.f32 %v4015_v23, 0.0  ;;  %v4025_v10 = vmax.f32 %v4017_v30, 0.0  ;;  %v9890_v60 = vsub.s32 3, %v9822_v22  ;;  %v4121_v18 = vsub.s32 4, %v9822_v22 }
 0x37d   :  { %v4024_v52 = vmax.f32 %v4016_v35, 0.0  ;;  %v4026_v25 = vmax.f32 %v4018_v8, 0.0  ;;  %v4133_v14 = vsub.s32 7, %v9822_v22 }
 0x37e   :  { %v4031_v42 = vadd.f32 1e-05, %v4023_v48  ;;  %v4033_v37 = vadd.f32 1e-05, %v4025_v10 }
 0x37f   :  { %v4032_v13 = vadd.f32 1e-05, %v4024_v52  ;;  %v4034_v33 = vadd.f32 1e-05, %v4026_v25 }
 0x380   :  { %9131 = vrsqrt.f32 %v4031_v42 }
 0x381   :  { %9133 = vrsqrt.f32 %v4033_v37 }
 0x382   :  { %9135 = vrsqrt.f32 %v4032_v13 }
 0x383   :  { %9137 = vrsqrt.f32 %v4034_v33  ;;  %v153_v33 = vld [vmem:[#allocation14 + $0x18] sm:$0xff] }
 0x38a   :  { %v9132_v49 = vpop.eup %9131 }
 0x38b   :  { %v9134_v43 = vpop.eup %9133 }
 0x38c   :  { %v9136_v45 = vpop.eup %9135 }
 0x38d   :  { %v9138_v19 = vpop.eup %9137  ;;  %v4053_v20 = vcombine.low %v9132_v49, %v9136_v45 }
 0x38e   :  { %v4054_v36 = vcombine.low %v9134_v43, %v9138_v19 }
 0x38f   :  { %v4075_v15 = vrot.slane %v4053_v20, %v9825_v11 }
 0x390   :  { %v4082_v21 = vrot.slane %v4054_v36, %v9825_v11 }
 0x392   :  { %v4084_v12 = vcombine.low %v4075_v15, %v4082_v21 }
 0x394   :  { %v4098_v54 = vrot.slane %v4084_v12, %v9825_v11 }
 0x396   :  { %v4099_v27 = vcombine.low %v4091_v41, %v4098_v54 }
 0x398   :  { %v4101_v24 = vmul.f32 %v4099_v27, %v152_v47 }
 0x39a   :  { %v4106_v53 = vrot.slane %v4101_v24, %v9881_v50  ;;  %v4110_v63 = vrot.slane %v4101_v24, %v9884_v55  ;;  %v4114_v62 = vrot.slane %v4101_v24, %v9887_v51  ;;  %v4118_v0 = vrot.slane %v4101_v24, %v9890_v60 }
 0x39b   :  { %v4122_v26 = vrot.slane %v4101_v24, %v4121_v18  ;;  %v4126_v7 = vrot.slane %v4101_v24, %v4125_v17  ;;  %v4130_v9 = vrot.slane %v4101_v24, %v4129_v44  ;;  %v4134_v4 = vrot.slane %v4101_v24, %v4133_v14 }
 0x39c   :  { %v4143_v5 = vmul.f32 %v4106_v53, %v9778_v61  ;;  %v4144_v29 = vmul.f32 %v4110_v63, %v9782_v1  ;;  %v4145_v23 = vmul.f32 %v4114_v62, %v9780_v2  ;;  %v4146_v22 = vmul.f32 %v4118_v0, %v9789_v31 }
 0x39d   :  { %v4147_v46 = vmul.f32 %v4122_v26, %v9861_v16  ;;  %v4148_v6 = vmul.f32 %v4126_v7, %v9865_v57  ;;  %v4149_v30 = vmul.f32 %v4130_v9, %v9863_v56  ;;  %v4150_v35 = vmul.f32 %v4134_v4, %v3938_v3 }
 0x39e   :  { %v4159_v48 = vcombine.low %v4143_v5, %v4144_v29  ;;  %v4160_v8 = vcombine.low %v4145_v23, %v4146_v22  ;;  %v4216_v10 = vmul.f32 %v4130_v9, %v9842_v58  ;;  %v4217_v52 = vmul.f32 %v4134_v4, %v9852_v39 }
 0x39f   :  { %v4161_v61 = vcombine.low %v4147_v46, %v4148_v6  ;;  %v4162_v42 = vcombine.low %v4149_v30, %v4150_v35  ;;  %v4211_v1 = vmul.f32 %v4110_v63, %v9739_v40  ;;  %v4215_v2 = vmul.f32 %v4126_v7, %v9844_v59 }
 0x3a0   :  { %v4169_v31 = vrot.slane %v4159_v48, %v9825_v11  ;;  %v4176_v16 = vrot.slane %v4160_v8, %v9825_v11  ;;  %v4210_v57 = vmul.f32 %v4106_v53, %v9724_v32  ;;  %v4214_v56 = vmul.f32 %v4122_v26, %v9837_v28  ;;  %v8723_v8 = vld [vmem:[#allocation7 + $0x200] ss:$16 sps:$4 sm:$0xff]  }
 0x3a1   :  { %v4183_v3 = vrot.slane %v4161_v61, %v9825_v11  ;;  %v4190_v58 = vrot.slane %v4162_v42, %v9825_v11  ;;  %v4213_v39 = vmul.f32 %v4118_v0, %v9751_v34  ;;  %v4212_v25 = vmul.f32 %v4114_v62, %v9737_v38  ;;  %v8731_v61 = vld [vmem:[#allocation7 + $0x224] ss:$16 sps:$4 sm:$0xff]   ;;  %v8734_v42 = vld [vmem:[#allocation7 + $0x22c] ss:$16 sps:$4 sm:$0xff]  }
 0x3a2   :  { %v4191_v37 = vcombine.low %v4169_v31, %v4176_v16  ;;  %v8732_v31 = vld [vmem:[#allocation7 + $0x228] ss:$16 sps:$4 sm:$0xff]   ;;  %v8737_v16 = vld [vmem:[#allocation7 + $0x244] ss:$16 sps:$4 sm:$0xff]  }
 0x3a3   :  { %v4192_v40 = vcombine.low %v4183_v3, %v4190_v58  ;;  %v8738_v3 = vld [vmem:[#allocation7 + $0x248] ss:$16 sps:$4 sm:$0xff]   ;;  %v8743_v58 = vld [vmem:[#allocation7 + $0x264] ss:$16 sps:$4 sm:$0xff]  }
 0x3a4   :  { %v4199_v59 = vrot.slane %v4191_v37, %v9825_v11  ;;  %v8744_v37 = vld [vmem:[#allocation7 + $0x268] ss:$16 sps:$4 sm:$0xff]  }
 0x3a5   :  { %v4206_v13 = vrot.slane %v4192_v40, %v9825_v11  ;;  %v8749_v40 = vld [vmem:[#allocation7 + $0x284] ss:$16 sps:$4 sm:$0xff]  }
 0x3a7   :  { %v4207_v49 = vcombine.low %v4199_v59, %v4206_v13  ;;  %v8752_v59 = vld [vmem:[#allocation7 + $0x28c] ss:$16 sps:$4 sm:$0xff]   ;;  %v8747_v13 = vld [vmem:[#allocation7 + $0x280] ss:$16 sps:$4 sm:$0xff]  }
 0x3a9   :  { %v4209_v43 = vsub.f32 %v153_v33, %v4207_v49  ;;  %v8750_v33 = vld [vmem:[#allocation7 + $0x288] ss:$16 sps:$4 sm:$0xff]   ;;  %v8755_v49 = vld [vmem:[#allocation7 + $0x2a4] ss:$16 sps:$4 sm:$0xff]  }
 0x3ab   :  { %v4246_v32 = vrot.slane %v4209_v43, %v4129_v44  ;;  %v4250_v45 = vrot.slane %v4209_v43, %v4133_v14  ;;  %v4226_v28 = vrot.slane %v4209_v43, %v9884_v55  ;;  %v4242_v19 = vrot.slane %v4209_v43, %v4125_v17 }
 0x3ac   :  { %v4222_v20 = vrot.slane %v4209_v43, %v9881_v50  ;;  %v4238_v36 = vrot.slane %v4209_v43, %v4121_v18  ;;  %v4234_v34 = vrot.slane %v4209_v43, %v9890_v60  ;;  %v4230_v38 = vrot.slane %v4209_v43, %v9887_v51  ;;  %v8758_v43 = vld [vmem:[#allocation7 + $0x2ac] ss:$16 sps:$4 sm:$0xff]  }
 0x3ad   :  { %v4265_v15 = vadd.f32 %v4246_v32, %v4216_v10  ;;  %v4266_v21 = vadd.f32 %v4250_v45, %v4217_v52  ;;  %v4260_v12 = vadd.f32 %v4226_v28, %v4211_v1  ;;  %v4264_v41 = vadd.f32 %v4242_v19, %v4215_v2  ;;  %v8726_v10 = vld [vmem:[#allocation7 + $0x208] ss:$16 sps:$4 sm:$0xff]   ;;  %v8729_v2 = vld [vmem:[#allocation7 + $0x220] ss:$16 sps:$4 sm:$0xff]   ;;  %v8761_v28 = vld [vmem:[#allocation7 + $0x2c4] ss:$16 sps:$4 sm:$0xff]  }
 0x3ae   :  { %v4259_v54 = vadd.f32 %v4222_v20, %v4210_v57  ;;  %v4263_v47 = vadd.f32 %v4238_v36, %v4214_v56  ;;  %v4262_v27 = vadd.f32 %v4234_v34, %v4213_v39  ;;  %v4261_v24 = vadd.f32 %v4230_v38, %v4212_v25  ;;  %v8740_v57 = vld [vmem:[#allocation7 + $0x24c] ss:$16 sps:$4 sm:$0xff]   ;;  %v8735_v56 = vld [vmem:[#allocation7 + $0x240] ss:$16 sps:$4 sm:$0xff]   ;;  %v8756_v45 = vld [vmem:[#allocation7 + $0x2a8] ss:$16 sps:$4 sm:$0xff]  }
 0x3af   :  { %v8186_v44 = vmul.f32 -1.442695, %v4265_v15  ;;  %v8187_v14 = vmul.f32 -1.442695, %v4266_v21  ;;  %v8185_v53 = vmul.f32 -1.442695, %v4264_v41 }
 0x3b0   :  { %v8184_v63 = vmul.f32 -1.442695, %v4263_v47  ;;  %v8746_v39 = vld [vmem:[#allocation7 + $0x26c] ss:$16 sps:$4 sm:$0xff]   ;;  %v8741_v25 = vld [vmem:[#allocation7 + $0x260] ss:$16 sps:$4 sm:$0xff]  }
 0x3b1   :  { %9139 = vpow2.f32 %v8186_v44  ;;  %v8753_v32 = vld [vmem:[#allocation7 + $0x2a0] ss:$16 sps:$4 sm:$0xff]   ;;  %v8764_v19 = vld [vmem:[#allocation7 + $0x2cc] ss:$16 sps:$4 sm:$0xff]   ;;  %v8762_v36 = vld [vmem:[#allocation7 + $0x2c8] ss:$16 sps:$4 sm:$0xff]  }
 0x3b2   :  { %9141 = vpow2.f32 %v8187_v14  ;;  %v8759_v20 = vld [vmem:[#allocation7 + $0x2c0] ss:$16 sps:$4 sm:$0xff]   ;;  %v8767_v34 = vld [vmem:[#allocation7 + $0x2e4] ss:$16 sps:$4 sm:$0xff]   ;;  %v8770_v38 = vld [vmem:[#allocation7 + $0x2ec] ss:$16 sps:$4 sm:$0xff]  }
 0x3b3   :  { %9143 = vpow2.f32 %v8185_v53  ;;  %v8765_v15 = vld [vmem:[#allocation7 + $0x2e0] ss:$16 sps:$4 sm:$0xff]   ;;  %v8768_v21 = vld [vmem:[#allocation7 + $0x2e8] ss:$16 sps:$4 sm:$0xff]   ;;  %v8776_v41 = vld [vmem:[#allocation7 + $0x30c] ss:$16 sps:$4 sm:$0xff]  }
 0x3b4   :  { %9145 = vpow2.f32 %v8184_v63  ;;  %v8774_v47 = vld [vmem:[#allocation7 + $0x308] ss:$16 sps:$4 sm:$0xff]   ;;  %v8777_v44 = vld [vmem:[#allocation7 + $0x320] ss:$16 sps:$4 sm:$0xff]   ;;  %v8785_v53 = vld [vmem:[#allocation7 + $0x344] ss:$16 sps:$4 sm:$0xff]  }
 0x3b5   :  { %v8780_v14 = vld [vmem:[#allocation7 + $0x328] ss:$16 sps:$4 sm:$0xff]   ;;  %v8788_v63 = vld [vmem:[#allocation7 + $0x34c] ss:$16 sps:$4 sm:$0xff]  }
 0x3bb   :  { %v9140_v18 = vpop.eup %9139 }
 0x3bc   :  { %v9142_v17 = vpop.eup %9141  ;;  %v4281_v62 = vadd.f32 1.0, %v9140_v18  ;;  %v8783_v18 = vld [vmem:[#allocation7 + $0x340] ss:$16 sps:$4 sm:$0xff]  }
 0x3bd   :  { %v9144_v0 = vpop.eup %9143  ;;  %v4282_v26 = vadd.f32 1.0, %v9142_v17  ;;  %v8786_v17 = vld [vmem:[#allocation7 + $0x348] ss:$16 sps:$4 sm:$0xff]  }
 0x3be   :  { %v9146_v7 = vpop.eup %9145  ;;  %v4280_v9 = vadd.f32 1.0, %v9144_v0  ;;  %9147 = vrcp.f32 %v4281_v62  ;;  %v8791_v62 = vld [vmem:[#allocation7 + $0x364] ss:$16 sps:$4 sm:$0xff]   ;;  %v8794_v0 = vld [vmem:[#allocation7 + $0x36c] ss:$16 sps:$4 sm:$0xff]  }
 0x3bf   :  { %9149 = vrcp.f32 %v4282_v26  ;;  %v4279_v4 = vadd.f32 1.0, %v9146_v7  ;;  %v8789_v26 = vld [vmem:[#allocation7 + $0x360] ss:$16 sps:$4 sm:$0xff]   ;;  %v8792_v7 = vld [vmem:[#allocation7 + $0x368] ss:$16 sps:$4 sm:$0xff]  }
 0x3c0   :  { %9151 = vrcp.f32 %v4280_v9  ;;  %v8797_v9 = vld [vmem:[#allocation7 + $0x384] ss:$16 sps:$4 sm:$0xff]  }
 0x3c1   :  { %9153 = vrcp.f32 %v4279_v4  ;;  %v8800_v4 = vld [vmem:[#allocation7 + $0x38c] ss:$16 sps:$4 sm:$0xff]  }
 0x3c8   :  { %v9148_v5 = vpop.eup %9147 }
 0x3c9   :  { %v9150_v29 = vpop.eup %9149  ;;  %v9925_v23 = vmul.f32 %v9148_v5, %v4261_v24  ;;  %v8782_v24 = vld [vmem:[#allocation7 + $0x32c] ss:$16 sps:$4 sm:$0xff]   ;;  %v8795_v5 = vld [vmem:[#allocation7 + $0x380] ss:$16 sps:$4 sm:$0xff]  }
 0x3ca   :  { %v9152_v22 = vpop.eup %9151  ;;  %v4294_v46 = vmul.f32 %v9150_v29, %v4262_v27  ;;  %v8779_v27 = vld [vmem:[#allocation7 + $0x324] ss:$16 sps:$4 sm:$0xff]   ;;  %v8798_v29 = vld [vmem:[#allocation7 + $0x388] ss:$16 sps:$4 sm:$0xff]  }
 0x3cb   :  { %v9154_v6 = vpop.eup %9153  ;;  %v4292_v30 = vmul.f32 %v9152_v22, %v4260_v12  ;;  %v8773_v12 = vld [vmem:[#allocation7 + $0x304] ss:$16 sps:$4 sm:$0xff]  }
 0x3cc   :  { %v4291_v35 = vmul.f32 %v9154_v6, %v4259_v54  ;;  %v4298_v1 = vpack.c.bf16 %v4294_v46, %v4294_v46  ;;  %v8771_v54 = vld [vmem:[#allocation7 + $0x300] ss:$16 sps:$4 sm:$0xff]   ;;  %v8803_v22 = vld [vmem:[#allocation7 + $0x3a4] ss:$16 sps:$4 sm:$0xff]   ;;  %v8806_v46 = vld [vmem:[#allocation7 + $0x3ac] ss:$16 sps:$4 sm:$0xff]  }
 0x3cd   :  { %v4296_v48 = vpack.c.bf16 %v4292_v30, %v4292_v30  ;;  %v8801_v6 = vld [vmem:[#allocation7 + $0x3a0] ss:$16 sps:$4 sm:$0xff]   ;;  %v8804_v30 = vld [vmem:[#allocation7 + $0x3a8] ss:$16 sps:$4 sm:$0xff]  }
 0x3ce   :  { %v4295_v52 = vpack.c.bf16 %v4291_v35, %v4291_v35  ;;  %v8809_v35 = vld [vmem:[#allocation7 + $0x3c4] ss:$16 sps:$4 sm:$0xff]  }
 0x3cf   :  { %5101 = vmatprep.mubr.bf16.mxu0 %v4296_v48  ;;  %5183 = vmatprep.mubr.bf16.mxu1 %v4296_v48  ;;  %v8812_v48 = vld [vmem:[#allocation7 + $0x3cc] ss:$16 sps:$4 sm:$0xff]  }
 0x3d0   :  { %5102 = vmatmul.mubr.bf16.vlgmr.msra.gmra.mrb[8].mxu0 %v4295_v52  ;;  %5184 = vmatmul.mubr.bf16.vlgmr.msra.gmra.mrb[8].mxu1 %v4295_v52  ;;  %v8815_v52 = vld [vmem:[#allocation7 + $0x3e4] ss:$16 sps:$4 sm:$0xff]  }
 0x3d1   :  { %5111 = vmatpush1.bf16.msra.mxu0 %v8723_v8  ;;  %5193 = vmatpush1.bf16.msra.mxu1 %v8726_v10  ;;  %v8807_v8 = vld [vmem:[#allocation7 + $0x3c0] ss:$16 sps:$4 sm:$0xff]   ;;  %v8810_v10 = vld [vmem:[#allocation7 + $0x3c8] ss:$16 sps:$4 sm:$0xff]  }
 0x3d2   :  { %5142 = vmatprep.mubr.bf16.mxu0 %v4298_v1  ;;  %5224 = vmatprep.mubr.bf16.mxu1 %v4298_v1  ;;  %v8816_v1 = vld [vmem:[#allocation7 + $0x3e8] ss:$16 sps:$4 sm:$0xff]  }
 0x3d3   :  { %5112 = vmatprep.subr.bf16.mxu0 %v8731_v61  ;;  %5194 = vmatprep.subr.bf16.mxu1 %v8734_v42  ;;  %v8818_v61 = vld [vmem:[#allocation7 + $0x3ec] ss:$16 sps:$4 sm:$0xff]   ;;  %v8813_v42 = vld [vmem:[#allocation7 + $0x3e0] ss:$16 sps:$4 sm:$0xff]  }
 0x3d5   :  { %5113 = vmatpush1.bf16.msra.mxu0 %v8729_v2  ;;  %5195 = vmatpush1.bf16.msra.mxu1 %v8732_v31  ;;  %v4297_v2 = vpack.c.bf16 %v9925_v23, %v9925_v23  ;;  %v8821_v31 = vld [vmem:[#allocation8 + $0x4] ss:$16 sps:$4 sm:$0xff]   ;;  %v8836_v23 = vld [vmem:[#allocation8 + $0x4c] ss:$16 sps:$4 sm:$0xff]  }
 0x3d6   :  { %5114 = vmatprep.subr.bf16.mxu0 %v8737_v16  ;;  %5196 = vmatprep.subr.bf16.mxu1 %v8740_v57  ;;  %v8824_v16 = vld [vmem:[#allocation8 + $0xc] ss:$16 sps:$4 sm:$0xff]   ;;  %v8819_v57 = vld [vmem:[#allocation8] ss:$16 sps:$4 sm:$0xff]  }
 0x3d9   :  { %5115 = vmatpush1.bf16.msra.mxu0 %v8735_v56  ;;  %5197 = vmatpush1.bf16.msra.mxu1 %v8738_v3  ;;  %v8822_v56 = vld [vmem:[#allocation8 + $0x8] ss:$16 sps:$4 sm:$0xff]   ;;  %v8827_v3 = vld [vmem:[#allocation8 + $0x24] ss:$16 sps:$4 sm:$0xff]  }
 0x3da   :  { %5116 = vmatprep.subr.bf16.mxu0 %v8743_v58  ;;  %5198 = vmatprep.subr.bf16.mxu1 %v8746_v39  ;;  %v8830_v58 = vld [vmem:[#allocation8 + $0x2c] ss:$16 sps:$4 sm:$0xff]   ;;  %v8825_v39 = vld [vmem:[#allocation8 + $0x20] ss:$16 sps:$4 sm:$0xff]  }
 0x3dd   :  { %5117 = vmatpush1.bf16.msra.mxu0 %v8741_v25  ;;  %5199 = vmatpush1.bf16.msra.mxu1 %v8744_v37  ;;  %v8828_v25 = vld [vmem:[#allocation8 + $0x28] ss:$16 sps:$4 sm:$0xff]   ;;  %v8833_v37 = vld [vmem:[#allocation8 + $0x44] ss:$16 sps:$4 sm:$0xff]  }
 0x3de   :  { %5118 = vmatprep.subr.bf16.mxu0 %v8749_v40  ;;  %5200 = vmatprep.subr.bf16.mxu1 %v8752_v59  ;;  %v8831_v40 = vld [vmem:[#allocation8 + $0x40] ss:$16 sps:$4 sm:$0xff]   ;;  %v8834_v59 = vld [vmem:[#allocation8 + $0x48] ss:$16 sps:$4 sm:$0xff]  }
 0x3e1   :  { %5119 = vmatpush1.bf16.msra.mxu0 %v8747_v13  ;;  %5201 = vmatpush1.bf16.msra.mxu1 %v8750_v33  ;;  %v8839_v13 = vld [vmem:[#allocation8 + $0x64] ss:$16 sps:$4 sm:$0xff]   ;;  %v8842_v33 = vld [vmem:[#allocation8 + $0x6c] ss:$16 sps:$4 sm:$0xff]  }
 0x3e2   :  { %5120 = vmatprep.subr.bf16.mxu0 %v8755_v49  ;;  %5202 = vmatprep.subr.bf16.mxu1 %v8758_v43  ;;  %v8837_v49 = vld [vmem:[#allocation8 + $0x60] ss:$16 sps:$4 sm:$0xff]   ;;  %v8840_v43 = vld [vmem:[#allocation8 + $0x68] ss:$16 sps:$4 sm:$0xff]  }
 0x3e5   :  { %5121 = vmatpush1.bf16.msra.mxu0 %v8753_v32  ;;  %5203 = vmatpush1.bf16.msra.mxu1 %v8756_v45  ;;  %v8845_v32 = vld [vmem:[#allocation8 + $0x84] ss:$16 sps:$4 sm:$0xff]   ;;  %v8848_v45 = vld [vmem:[#allocation8 + $0x8c] ss:$16 sps:$4 sm:$0xff]  }
 0x3e6   :  { %5122 = vmatprep.subr.bf16.mxu0 %v8761_v28  ;;  %5204 = vmatprep.subr.bf16.mxu1 %v8764_v19  ;;  %v8843_v28 = vld [vmem:[#allocation8 + $0x80] ss:$16 sps:$4 sm:$0xff]   ;;  %v8846_v19 = vld [vmem:[#allocation8 + $0x88] ss:$16 sps:$4 sm:$0xff]  }
 0x3e9   :  { %5123 = vmatpush1.bf16.msra.mxu0 %v8759_v20  ;;  %5205 = vmatpush1.bf16.msra.mxu1 %v8762_v36  ;;  %v8851_v20 = vld [vmem:[#allocation8 + $0xa4] ss:$16 sps:$4 sm:$0xff]   ;;  %v8854_v36 = vld [vmem:[#allocation8 + $0xac] ss:$16 sps:$4 sm:$0xff]  }
 0x3ea   :  { %5124 = vmatprep.subr.bf16.mxu0 %v8767_v34  ;;  %5206 = vmatprep.subr.bf16.mxu1 %v8770_v38  ;;  %v8849_v34 = vld [vmem:[#allocation8 + $0xa0] ss:$16 sps:$4 sm:$0xff]   ;;  %v8852_v38 = vld [vmem:[#allocation8 + $0xa8] ss:$16 sps:$4 sm:$0xff]  }
 0x3ed   :  { %5125 = vmatpush1.bf16.msra.mxu0 %v8765_v15  ;;  %5207 = vmatpush1.bf16.msra.mxu1 %v8768_v21  ;;  %v8857_v15 = vld [vmem:[#allocation8 + $0xc4] ss:$16 sps:$4 sm:$0xff]   ;;  %v8860_v21 = vld [vmem:[#allocation8 + $0xcc] ss:$16 sps:$4 sm:$0xff]  }
 0x3ee   :  { %5126 = vmatprep.subr.bf16.mxu0 %v8773_v12  ;;  %5208 = vmatprep.subr.bf16.mxu1 %v8776_v41  ;;  %v8855_v12 = vld [vmem:[#allocation8 + $0xc0] ss:$16 sps:$4 sm:$0xff]   ;;  %v8858_v41 = vld [vmem:[#allocation8 + $0xc8] ss:$16 sps:$4 sm:$0xff]  }
 0x3f1   :  { %5127 = vmatpush1.bf16.msra.mxu0 %v8771_v54  ;;  %5209 = vmatpush1.bf16.msra.mxu1 %v8774_v47  ;;  %v8863_v54 = vld [vmem:[#allocation8 + $0xe4] ss:$16 sps:$4 sm:$0xff]   ;;  %v8866_v47 = vld [vmem:[#allocation8 + $0xec] ss:$16 sps:$4 sm:$0xff]  }
 0x3f2   :  { %5128 = vmatprep.subr.bf16.mxu0 %v8779_v27  ;;  %5210 = vmatprep.subr.bf16.mxu1 %v8782_v24  ;;  %v8861_v27 = vld [vmem:[#allocation8 + $0xe0] ss:$16 sps:$4 sm:$0xff]   ;;  %v8864_v24 = vld [vmem:[#allocation8 + $0xe8] ss:$16 sps:$4 sm:$0xff]  }
 0x3f5   :  { %5129 = vmatpush1.bf16.msra.mxu0 %v8777_v44  ;;  %5211 = vmatpush1.bf16.msra.mxu1 %v8780_v14  ;;  %v8869_v44 = vld [vmem:[#allocation8 + $0x104] ss:$16 sps:$4 sm:$0xff]   ;;  %v8872_v14 = vld [vmem:[#allocation8 + $0x10c] ss:$16 sps:$4 sm:$0xff]  }
 0x3f6   :  { %5130 = vmatprep.subr.bf16.mxu0 %v8785_v53  ;;  %5212 = vmatprep.subr.bf16.mxu1 %v8788_v63  ;;  %v8867_v53 = vld [vmem:[#allocation8 + $0x100] ss:$16 sps:$4 sm:$0xff]   ;;  %v8870_v63 = vld [vmem:[#allocation8 + $0x108] ss:$16 sps:$4 sm:$0xff]  }
 0x3f9   :  { %5131 = vmatpush1.bf16.msra.mxu0 %v8783_v18  ;;  %5213 = vmatpush1.bf16.msra.mxu1 %v8786_v17  ;;  %v8875_v18 = vld [vmem:[#allocation8 + $0x124] ss:$16 sps:$4 sm:$0xff]   ;;  %v8878_v17 = vld [vmem:[#allocation8 + $0x12c] ss:$16 sps:$4 sm:$0xff]  }
 0x3fa   :  { %5132 = vmatprep.subr.bf16.mxu0 %v8791_v62  ;;  %5214 = vmatprep.subr.bf16.mxu1 %v8794_v0  ;;  %v8873_v62 = vld [vmem:[#allocation8 + $0x120] ss:$16 sps:$4 sm:$0xff]   ;;  %v8876_v0 = vld [vmem:[#allocation8 + $0x128] ss:$16 sps:$4 sm:$0xff]  }
 0x3fd   :  { %5133 = vmatpush1.bf16.msra.mxu0 %v8789_v26  ;;  %5215 = vmatpush1.bf16.msra.mxu1 %v8792_v7  ;;  %v8881_v26 = vld [vmem:[#allocation8 + $0x144] ss:$16 sps:$4 sm:$0xff]   ;;  %v8884_v7 = vld [vmem:[#allocation8 + $0x14c] ss:$16 sps:$4 sm:$0xff]  }
 0x3fe   :  { %5134 = vmatprep.subr.bf16.mxu0 %v8797_v9  ;;  %5216 = vmatprep.subr.bf16.mxu1 %v8800_v4  ;;  %v8879_v9 = vld [vmem:[#allocation8 + $0x140] ss:$16 sps:$4 sm:$0xff]   ;;  %v8882_v4 = vld [vmem:[#allocation8 + $0x148] ss:$16 sps:$4 sm:$0xff]  }
 0x401   :  { %5135 = vmatpush1.bf16.msra.mxu0 %v8795_v5  ;;  %5217 = vmatpush1.bf16.msra.mxu1 %v8798_v29  ;;  %v8887_v5 = vld [vmem:[#allocation8 + $0x164] ss:$16 sps:$4 sm:$0xff]   ;;  %v8890_v29 = vld [vmem:[#allocation8 + $0x16c] ss:$16 sps:$4 sm:$0xff]  }
 0x402   :  { %5136 = vmatprep.subr.bf16.mxu0 %v8803_v22  ;;  %5218 = vmatprep.subr.bf16.mxu1 %v8806_v46  ;;  %v8885_v22 = vld [vmem:[#allocation8 + $0x160] ss:$16 sps:$4 sm:$0xff]   ;;  %v8888_v46 = vld [vmem:[#allocation8 + $0x168] ss:$16 sps:$4 sm:$0xff]  }
 0x405   :  { %5137 = vmatpush1.bf16.msra.mxu0 %v8801_v6  ;;  %5219 = vmatpush1.bf16.msra.mxu1 %v8804_v30  ;;  %v8893_v6 = vld [vmem:[#allocation8 + $0x184] ss:$16 sps:$4 sm:$0xff]   ;;  %v8896_v30 = vld [vmem:[#allocation8 + $0x18c] ss:$16 sps:$4 sm:$0xff]  }
 0x406   :  { %5138 = vmatprep.subr.bf16.mxu0 %v8809_v35  ;;  %5220 = vmatprep.subr.bf16.mxu1 %v8812_v48  ;;  %v8891_v35 = vld [vmem:[#allocation8 + $0x180] ss:$16 sps:$4 sm:$0xff]   ;;  %v8894_v48 = vld [vmem:[#allocation8 + $0x188] ss:$16 sps:$4 sm:$0xff]  }
 0x409   :  { %5139 = vmatpush1.bf16.msra.mxu0 %v8807_v8  ;;  %5221 = vmatpush1.bf16.msra.mxu1 %v8810_v10  ;;  %v8899_v8 = vld [vmem:[#allocation8 + $0x1a4] ss:$16 sps:$4 sm:$0xff]   ;;  %v8897_v10 = vld [vmem:[#allocation8 + $0x1a0] ss:$16 sps:$4 sm:$0xff]  }
 0x40a   :  { %5140 = vmatprep.subr.bf16.mxu0 %v8815_v52  ;;  %5222 = vmatprep.subr.bf16.mxu1 %v8818_v61  ;;  %v8900_v52 = vld [vmem:[#allocation8 + $0x1a8] ss:$16 sps:$4 sm:$0xff]   ;;  %v8902_v61 = vld [vmem:[#allocation8 + $0x1ac] ss:$16 sps:$4 sm:$0xff]  }
 0x40d   :  { %5141 = vmatpush1.bf16.msra.mxu0 %v8813_v42  ;;  %5223 = vmatpush1.bf16.msra.mxu1 %v8816_v1  ;;  %v8905_v42 = vld [vmem:[#allocation8 + $0x1c4] ss:$16 sps:$4 sm:$0xff]   ;;  %v8908_v1 = vld [vmem:[#allocation8 + $0x1cc] ss:$16 sps:$4 sm:$0xff]  }
 0x40e   :  { %5829 = vmatprep.subr.bf16.mxu0 %v8821_v31  ;;  %5870 = vmatprep.subr.bf16.mxu1 %v8824_v16  ;;  %v8906_v31 = vld [vmem:[#allocation8 + $0x1c8] ss:$16 sps:$4 sm:$0xff]   ;;  %v8911_v16 = vld [vmem:[#allocation8 + $0x1e4] ss:$16 sps:$4 sm:$0xff]  }
 0x410   :  { %5143 = vmatmul.mubr.bf16.vlgmr.msra.gmra.mrb[8].mxu0 %v4297_v2  ;;  %5225 = vmatmul.mubr.bf16.vlgmr.msra.gmra.mrb[8].mxu1 %v4297_v2  ;;  %v8903_v2 = vld [vmem:[#allocation8 + $0x1c0] ss:$16 sps:$4 sm:$0xff]  }
 0x411   :  { %5830 = vmatpush1.bf16.msra.mxu0 %v8819_v57  ;;  %5871 = vmatpush1.bf16.msra.mxu1 %v8822_v56  ;;  %v8914_v57 = vld [vmem:[#allocation8 + $0x1ec] ss:$16 sps:$4 sm:$0xff]   ;;  %v8909_v56 = vld [vmem:[#allocation8 + $0x1e0] ss:$16 sps:$4 sm:$0xff]  }
 0x412   :  { %5831 = vmatprep.subr.bf16.mxu0 %v8827_v3  ;;  %5872 = vmatprep.subr.bf16.mxu1 %v8830_v58  ;;  %v8912_v3 = vld [vmem:[#allocation8 + $0x1e8] ss:$16 sps:$4 sm:$0xff]  }
 0x415   :  { %5832 = vmatpush1.bf16.msra.mxu0 %v8825_v39  ;;  %5873 = vmatpush1.bf16.msra.mxu1 %v8828_v25 }
 0x416   :  { %5833 = vmatprep.subr.bf16.mxu0 %v8833_v37  ;;  %5874 = vmatprep.subr.bf16.mxu1 %v8836_v23 }
 0x419   :  { %5834 = vmatpush1.bf16.msra.mxu0 %v8831_v40  ;;  %5875 = vmatpush1.bf16.msra.mxu1 %v8834_v59 }
 0x41a   :  { %5835 = vmatprep.subr.bf16.mxu0 %v8839_v13  ;;  %5876 = vmatprep.subr.bf16.mxu1 %v8842_v33 }
 0x41d   :  { %5836 = vmatpush1.bf16.msra.mxu0 %v8837_v49  ;;  %5877 = vmatpush1.bf16.msra.mxu1 %v8840_v43 }
 0x41e   :  { %5837 = vmatprep.subr.bf16.mxu0 %v8845_v32  ;;  %5878 = vmatprep.subr.bf16.mxu1 %v8848_v45 }
 0x421   :  { %5838 = vmatpush1.bf16.msra.mxu0 %v8843_v28  ;;  %5879 = vmatpush1.bf16.msra.mxu1 %v8846_v19 }
 0x422   :  { %5839 = vmatprep.subr.bf16.mxu0 %v8851_v20  ;;  %5880 = vmatprep.subr.bf16.mxu1 %v8854_v36 }
 0x425   :  { %5840 = vmatpush1.bf16.msra.mxu0 %v8849_v34  ;;  %5881 = vmatpush1.bf16.msra.mxu1 %v8852_v38 }
 0x426   :  { %5841 = vmatprep.subr.bf16.mxu0 %v8857_v15  ;;  %5882 = vmatprep.subr.bf16.mxu1 %v8860_v21 }
 0x429   :  { %5842 = vmatpush1.bf16.msra.mxu0 %v8855_v12  ;;  %5883 = vmatpush1.bf16.msra.mxu1 %v8858_v41 }
 0x42a   :  { %5843 = vmatprep.subr.bf16.mxu0 %v8863_v54  ;;  %5884 = vmatprep.subr.bf16.mxu1 %v8866_v47 }
 0x42d   :  { %5844 = vmatpush1.bf16.msra.mxu0 %v8861_v27  ;;  %5885 = vmatpush1.bf16.msra.mxu1 %v8864_v24 }
 0x42e   :  { %5845 = vmatprep.subr.bf16.mxu0 %v8869_v44  ;;  %5886 = vmatprep.subr.bf16.mxu1 %v8872_v14 }
 0x431   :  { %5846 = vmatpush1.bf16.msra.mxu0 %v8867_v53  ;;  %5887 = vmatpush1.bf16.msra.mxu1 %v8870_v63 }
 0x432   :  { %5847 = vmatprep.subr.bf16.mxu0 %v8875_v18  ;;  %5888 = vmatprep.subr.bf16.mxu1 %v8878_v17 }
 0x435   :  { %5848 = vmatpush1.bf16.msra.mxu0 %v8873_v62  ;;  %5889 = vmatpush1.bf16.msra.mxu1 %v8876_v0 }
 0x436   :  { %5849 = vmatprep.subr.bf16.mxu0 %v8881_v26  ;;  %5890 = vmatprep.subr.bf16.mxu1 %v8884_v7 }
 0x439   :  { %5850 = vmatpush1.bf16.msra.mxu0 %v8879_v9  ;;  %5891 = vmatpush1.bf16.msra.mxu1 %v8882_v4 }
 0x43a   :  { %5851 = vmatprep.subr.bf16.mxu0 %v8887_v5  ;;  %5892 = vmatprep.subr.bf16.mxu1 %v8890_v29 }
 0x43d   :  { %5852 = vmatpush1.bf16.msra.mxu0 %v8885_v22  ;;  %5893 = vmatpush1.bf16.msra.mxu1 %v8888_v46 }
 0x43e   :  { %5853 = vmatprep.subr.bf16.mxu0 %v8893_v6  ;;  %5894 = vmatprep.subr.bf16.mxu1 %v8896_v30 }
 0x441   :  { %5854 = vmatpush1.bf16.msra.mxu0 %v8891_v35  ;;  %5895 = vmatpush1.bf16.msra.mxu1 %v8894_v48 }
 0x442   :  { %5855 = vmatprep.subr.bf16.mxu0 %v8899_v8  ;;  %5896 = vmatprep.subr.bf16.mxu1 %v8902_v61 }
 0x445   :  { %5856 = vmatpush1.bf16.msra.mxu0 %v8897_v10  ;;  %5897 = vmatpush1.bf16.msra.mxu1 %v8900_v52 }
 0x446   :  { %5857 = vmatprep.subr.bf16.mxu0 %v8905_v42  ;;  %5898 = vmatprep.subr.bf16.mxu1 %v8908_v1 }
 0x449   :  { %5858 = vmatpush1.bf16.msra.mxu0 %v8903_v2  ;;  %5899 = vmatpush1.bf16.msra.mxu1 %v8906_v31 }
 0x44a   :  { %5859 = vmatprep.subr.bf16.mxu0 %v8911_v16  ;;  %5900 = vmatprep.subr.bf16.mxu1 %v8914_v57 }
 0x44d   :  { %5860 = vmatpush1.bf16.msra.mxu0 %v8909_v56  ;;  %5901 = vmatpush1.bf16.msra.mxu1 %v8912_v3 }
 0x4e3   :  { %v9929_v58 = vpop.f32.mrb[8].mxu0  ;;  %v9931_v39 = vpop.f32.mrb[8].mxu1 }
 0x4e4   :  { %v5233_v25 = vrot.slane %v9929_v58, 4  ;;  %v5261_v37 = vmul.f32 %v9929_v58, %v9929_v58  ;;  %v5245_v23 = vrot.slane %v9931_v39, 4  ;;  %v5263_v40 = vmul.f32 %v9931_v39, %v9931_v39  ;;  %v9939_v59 = vpop.f32.mrb[9].mxu0  ;;  %v9941_v13 = vpop.f32.mrb[9].mxu1 }
 0x4e5   :  { %v5239_v33 = vrot.slane %v9939_v59, 4  ;;  %v5262_v49 = vmul.f32 %v9939_v59, %v9939_v59  ;;  %v5251_v43 = vrot.slane %v9941_v13, 4  ;;  %v5264_v32 = vmul.f32 %v9941_v13, %v9941_v13  ;;  %v5148_v45 = vpop.f32.mrb[10].mxu0  ;;  %v5230_v28 = vpop.f32.mrb[10].mxu1 }
 0x4e6   :  { %v5234_v19 = vadd.f32 %v5233_v25, %v9929_v58  ;;  %v5265_v20 = vrot.slane %v5261_v37, 4  ;;  %v5246_v36 = vadd.f32 %v5245_v23, %v9931_v39  ;;  %v5277_v34 = vrot.slane %v5263_v40, 4  ;;  %v5149_v38 = vpop.f32.mrb[11].mxu0  ;;  %v5231_v15 = vpop.f32.mrb[11].mxu1 }
 0x4e7   :  { %v5240_v21 = vadd.f32 %v5239_v33, %v9939_v59  ;;  %v5271_v12 = vrot.slane %v5262_v49, 4  ;;  %v5252_v41 = vadd.f32 %v5251_v43, %v9941_v13  ;;  %v5283_v54 = vrot.slane %v5264_v32, 4 }
 0x4e8   :  { %v5235_v47 = vrot.slane %v5234_v19, 2  ;;  %v5266_v27 = vadd.f32 %v5265_v20, %v5261_v37  ;;  %v5247_v24 = vrot.slane %v5246_v36, 2  ;;  %v5278_v44 = vadd.f32 %v5277_v34, %v5263_v40 }
 0x4e9   :  { %v5241_v14 = vrot.slane %v5240_v21, 2  ;;  %v5272_v53 = vadd.f32 %v5271_v12, %v5262_v49  ;;  %v5253_v63 = vrot.slane %v5252_v41, 2  ;;  %v5284_v18 = vadd.f32 %v5283_v54, %v5264_v32 }
 0x4ea   :  { %v5236_v17 = vadd.f32 %v5235_v47, %v5234_v19  ;;  %v5267_v62 = vrot.slane %v5266_v27, 2  ;;  %v5248_v0 = vadd.f32 %v5247_v24, %v5246_v36  ;;  %v5279_v26 = vrot.slane %v5278_v44, 2 }
 0x4eb   :  { %v5242_v7 = vadd.f32 %v5241_v14, %v5240_v21  ;;  %v5273_v9 = vrot.slane %v5272_v53, 2  ;;  %v5254_v4 = vadd.f32 %v5253_v63, %v5252_v41  ;;  %v5285_v5 = vrot.slane %v5284_v18, 2 }
 0x4ec   :  { %v5237_v29 = vrot.slane %v5236_v17, 1  ;;  %v5268_v22 = vadd.f32 %v5267_v62, %v5266_v27  ;;  %v5249_v46 = vrot.slane %v5248_v0, 1  ;;  %v5280_v6 = vadd.f32 %v5279_v26, %v5278_v44 }
 0x4ed   :  { %v5243_v30 = vrot.slane %v5242_v7, 1  ;;  %v5274_v35 = vadd.f32 %v5273_v9, %v5272_v53  ;;  %v5255_v48 = vrot.slane %v5254_v4, 1  ;;  %v5286_v8 = vadd.f32 %v5285_v5, %v5284_v18 }
 0x4ee   :  { %v5238_v10 = vadd.f32 %v5237_v29, %v5236_v17  ;;  %v5269_v52 = vrot.slane %v5268_v22, 1  ;;  %v5250_v61 = vadd.f32 %v5249_v46, %v5248_v0  ;;  %v5281_v42 = vrot.slane %v5280_v6, 1 }
 0x4ef   :  { %v5244_v1 = vadd.f32 %v5243_v30, %v5242_v7  ;;  %v5275_v2 = vrot.slane %v5274_v35, 1  ;;  %v5256_v31 = vadd.f32 %v5255_v48, %v5254_v4  ;;  %v5287_v16 = vrot.slane %v5286_v8, 1  ;;  %v4299_v4 = vld [vmem:[#allocation14 + $0x8] sm:$0xf] }
 0x4f0   :  { %v5257_v57 = vmul.f32 0.125, %v5238_v10  ;;  %v5270_v56 = vadd.f32 %v5269_v52, %v5268_v22  ;;  %v5259_v3 = vmul.f32 0.125, %v5250_v61  ;;  %v5282_v25 = vadd.f32 %v5281_v42, %v5280_v6 }
 0x4f1   :  { %v5258_v37 = vmul.f32 0.125, %v5244_v1  ;;  %v5276_v23 = vadd.f32 %v5275_v2, %v5274_v35  ;;  %v5260_v40 = vmul.f32 0.125, %v5256_v31  ;;  %v5288_v33 = vadd.f32 %v5287_v16, %v5286_v8 }
 0x4f2   :  { %v5289_v49 = vmul.f32 0.125, %v5270_v56  ;;  %v5293_v43 = vmul.f32 %v5257_v57, %v5257_v57  ;;  %v5291_v32 = vmul.f32 0.125, %v5282_v25  ;;  %v5295_v45 = vmul.f32 %v5259_v3, %v5259_v3 }
 0x4f3   :  { %v5290_v28 = vmul.f32 0.125, %v5276_v23  ;;  %v5294_v19 = vmul.f32 %v5258_v37, %v5258_v37  ;;  %v5292_v20 = vmul.f32 0.125, %v5288_v33  ;;  %v5296_v36 = vmul.f32 %v5260_v40, %v5260_v40  ;;  %v4300_v23 = vld [vmem:[#allocation14 + $0x20] sm:$0xf] }
 0x4f4   :  { %v5297_v34 = vsub.f32 %v5289_v49, %v5293_v43  ;;  %v5299_v38 = vsub.f32 %v5291_v32, %v5295_v45 }
 0x4f5   :  { %v5298_v15 = vsub.f32 %v5290_v28, %v5294_v19  ;;  %v5300_v21 = vsub.f32 %v5292_v20, %v5296_v36 }
 0x4f6   :  { %v5301_v12 = vmax.f32 %v5297_v34, 0.0  ;;  %v5303_v41 = vmax.f32 %v5299_v38, 0.0 }
 0x4f7   :  { %v5302_v54 = vmax.f32 %v5298_v15, 0.0  ;;  %v5304_v47 = vmax.f32 %v5300_v21, 0.0 }
 0x4f8   :  { %v5305_v27 = vadd.f32 1e-05, %v5301_v12  ;;  %v5307_v24 = vadd.f32 1e-05, %v5303_v41  ;;  %v8917_v41 = vld [vmem:[#allocation10 + $0x4] ss:$16 sps:$4 sm:$0xff]  }
 0x4f9   :  { %v5306_v44 = vadd.f32 1e-05, %v5302_v54  ;;  %v5308_v14 = vadd.f32 1e-05, %v5304_v47  ;;  %v8920_v54 = vld [vmem:[#allocation10 + $0xc] ss:$16 sps:$4 sm:$0xff]   ;;  %6507 = vmatprep.subr.bf16.mxu0 %v8917_v41 }
 0x4fa   :  { %9155 = vrsqrt.f32 %v5305_v27  ;;  %v8915_v47 = vld [vmem:[#allocation10] ss:$16 sps:$4 sm:$0xff]   ;;  %v8918_v27 = vld [vmem:[#allocation10 + $0x8] ss:$16 sps:$4 sm:$0xff]   ;;  %6548 = vmatprep.subr.bf16.mxu1 %v8920_v54  ;;  %v9007_v54 = vld [vmem:[#allocation10 + $0x1e4] ss:$16 sps:$4 sm:$0xff]  }
 0x4fb   :  { %9157 = vrsqrt.f32 %v5307_v24  ;;  %v8923_v24 = vld [vmem:[#allocation10 + $0x24] ss:$16 sps:$4 sm:$0xff]   ;;  %v9002_v41 = vld [vmem:[#allocation10 + $0x1c8] ss:$16 sps:$4 sm:$0xff]  }
 0x4fc   :  { %9159 = vrsqrt.f32 %v5306_v44  ;;  %v8926_v44 = vld [vmem:[#allocation10 + $0x2c] ss:$16 sps:$4 sm:$0xff]  }
 0x4fd   :  { %9161 = vrsqrt.f32 %v5308_v14  ;;  %v8921_v14 = vld [vmem:[#allocation10 + $0x20] ss:$16 sps:$4 sm:$0xff]  }
 0x504   :  { %v9156_v53 = vpop.eup %9155 }
 0x505   :  { %v9158_v63 = vpop.eup %9157 }
 0x506   :  { %v9160_v18 = vpop.eup %9159 }
 0x507   :  { %v9162_v17 = vpop.eup %9161  ;;  %v5317_v62 = vcombine.low %v9156_v53, %v9160_v18  ;;  %v8924_v53 = vld [vmem:[#allocation10 + $0x28] ss:$16 sps:$4 sm:$0xff]   ;;  %v8932_v18 = vld [vmem:[#allocation10 + $0x4c] ss:$16 sps:$4 sm:$0xff]  }
 0x508   :  { %v5318_v0 = vcombine.low %v9158_v63, %v9162_v17  ;;  %v8929_v63 = vld [vmem:[#allocation10 + $0x44] ss:$16 sps:$4 sm:$0xff]   ;;  %v8927_v17 = vld [vmem:[#allocation10 + $0x40] ss:$16 sps:$4 sm:$0xff]  }
 0x509   :  { %v5325_v26 = vrot.slane %v5317_v62, %v9825_v11  ;;  %v8930_v62 = vld [vmem:[#allocation10 + $0x48] ss:$16 sps:$4 sm:$0xff]  }
 0x50a   :  { %v5332_v7 = vrot.slane %v5318_v0, %v9825_v11  ;;  %v8935_v0 = vld [vmem:[#allocation10 + $0x64] ss:$16 sps:$4 sm:$0xff]  }
 0x50c   :  { %v5333_v9 = vcombine.low %v5325_v26, %v5332_v7  ;;  %v8938_v26 = vld [vmem:[#allocation10 + $0x6c] ss:$16 sps:$4 sm:$0xff]   ;;  %v8933_v7 = vld [vmem:[#allocation10 + $0x60] ss:$16 sps:$4 sm:$0xff]  }
 0x50e   :  { %v5340_v5 = vrot.slane %v5333_v9, %v9825_v11  ;;  %v8936_v9 = vld [vmem:[#allocation10 + $0x68] ss:$16 sps:$4 sm:$0xff]  }
 0x510   :  { %v5342_v29 = vmul.f32 %v5340_v5, %v4299_v4  ;;  %v8941_v4 = vld [vmem:[#allocation10 + $0x84] ss:$16 sps:$4 sm:$0xff]   ;;  %v8944_v5 = vld [vmem:[#allocation10 + $0x8c] ss:$16 sps:$4 sm:$0xff]  }
 0x512   :  { %v5347_v22 = vrot.slane %v5342_v29, %v9881_v50  ;;  %v5351_v46 = vrot.slane %v5342_v29, %v9884_v55  ;;  %v5355_v6 = vrot.slane %v5342_v29, %v9887_v51  ;;  %v5359_v30 = vrot.slane %v5342_v29, %v9890_v60  ;;  %v8939_v29 = vld [vmem:[#allocation10 + $0x80] ss:$16 sps:$4 sm:$0xff]  }
 0x514   :  { %v5364_v35 = vmul.f32 %v5347_v22, %v5257_v57  ;;  %v5365_v48 = vmul.f32 %v5351_v46, %v5258_v37  ;;  %v5366_v8 = vmul.f32 %v5355_v6, %v5259_v3  ;;  %v5367_v10 = vmul.f32 %v5359_v30, %v5260_v40 }
 0x515   :  { %v5400_v52 = vmul.f32 %v5355_v6, %v9931_v39  ;;  %v5401_v61 = vmul.f32 %v5359_v30, %v9941_v13  ;;  %v5399_v42 = vmul.f32 %v5351_v46, %v9939_v59  ;;  %v5398_v1 = vmul.f32 %v5347_v22, %v9929_v58  ;;  %v8942_v22 = vld [vmem:[#allocation10 + $0x88] ss:$16 sps:$4 sm:$0xff]   ;;  %v8947_v46 = vld [vmem:[#allocation10 + $0xa4] ss:$16 sps:$4 sm:$0xff]   ;;  %v8950_v6 = vld [vmem:[#allocation10 + $0xac] ss:$16 sps:$4 sm:$0xff]  }
 0x516   :  { %v5372_v2 = vcombine.low %v5364_v35, %v5365_v48  ;;  %v5373_v31 = vcombine.low %v5366_v8, %v5367_v10  ;;  %v8945_v30 = vld [vmem:[#allocation10 + $0xa0] ss:$16 sps:$4 sm:$0xff]   ;;  %v8948_v35 = vld [vmem:[#allocation10 + $0xa8] ss:$16 sps:$4 sm:$0xff]   ;;  %v8953_v48 = vld [vmem:[#allocation10 + $0xc4] ss:$16 sps:$4 sm:$0xff]  }
 0x517   :  { %v8956_v8 = vld [vmem:[#allocation10 + $0xcc] ss:$16 sps:$4 sm:$0xff]   ;;  %v8951_v10 = vld [vmem:[#allocation10 + $0xc0] ss:$16 sps:$4 sm:$0xff]  }
 0x518   :  { %v5380_v16 = vrot.slane %v5372_v2, %v9825_v11  ;;  %v5387_v56 = vrot.slane %v5373_v31, %v9825_v11  ;;  %v8960_v2 = vld [vmem:[#allocation10 + $0xe8] ss:$16 sps:$4 sm:$0xff]   ;;  %v8965_v31 = vld [vmem:[#allocation10 + $0x104] ss:$16 sps:$4 sm:$0xff]  }
 0x51a   :  { %v5388_v25 = vcombine.low %v5380_v16, %v5387_v56  ;;  %v8968_v16 = vld [vmem:[#allocation10 + $0x10c] ss:$16 sps:$4 sm:$0xff]   ;;  %v8963_v56 = vld [vmem:[#allocation10 + $0x100] ss:$16 sps:$4 sm:$0xff]  }
 0x51c   :  { %v5395_v57 = vrot.slane %v5388_v25, %v9825_v11  ;;  %v8966_v25 = vld [vmem:[#allocation10 + $0x108] ss:$16 sps:$4 sm:$0xff]  }
 0x51e   :  { %v5397_v3 = vsub.f32 %v4300_v23, %v5395_v57  ;;  %v8971_v23 = vld [vmem:[#allocation10 + $0x124] ss:$16 sps:$4 sm:$0xff]   ;;  %v8974_v57 = vld [vmem:[#allocation10 + $0x12c] ss:$16 sps:$4 sm:$0xff]  }
 0x520   :  { %v5414_v37 = vrot.slane %v5397_v3, %v9887_v51  ;;  %v5418_v39 = vrot.slane %v5397_v3, %v9890_v60  ;;  %v5410_v13 = vrot.slane %v5397_v3, %v9884_v55  ;;  %v5406_v59 = vrot.slane %v5397_v3, %v9881_v50  ;;  %v8969_v3 = vld [vmem:[#allocation10 + $0x120] ss:$16 sps:$4 sm:$0xff]  }
 0x522   :  { %v5425_v58 = vadd.f32 %v5414_v37, %v5400_v52  ;;  %v5426_v40 = vadd.f32 %v5418_v39, %v5401_v61  ;;  %v5424_v33 = vadd.f32 %v5410_v13, %v5399_v42  ;;  %v5423_v49 = vadd.f32 %v5406_v59, %v5398_v1  ;;  %v8954_v52 = vld [vmem:[#allocation10 + $0xc8] ss:$16 sps:$4 sm:$0xff]   ;;  %v8959_v61 = vld [vmem:[#allocation10 + $0xe4] ss:$16 sps:$4 sm:$0xff]   ;;  %v8962_v42 = vld [vmem:[#allocation10 + $0xec] ss:$16 sps:$4 sm:$0xff]  }
 0x523   :  { %v8957_v1 = vld [vmem:[#allocation10 + $0xe0] ss:$16 sps:$4 sm:$0xff]   ;;  %v8972_v37 = vld [vmem:[#allocation10 + $0x128] ss:$16 sps:$4 sm:$0xff]   ;;  %v8977_v39 = vld [vmem:[#allocation10 + $0x144] ss:$16 sps:$4 sm:$0xff]  }
 0x524   :  { %v8316_v43 = vmul.f32 -1.442695, %v5425_v58  ;;  %v8317_v32 = vmul.f32 -1.442695, %v5426_v40  ;;  %v8980_v13 = vld [vmem:[#allocation10 + $0x14c] ss:$16 sps:$4 sm:$0xff]  }
 0x525   :  { %v8975_v59 = vld [vmem:[#allocation10 + $0x140] ss:$16 sps:$4 sm:$0xff]   ;;  %v8978_v58 = vld [vmem:[#allocation10 + $0x148] ss:$16 sps:$4 sm:$0xff]   ;;  %v8983_v40 = vld [vmem:[#allocation10 + $0x164] ss:$16 sps:$4 sm:$0xff]  }
 0x526   :  { %9163 = vpow2.f32 %v8316_v43  ;;  %v8984_v43 = vld [vmem:[#allocation10 + $0x168] ss:$16 sps:$4 sm:$0xff]  }
 0x527   :  { %9165 = vpow2.f32 %v8317_v32  ;;  %v8989_v32 = vld [vmem:[#allocation10 + $0x184] ss:$16 sps:$4 sm:$0xff]  }
 0x530   :  { %v9164_v45 = vpop.eup %9163 }
 0x531   :  { %v9166_v28 = vpop.eup %9165  ;;  %v5433_v19 = vadd.f32 1.0, %v9164_v45  ;;  %v8992_v45 = vld [vmem:[#allocation10 + $0x18c] ss:$16 sps:$4 sm:$0xff]  }
 0x532   :  { %v5434_v20 = vadd.f32 1.0, %v9166_v28  ;;  %v8987_v28 = vld [vmem:[#allocation10 + $0x180] ss:$16 sps:$4 sm:$0xff]  }
 0x533   :  { %9167 = vrcp.f32 %v5433_v19  ;;  %v8990_v19 = vld [vmem:[#allocation10 + $0x188] ss:$16 sps:$4 sm:$0xff]  }
 0x534   :  { %9169 = vrcp.f32 %v5434_v20  ;;  %v8995_v20 = vld [vmem:[#allocation10 + $0x1a4] ss:$16 sps:$4 sm:$0xff]  }
 0x53d   :  { %v9168_v36 = vpop.eup %9167 }
 0x53e   :  { %v9170_v34 = vpop.eup %9169  ;;  %v5439_v38 = vmul.f32 %v9168_v36, %v5423_v49  ;;  %v8981_v49 = vld [vmem:[#allocation10 + $0x160] ss:$16 sps:$4 sm:$0xff]  }
 0x53f   :  { %v5440_v15 = vmul.f32 %v9170_v34, %v5424_v33  ;;  %v8986_v33 = vld [vmem:[#allocation10 + $0x16c] ss:$16 sps:$4 sm:$0xff]   ;;  %v8993_v36 = vld [vmem:[#allocation10 + $0x1a0] ss:$16 sps:$4 sm:$0xff]   ;;  %v8996_v34 = vld [vmem:[#allocation10 + $0x1a8] ss:$16 sps:$4 sm:$0xff]  }
 0x540   :  { %v5441_v21 = vpack.c.bf16 %v5439_v38, %v5439_v38  ;;  %v8998_v38 = vld [vmem:[#allocation10 + $0x1ac] ss:$16 sps:$4 sm:$0xff]  }
 0x541   :  { %v5442_v12 = vpack.c.bf16 %v5440_v15, %v5440_v15  ;;  %v9001_v15 = vld [vmem:[#allocation10 + $0x1c4] ss:$16 sps:$4 sm:$0xff]  }
 0x543   :  { %5861 = vmatprep.mubr.bf16.mxu0 %v5442_v12  ;;  %5902 = vmatprep.mubr.bf16.mxu1 %v5442_v12  ;;  %v8999_v12 = vld [vmem:[#allocation10 + $0x1c0] ss:$16 sps:$4 sm:$0xff]  }
 0x544   :  { %5862 = vmatmul.mubr.bf16.vlgmr.msra.gmra.mrb[12].mxu0 %v5441_v21  ;;  %5903 = vmatmul.mubr.bf16.vlgmr.msra.gmra.mrb[12].mxu1 %v5441_v21  ;;  %v9004_v21 = vld [vmem:[#allocation10 + $0x1cc] ss:$16 sps:$4 sm:$0xff]  }
 0x545   :  { %6508 = vmatpush1.bf16.msra.mxu0 %v8915_v47  ;;  %6549 = vmatpush1.bf16.msra.mxu1 %v8918_v27  ;;  %v9010_v47 = vld [vmem:[#allocation10 + $0x1ec] ss:$16 sps:$4 sm:$0xff]   ;;  %v9005_v27 = vld [vmem:[#allocation10 + $0x1e0] ss:$16 sps:$4 sm:$0xff]  }
 0x546   :  { %6509 = vmatprep.subr.bf16.mxu0 %v8923_v24  ;;  %6550 = vmatprep.subr.bf16.mxu1 %v8926_v44  ;;  %v9008_v24 = vld [vmem:[#allocation10 + $0x1e8] ss:$16 sps:$4 sm:$0xff]  }
 0x549   :  { %6510 = vmatpush1.bf16.msra.mxu0 %v8921_v14  ;;  %6551 = vmatpush1.bf16.msra.mxu1 %v8924_v53 }
 0x54a   :  { %6511 = vmatprep.subr.bf16.mxu0 %v8929_v63  ;;  %6552 = vmatprep.subr.bf16.mxu1 %v8932_v18 }
 0x54d   :  { %6512 = vmatpush1.bf16.msra.mxu0 %v8927_v17  ;;  %6553 = vmatpush1.bf16.msra.mxu1 %v8930_v62 }
 0x54e   :  { %6513 = vmatprep.subr.bf16.mxu0 %v8935_v0  ;;  %6554 = vmatprep.subr.bf16.mxu1 %v8938_v26 }
 0x551   :  { %6514 = vmatpush1.bf16.msra.mxu0 %v8933_v7  ;;  %6555 = vmatpush1.bf16.msra.mxu1 %v8936_v9 }
 0x552   :  { %6515 = vmatprep.subr.bf16.mxu0 %v8941_v4  ;;  %6556 = vmatprep.subr.bf16.mxu1 %v8944_v5 }
 0x555   :  { %6516 = vmatpush1.bf16.msra.mxu0 %v8939_v29  ;;  %6557 = vmatpush1.bf16.msra.mxu1 %v8942_v22 }
 0x556   :  { %6517 = vmatprep.subr.bf16.mxu0 %v8947_v46  ;;  %6558 = vmatprep.subr.bf16.mxu1 %v8950_v6 }
 0x559   :  { %6518 = vmatpush1.bf16.msra.mxu0 %v8945_v30  ;;  %6559 = vmatpush1.bf16.msra.mxu1 %v8948_v35 }
 0x55a   :  { %6519 = vmatprep.subr.bf16.mxu0 %v8953_v48  ;;  %6560 = vmatprep.subr.bf16.mxu1 %v8956_v8 }
 0x55d   :  { %6520 = vmatpush1.bf16.msra.mxu0 %v8951_v10  ;;  %6561 = vmatpush1.bf16.msra.mxu1 %v8954_v52 }
 0x55e   :  { %6521 = vmatprep.subr.bf16.mxu0 %v8959_v61  ;;  %6562 = vmatprep.subr.bf16.mxu1 %v8962_v42 }
 0x561   :  { %6522 = vmatpush1.bf16.msra.mxu0 %v8957_v1  ;;  %6563 = vmatpush1.bf16.msra.mxu1 %v8960_v2 }
 0x562   :  { %6523 = vmatprep.subr.bf16.mxu0 %v8965_v31  ;;  %6564 = vmatprep.subr.bf16.mxu1 %v8968_v16 }
 0x565   :  { %6524 = vmatpush1.bf16.msra.mxu0 %v8963_v56  ;;  %6565 = vmatpush1.bf16.msra.mxu1 %v8966_v25 }
 0x566   :  { %6525 = vmatprep.subr.bf16.mxu0 %v8971_v23  ;;  %6566 = vmatprep.subr.bf16.mxu1 %v8974_v57 }
 0x569   :  { %6526 = vmatpush1.bf16.msra.mxu0 %v8969_v3  ;;  %6567 = vmatpush1.bf16.msra.mxu1 %v8972_v37 }
 0x56a   :  { %6527 = vmatprep.subr.bf16.mxu0 %v8977_v39  ;;  %6568 = vmatprep.subr.bf16.mxu1 %v8980_v13 }
 0x56d   :  { %6528 = vmatpush1.bf16.msra.mxu0 %v8975_v59  ;;  %6569 = vmatpush1.bf16.msra.mxu1 %v8978_v58 }
 0x56e   :  { %6529 = vmatprep.subr.bf16.mxu0 %v8983_v40  ;;  %6570 = vmatprep.subr.bf16.mxu1 %v8986_v33 }
 0x571   :  { %6530 = vmatpush1.bf16.msra.mxu0 %v8981_v49  ;;  %6571 = vmatpush1.bf16.msra.mxu1 %v8984_v43 }
 0x572   :  { %6531 = vmatprep.subr.bf16.mxu0 %v8989_v32  ;;  %6572 = vmatprep.subr.bf16.mxu1 %v8992_v45 }
 0x575   :  { %6532 = vmatpush1.bf16.msra.mxu0 %v8987_v28  ;;  %6573 = vmatpush1.bf16.msra.mxu1 %v8990_v19 }
 0x576   :  { %6533 = vmatprep.subr.bf16.mxu0 %v8995_v20  ;;  %6574 = vmatprep.subr.bf16.mxu1 %v8998_v38 }
 0x579   :  { %6534 = vmatpush1.bf16.msra.mxu0 %v8993_v36  ;;  %6575 = vmatpush1.bf16.msra.mxu1 %v8996_v34 }
 0x57a   :  { %6535 = vmatprep.subr.bf16.mxu0 %v9001_v15  ;;  %6576 = vmatprep.subr.bf16.mxu1 %v9004_v21 }
 0x57d   :  { %6536 = vmatpush1.bf16.msra.mxu0 %v8999_v12  ;;  %6577 = vmatpush1.bf16.msra.mxu1 %v9002_v41 }
 0x57e   :  { %6537 = vmatprep.subr.bf16.mxu0 %v9007_v54  ;;  %6578 = vmatprep.subr.bf16.mxu1 %v9010_v47 }
 0x581   :  { %6538 = vmatpush1.bf16.msra.mxu0 %v9005_v27  ;;  %6579 = vmatpush1.bf16.msra.mxu1 %v9008_v24 }
 0x617   :  { %v9971_v44 = vpop.f32.mrb[12].mxu0  ;;  %v9973_v14 = vpop.f32.mrb[12].mxu1 }
 0x618   :  { %v5911_v53 = vrot.slane %v9971_v44, 4  ;;  %v5939_v63 = vmul.f32 %v9971_v44, %v9971_v44  ;;  %v5923_v18 = vrot.slane %v9973_v14, 4  ;;  %v5941_v17 = vmul.f32 %v9973_v14, %v9973_v14  ;;  %v9981_v62 = vpop.f32.mrb[13].mxu0  ;;  %v9983_v0 = vpop.f32.mrb[13].mxu1 }
 0x619   :  { %v5917_v26 = vrot.slane %v9981_v62, 4  ;;  %v5940_v7 = vmul.f32 %v9981_v62, %v9981_v62  ;;  %v5929_v9 = vrot.slane %v9983_v0, 4  ;;  %v5942_v4 = vmul.f32 %v9983_v0, %v9983_v0  ;;  %v5867_v5 = vpop.f32.mrb[14].mxu0  ;;  %v5908_v29 = vpop.f32.mrb[14].mxu1 }
 0x61a   :  { %v5912_v22 = vadd.f32 %v5911_v53, %v9971_v44  ;;  %v5943_v46 = vrot.slane %v5939_v63, 4  ;;  %v5924_v6 = vadd.f32 %v5923_v18, %v9973_v14  ;;  %v5955_v30 = vrot.slane %v5941_v17, 4  ;;  %v5868_v35 = vpop.f32.mrb[15].mxu0  ;;  %v5909_v48 = vpop.f32.mrb[15].mxu1 }
 0x61b   :  { %v5918_v8 = vadd.f32 %v5917_v26, %v9981_v62  ;;  %v5949_v10 = vrot.slane %v5940_v7, 4  ;;  %v5930_v52 = vadd.f32 %v5929_v9, %v9983_v0  ;;  %v5961_v61 = vrot.slane %v5942_v4, 4 }
 0x61c   :  { %v5913_v42 = vrot.slane %v5912_v22, 2  ;;  %v5944_v1 = vadd.f32 %v5943_v46, %v5939_v63  ;;  %v5925_v2 = vrot.slane %v5924_v6, 2  ;;  %v5956_v31 = vadd.f32 %v5955_v30, %v5941_v17 }
 0x61d   :  { %v5919_v16 = vrot.slane %v5918_v8, 2  ;;  %v5950_v56 = vadd.f32 %v5949_v10, %v5940_v7  ;;  %v5931_v25 = vrot.slane %v5930_v52, 2  ;;  %v5962_v23 = vadd.f32 %v5961_v61, %v5942_v4 }
 0x61e   :  { %v5914_v57 = vadd.f32 %v5913_v42, %v5912_v22  ;;  %v5945_v3 = vrot.slane %v5944_v1, 2  ;;  %v5926_v37 = vadd.f32 %v5925_v2, %v5924_v6  ;;  %v5957_v39 = vrot.slane %v5956_v31, 2 }
 0x61f   :  { %v5920_v13 = vadd.f32 %v5919_v16, %v5918_v8  ;;  %v5951_v59 = vrot.slane %v5950_v56, 2  ;;  %v5932_v58 = vadd.f32 %v5931_v25, %v5930_v52  ;;  %v5963_v40 = vrot.slane %v5962_v23, 2 }
 0x620   :  { %v5915_v33 = vrot.slane %v5914_v57, 1  ;;  %v5946_v49 = vadd.f32 %v5945_v3, %v5944_v1  ;;  %v5927_v43 = vrot.slane %v5926_v37, 1  ;;  %v5958_v32 = vadd.f32 %v5957_v39, %v5956_v31 }
 0x621   :  { %v5921_v45 = vrot.slane %v5920_v13, 1  ;;  %v5952_v28 = vadd.f32 %v5951_v59, %v5950_v56  ;;  %v5933_v19 = vrot.slane %v5932_v58, 1  ;;  %v5964_v20 = vadd.f32 %v5963_v40, %v5962_v23 }
 0x622   :  { %v5916_v36 = vadd.f32 %v5915_v33, %v5914_v57  ;;  %v5947_v34 = vrot.slane %v5946_v49, 1  ;;  %v5928_v38 = vadd.f32 %v5927_v43, %v5926_v37  ;;  %v5959_v15 = vrot.slane %v5958_v32, 1 }
 0x623   :  { %v5922_v21 = vadd.f32 %v5921_v45, %v5920_v13  ;;  %v5953_v12 = vrot.slane %v5952_v28, 1  ;;  %v5934_v41 = vadd.f32 %v5933_v19, %v5932_v58  ;;  %v5965_v54 = vrot.slane %v5964_v20, 1  ;;  %v5443_v58 = vld [vmem:[#allocation14 + $0xc] sm:$0xf] }
 0x624   :  { %v5935_v47 = vmul.f32 0.125, %v5916_v36  ;;  %v5948_v27 = vadd.f32 %v5947_v34, %v5946_v49  ;;  %v5937_v24 = vmul.f32 0.125, %v5928_v38  ;;  %v5960_v53 = vadd.f32 %v5959_v15, %v5958_v32 }
 0x625   :  { %v5936_v63 = vmul.f32 0.125, %v5922_v21  ;;  %v5954_v18 = vadd.f32 %v5953_v12, %v5952_v28  ;;  %v5938_v17 = vmul.f32 0.125, %v5934_v41  ;;  %v5966_v26 = vadd.f32 %v5965_v54, %v5964_v20 }
 0x626   :  { %v5967_v7 = vmul.f32 0.125, %v5948_v27  ;;  %v5971_v9 = vmul.f32 %v5935_v47, %v5935_v47  ;;  %v5969_v4 = vmul.f32 0.125, %v5960_v53  ;;  %v5973_v5 = vmul.f32 %v5937_v24, %v5937_v24 }
 0x627   :  { %v5968_v29 = vmul.f32 0.125, %v5954_v18  ;;  %v5972_v22 = vmul.f32 %v5936_v63, %v5936_v63  ;;  %v5970_v46 = vmul.f32 0.125, %v5966_v26  ;;  %v5974_v6 = vmul.f32 %v5938_v17, %v5938_v17  ;;  %v5444_v18 = vld [vmem:[#allocation14 + $0x24] sm:$0xf] }
 0x628   :  { %v5975_v30 = vsub.f32 %v5967_v7, %v5971_v9  ;;  %v5977_v35 = vsub.f32 %v5969_v4, %v5973_v5 }
 0x629   :  { %v5976_v48 = vsub.f32 %v5968_v29, %v5972_v22  ;;  %v5978_v8 = vsub.f32 %v5970_v46, %v5974_v6 }
 0x62a   :  { %v5979_v10 = vmax.f32 %v5975_v30, 0.0  ;;  %v5981_v52 = vmax.f32 %v5977_v35, 0.0 }
 0x62b   :  { %v5980_v61 = vmax.f32 %v5976_v48, 0.0  ;;  %v5982_v42 = vmax.f32 %v5978_v8, 0.0 }
 0x62c   :  { %v5983_v1 = vadd.f32 1e-05, %v5979_v10  ;;  %v5985_v2 = vadd.f32 1e-05, %v5981_v52  ;;  %v9013_v52 = vld [vmem:[#allocation11 + $0x4] ss:$16 sps:$4 sm:$0xff]  }
 0x62d   :  { %v5984_v31 = vadd.f32 1e-05, %v5980_v61  ;;  %v5986_v16 = vadd.f32 1e-05, %v5982_v42  ;;  %v9016_v61 = vld [vmem:[#allocation11 + $0xc] ss:$16 sps:$4 sm:$0xff]   ;;  %7185 = vmatprep.subr.bf16.mxu0 %v9013_v52 }
 0x62e   :  { %9171 = vrsqrt.f32 %v5983_v1  ;;  %v9011_v42 = vld [vmem:[#allocation11] ss:$16 sps:$4 sm:$0xff]   ;;  %v9014_v1 = vld [vmem:[#allocation11 + $0x8] ss:$16 sps:$4 sm:$0xff]   ;;  %7226 = vmatprep.subr.bf16.mxu1 %v9016_v61  ;;  %v9103_v61 = vld [vmem:[#allocation11 + $0x1e4] ss:$16 sps:$4 sm:$0xff]  }
 0x62f   :  { %9173 = vrsqrt.f32 %v5985_v2  ;;  %v9019_v2 = vld [vmem:[#allocation11 + $0x24] ss:$16 sps:$4 sm:$0xff]   ;;  %v9098_v52 = vld [vmem:[#allocation11 + $0x1c8] ss:$16 sps:$4 sm:$0xff]  }
 0x630   :  { %9175 = vrsqrt.f32 %v5984_v31  ;;  %v9022_v31 = vld [vmem:[#allocation11 + $0x2c] ss:$16 sps:$4 sm:$0xff]  }
 0x631   :  { %9177 = vrsqrt.f32 %v5986_v16  ;;  %v9017_v16 = vld [vmem:[#allocation11 + $0x20] ss:$16 sps:$4 sm:$0xff]  }
 0x638   :  { %v9172_v56 = vpop.eup %9171 }
 0x639   :  { %v9174_v25 = vpop.eup %9173 }
 0x63a   :  { %v9176_v23 = vpop.eup %9175 }
 0x63b   :  { %v9178_v57 = vpop.eup %9177  ;;  %v5995_v3 = vcombine.low %v9172_v56, %v9176_v23  ;;  %v9020_v56 = vld [vmem:[#allocation11 + $0x28] ss:$16 sps:$4 sm:$0xff]   ;;  %v9028_v23 = vld [vmem:[#allocation11 + $0x4c] ss:$16 sps:$4 sm:$0xff]  }
 0x63c   :  { %v5996_v37 = vcombine.low %v9174_v25, %v9178_v57  ;;  %v9025_v25 = vld [vmem:[#allocation11 + $0x44] ss:$16 sps:$4 sm:$0xff]   ;;  %v9023_v57 = vld [vmem:[#allocation11 + $0x40] ss:$16 sps:$4 sm:$0xff]  }
 0x63d   :  { %v6003_v39 = vrot.slane %v5995_v3, %v9825_v11  ;;  %v9026_v3 = vld [vmem:[#allocation11 + $0x48] ss:$16 sps:$4 sm:$0xff]  }
 0x63e   :  { %v6010_v13 = vrot.slane %v5996_v37, %v9825_v11  ;;  %v9031_v37 = vld [vmem:[#allocation11 + $0x64] ss:$16 sps:$4 sm:$0xff]  }
 0x640   :  { %v6011_v59 = vcombine.low %v6003_v39, %v6010_v13  ;;  %v9034_v39 = vld [vmem:[#allocation11 + $0x6c] ss:$16 sps:$4 sm:$0xff]   ;;  %v9029_v13 = vld [vmem:[#allocation11 + $0x60] ss:$16 sps:$4 sm:$0xff]  }
 0x642   :  { %v6018_v40 = vrot.slane %v6011_v59, %v9825_v11  ;;  %v9032_v59 = vld [vmem:[#allocation11 + $0x68] ss:$16 sps:$4 sm:$0xff]  }
 0x644   :  { %v6020_v33 = vmul.f32 %v6018_v40, %v5443_v58  ;;  %v9037_v58 = vld [vmem:[#allocation11 + $0x84] ss:$16 sps:$4 sm:$0xff]   ;;  %v9040_v40 = vld [vmem:[#allocation11 + $0x8c] ss:$16 sps:$4 sm:$0xff]  }
 0x646   :  { %v6025_v49 = vrot.slane %v6020_v33, %v9881_v50  ;;  %v6029_v43 = vrot.slane %v6020_v33, %v9884_v55  ;;  %v6033_v32 = vrot.slane %v6020_v33, %v9887_v51  ;;  %v6037_v45 = vrot.slane %v6020_v33, %v9890_v60  ;;  %v9035_v33 = vld [vmem:[#allocation11 + $0x80] ss:$16 sps:$4 sm:$0xff]  }
 0x648   :  { %v6042_v28 = vmul.f32 %v6025_v49, %v5935_v47  ;;  %v6043_v19 = vmul.f32 %v6029_v43, %v5936_v63  ;;  %v6044_v20 = vmul.f32 %v6033_v32, %v5937_v24  ;;  %v6045_v36 = vmul.f32 %v6037_v45, %v5938_v17 }
 0x649   :  { %v6078_v34 = vmul.f32 %v6033_v32, %v9973_v14  ;;  %v6079_v38 = vmul.f32 %v6037_v45, %v9983_v0  ;;  %v6077_v15 = vmul.f32 %v6029_v43, %v9981_v62  ;;  %v6076_v21 = vmul.f32 %v6025_v49, %v9971_v44  ;;  %v9038_v49 = vld [vmem:[#allocation11 + $0x88] ss:$16 sps:$4 sm:$0xff]   ;;  %v9043_v43 = vld [vmem:[#allocation11 + $0xa4] ss:$16 sps:$4 sm:$0xff]   ;;  %v9046_v32 = vld [vmem:[#allocation11 + $0xac] ss:$16 sps:$4 sm:$0xff]  }
 0x64a   :  { %v6050_v12 = vcombine.low %v6042_v28, %v6043_v19  ;;  %v6051_v41 = vcombine.low %v6044_v20, %v6045_v36  ;;  %v9041_v45 = vld [vmem:[#allocation11 + $0xa0] ss:$16 sps:$4 sm:$0xff]   ;;  %v9044_v28 = vld [vmem:[#allocation11 + $0xa8] ss:$16 sps:$4 sm:$0xff]   ;;  %v9049_v19 = vld [vmem:[#allocation11 + $0xc4] ss:$16 sps:$4 sm:$0xff]  }
 0x64b   :  { %v9052_v20 = vld [vmem:[#allocation11 + $0xcc] ss:$16 sps:$4 sm:$0xff]   ;;  %v9047_v36 = vld [vmem:[#allocation11 + $0xc0] ss:$16 sps:$4 sm:$0xff]  }
 0x64c   :  { %v6058_v54 = vrot.slane %v6050_v12, %v9825_v11  ;;  %v6065_v27 = vrot.slane %v6051_v41, %v9825_v11  ;;  %v9056_v12 = vld [vmem:[#allocation11 + $0xe8] ss:$16 sps:$4 sm:$0xff]   ;;  %v9061_v41 = vld [vmem:[#allocation11 + $0x104] ss:$16 sps:$4 sm:$0xff]  }
 0x64e   :  { %v6066_v53 = vcombine.low %v6058_v54, %v6065_v27  ;;  %v9064_v54 = vld [vmem:[#allocation11 + $0x10c] ss:$16 sps:$4 sm:$0xff]   ;;  %v9059_v27 = vld [vmem:[#allocation11 + $0x100] ss:$16 sps:$4 sm:$0xff]  }
 0x650   :  { %v6073_v47 = vrot.slane %v6066_v53, %v9825_v11  ;;  %v9062_v53 = vld [vmem:[#allocation11 + $0x108] ss:$16 sps:$4 sm:$0xff]  }
 0x652   :  { %v6075_v24 = vsub.f32 %v5444_v18, %v6073_v47  ;;  %v9067_v18 = vld [vmem:[#allocation11 + $0x124] ss:$16 sps:$4 sm:$0xff]   ;;  %v9070_v47 = vld [vmem:[#allocation11 + $0x12c] ss:$16 sps:$4 sm:$0xff]  }
 0x654   :  { %v6092_v63 = vrot.slane %v6075_v24, %v9887_v51  ;;  %v6096_v14 = vrot.slane %v6075_v24, %v9890_v60  ;;  %v6088_v0 = vrot.slane %v6075_v24, %v9884_v55  ;;  %v6084_v62 = vrot.slane %v6075_v24, %v9881_v50  ;;  %v9065_v24 = vld [vmem:[#allocation11 + $0x120] ss:$16 sps:$4 sm:$0xff]  }
 0x656   :  { %v6103_v44 = vadd.f32 %v6092_v63, %v6078_v34  ;;  %v6104_v17 = vadd.f32 %v6096_v14, %v6079_v38  ;;  %v6102_v26 = vadd.f32 %v6088_v0, %v6077_v15  ;;  %v6101_v7 = vadd.f32 %v6084_v62, %v6076_v21  ;;  %v9050_v34 = vld [vmem:[#allocation11 + $0xc8] ss:$16 sps:$4 sm:$0xff]   ;;  %v9055_v38 = vld [vmem:[#allocation11 + $0xe4] ss:$16 sps:$4 sm:$0xff]   ;;  %v9058_v15 = vld [vmem:[#allocation11 + $0xec] ss:$16 sps:$4 sm:$0xff]  }
 0x657   :  { %v9053_v21 = vld [vmem:[#allocation11 + $0xe0] ss:$16 sps:$4 sm:$0xff]   ;;  %v9068_v63 = vld [vmem:[#allocation11 + $0x128] ss:$16 sps:$4 sm:$0xff]   ;;  %v9073_v14 = vld [vmem:[#allocation11 + $0x144] ss:$16 sps:$4 sm:$0xff]  }
 0x658   :  { %v8382_v9 = vmul.f32 -1.442695, %v6103_v44  ;;  %v8383_v4 = vmul.f32 -1.442695, %v6104_v17  ;;  %v9076_v0 = vld [vmem:[#allocation11 + $0x14c] ss:$16 sps:$4 sm:$0xff]  }
 0x659   :  { %v9071_v62 = vld [vmem:[#allocation11 + $0x140] ss:$16 sps:$4 sm:$0xff]   ;;  %v9074_v44 = vld [vmem:[#allocation11 + $0x148] ss:$16 sps:$4 sm:$0xff]   ;;  %v9079_v17 = vld [vmem:[#allocation11 + $0x164] ss:$16 sps:$4 sm:$0xff]  }
 0x65a   :  { %9179 = vpow2.f32 %v8382_v9  ;;  %v9080_v9 = vld [vmem:[#allocation11 + $0x168] ss:$16 sps:$4 sm:$0xff]  }
 0x65b   :  { %9181 = vpow2.f32 %v8383_v4  ;;  %v9085_v4 = vld [vmem:[#allocation11 + $0x184] ss:$16 sps:$4 sm:$0xff]  }
 0x664   :  { %v9180_v5 = vpop.eup %9179 }
 0x665   :  { %v9182_v29 = vpop.eup %9181  ;;  %v6111_v22 = vadd.f32 1.0, %v9180_v5  ;;  %v9088_v5 = vld [vmem:[#allocation11 + $0x18c] ss:$16 sps:$4 sm:$0xff]  }
 0x666   :  { %v6112_v46 = vadd.f32 1.0, %v9182_v29  ;;  %v9083_v29 = vld [vmem:[#allocation11 + $0x180] ss:$16 sps:$4 sm:$0xff]  }
 0x667   :  { %9183 = vrcp.f32 %v6111_v22  ;;  %v9086_v22 = vld [vmem:[#allocation11 + $0x188] ss:$16 sps:$4 sm:$0xff]  }
 0x668   :  { %9185 = vrcp.f32 %v6112_v46  ;;  %v9091_v46 = vld [vmem:[#allocation11 + $0x1a4] ss:$16 sps:$4 sm:$0xff]  }
 0x671   :  { %v9184_v6 = vpop.eup %9183 }
 0x672   :  { %v9186_v30 = vpop.eup %9185  ;;  %v6117_v35 = vmul.f32 %v9184_v6, %v6101_v7  ;;  %v9077_v7 = vld [vmem:[#allocation11 + $0x160] ss:$16 sps:$4 sm:$0xff]  }
 0x673   :  { %v6118_v48 = vmul.f32 %v9186_v30, %v6102_v26  ;;  %v9082_v26 = vld [vmem:[#allocation11 + $0x16c] ss:$16 sps:$4 sm:$0xff]   ;;  %v9089_v6 = vld [vmem:[#allocation11 + $0x1a0] ss:$16 sps:$4 sm:$0xff]   ;;  %v9092_v30 = vld [vmem:[#allocation11 + $0x1a8] ss:$16 sps:$4 sm:$0xff]  }
 0x674   :  { %v6119_v8 = vpack.c.bf16 %v6117_v35, %v6117_v35  ;;  %v9094_v35 = vld [vmem:[#allocation11 + $0x1ac] ss:$16 sps:$4 sm:$0xff]  }
 0x675   :  { %v6120_v10 = vpack.c.bf16 %v6118_v48, %v6118_v48  ;;  %v9097_v48 = vld [vmem:[#allocation11 + $0x1c4] ss:$16 sps:$4 sm:$0xff]  }
 0x677   :  { %6539 = vmatprep.mubr.bf16.mxu0 %v6120_v10  ;;  %6580 = vmatprep.mubr.bf16.mxu1 %v6120_v10  ;;  %v9095_v10 = vld [vmem:[#allocation11 + $0x1c0] ss:$16 sps:$4 sm:$0xff]  }
 0x678   :  { %6540 = vmatmul.mubr.bf16.vlgmr.msra.gmra.mrb[16].mxu0 %v6119_v8  ;;  %6581 = vmatmul.mubr.bf16.vlgmr.msra.gmra.mrb[16].mxu1 %v6119_v8  ;;  %v9100_v8 = vld [vmem:[#allocation11 + $0x1cc] ss:$16 sps:$4 sm:$0xff]  }
 0x679   :  { %7186 = vmatpush1.bf16.msra.mxu0 %v9011_v42  ;;  %7227 = vmatpush1.bf16.msra.mxu1 %v9014_v1  ;;  %v9106_v42 = vld [vmem:[#allocation11 + $0x1ec] ss:$16 sps:$4 sm:$0xff]   ;;  %v9101_v1 = vld [vmem:[#allocation11 + $0x1e0] ss:$16 sps:$4 sm:$0xff]  }
 0x67a   :  { %7187 = vmatprep.subr.bf16.mxu0 %v9019_v2  ;;  %7228 = vmatprep.subr.bf16.mxu1 %v9022_v31  ;;  %v9104_v2 = vld [vmem:[#allocation11 + $0x1e8] ss:$16 sps:$4 sm:$0xff]  }
 0x67d   :  { %7188 = vmatpush1.bf16.msra.mxu0 %v9017_v16  ;;  %7229 = vmatpush1.bf16.msra.mxu1 %v9020_v56 }
 0x67e   :  { %7189 = vmatprep.subr.bf16.mxu0 %v9025_v25  ;;  %7230 = vmatprep.subr.bf16.mxu1 %v9028_v23 }
 0x681   :  { %7190 = vmatpush1.bf16.msra.mxu0 %v9023_v57  ;;  %7231 = vmatpush1.bf16.msra.mxu1 %v9026_v3 }
 0x682   :  { %7191 = vmatprep.subr.bf16.mxu0 %v9031_v37  ;;  %7232 = vmatprep.subr.bf16.mxu1 %v9034_v39 }
 0x685   :  { %7192 = vmatpush1.bf16.msra.mxu0 %v9029_v13  ;;  %7233 = vmatpush1.bf16.msra.mxu1 %v9032_v59 }
 0x686   :  { %7193 = vmatprep.subr.bf16.mxu0 %v9037_v58  ;;  %7234 = vmatprep.subr.bf16.mxu1 %v9040_v40 }
 0x689   :  { %7194 = vmatpush1.bf16.msra.mxu0 %v9035_v33  ;;  %7235 = vmatpush1.bf16.msra.mxu1 %v9038_v49 }
 0x68a   :  { %7195 = vmatprep.subr.bf16.mxu0 %v9043_v43  ;;  %7236 = vmatprep.subr.bf16.mxu1 %v9046_v32 }
 0x68d   :  { %7196 = vmatpush1.bf16.msra.mxu0 %v9041_v45  ;;  %7237 = vmatpush1.bf16.msra.mxu1 %v9044_v28 }
 0x68e   :  { %7197 = vmatprep.subr.bf16.mxu0 %v9049_v19  ;;  %7238 = vmatprep.subr.bf16.mxu1 %v9052_v20 }
 0x691   :  { %7198 = vmatpush1.bf16.msra.mxu0 %v9047_v36  ;;  %7239 = vmatpush1.bf16.msra.mxu1 %v9050_v34 }
 0x692   :  { %7199 = vmatprep.subr.bf16.mxu0 %v9055_v38  ;;  %7240 = vmatprep.subr.bf16.mxu1 %v9058_v15 }
 0x695   :  { %7200 = vmatpush1.bf16.msra.mxu0 %v9053_v21  ;;  %7241 = vmatpush1.bf16.msra.mxu1 %v9056_v12 }
 0x696   :  { %7201 = vmatprep.subr.bf16.mxu0 %v9061_v41  ;;  %7242 = vmatprep.subr.bf16.mxu1 %v9064_v54 }
 0x699   :  { %7202 = vmatpush1.bf16.msra.mxu0 %v9059_v27  ;;  %7243 = vmatpush1.bf16.msra.mxu1 %v9062_v53 }
 0x69a   :  { %7203 = vmatprep.subr.bf16.mxu0 %v9067_v18  ;;  %7244 = vmatprep.subr.bf16.mxu1 %v9070_v47 }
 0x69d   :  { %7204 = vmatpush1.bf16.msra.mxu0 %v9065_v24  ;;  %7245 = vmatpush1.bf16.msra.mxu1 %v9068_v63 }
 0x69e   :  { %7205 = vmatprep.subr.bf16.mxu0 %v9073_v14  ;;  %7246 = vmatprep.subr.bf16.mxu1 %v9076_v0 }
 0x6a1   :  { %7206 = vmatpush1.bf16.msra.mxu0 %v9071_v62  ;;  %7247 = vmatpush1.bf16.msra.mxu1 %v9074_v44 }
 0x6a2   :  { %7207 = vmatprep.subr.bf16.mxu0 %v9079_v17  ;;  %7248 = vmatprep.subr.bf16.mxu1 %v9082_v26 }
 0x6a5   :  { %7208 = vmatpush1.bf16.msra.mxu0 %v9077_v7  ;;  %7249 = vmatpush1.bf16.msra.mxu1 %v9080_v9 }
 0x6a6   :  { %7209 = vmatprep.subr.bf16.mxu0 %v9085_v4  ;;  %7250 = vmatprep.subr.bf16.mxu1 %v9088_v5 }
 0x6a9   :  { %7210 = vmatpush1.bf16.msra.mxu0 %v9083_v29  ;;  %7251 = vmatpush1.bf16.msra.mxu1 %v9086_v22 }
 0x6aa   :  { %7211 = vmatprep.subr.bf16.mxu0 %v9091_v46  ;;  %7252 = vmatprep.subr.bf16.mxu1 %v9094_v35 }
 0x6ad   :  { %7212 = vmatpush1.bf16.msra.mxu0 %v9089_v6  ;;  %7253 = vmatpush1.bf16.msra.mxu1 %v9092_v30 }
 0x6ae   :  { %7213 = vmatprep.subr.bf16.mxu0 %v9097_v48  ;;  %7254 = vmatprep.subr.bf16.mxu1 %v9100_v8 }
 0x6b1   :  { %7214 = vmatpush1.bf16.msra.mxu0 %v9095_v10  ;;  %7255 = vmatpush1.bf16.msra.mxu1 %v9098_v52 }
 0x6b2   :  { %7215 = vmatprep.subr.bf16.mxu0 %v9103_v61  ;;  %7256 = vmatprep.subr.bf16.mxu1 %v9106_v42 }
 0x6b5   :  { %7216 = vmatpush1.bf16.msra.mxu0 %v9101_v1  ;;  %7257 = vmatpush1.bf16.msra.mxu1 %v9104_v2 }
 0x74b   :  { %v10013_v31 = vpop.f32.mrb[16].mxu0  ;;  %v10015_v16 = vpop.f32.mrb[16].mxu1 }
 0x74c   :  { %v6589_v56 = vrot.slane %v10013_v31, 4  ;;  %v6617_v25 = vmul.f32 %v10013_v31, %v10013_v31  ;;  %v6601_v23 = vrot.slane %v10015_v16, 4  ;;  %v6619_v57 = vmul.f32 %v10015_v16, %v10015_v16  ;;  %v10023_v3 = vpop.f32.mrb[17].mxu0  ;;  %v10025_v37 = vpop.f32.mrb[17].mxu1 }
 0x74d   :  { %v6595_v39 = vrot.slane %v10023_v3, 4  ;;  %v6618_v13 = vmul.f32 %v10023_v3, %v10023_v3  ;;  %v6607_v59 = vrot.slane %v10025_v37, 4  ;;  %v6620_v58 = vmul.f32 %v10025_v37, %v10025_v37  ;;  %v6545_v40 = vpop.f32.mrb[18].mxu0  ;;  %v6586_v33 = vpop.f32.mrb[18].mxu1 }
 0x74e   :  { %v6590_v49 = vadd.f32 %v6589_v56, %v10013_v31  ;;  %v6621_v43 = vrot.slane %v6617_v25, 4  ;;  %v6602_v32 = vadd.f32 %v6601_v23, %v10015_v16  ;;  %v6633_v45 = vrot.slane %v6619_v57, 4  ;;  %v6546_v28 = vpop.f32.mrb[19].mxu0  ;;  %v6587_v19 = vpop.f32.mrb[19].mxu1 }
 0x74f   :  { %v6596_v20 = vadd.f32 %v6595_v39, %v10023_v3  ;;  %v6627_v36 = vrot.slane %v6618_v13, 4  ;;  %v6608_v34 = vadd.f32 %v6607_v59, %v10025_v37  ;;  %v6639_v38 = vrot.slane %v6620_v58, 4 }
 0x750   :  { %v6591_v15 = vrot.slane %v6590_v49, 2  ;;  %v6622_v21 = vadd.f32 %v6621_v43, %v6617_v25  ;;  %v6603_v12 = vrot.slane %v6602_v32, 2  ;;  %v6634_v41 = vadd.f32 %v6633_v45, %v6619_v57 }
 0x751   :  { %v6597_v54 = vrot.slane %v6596_v20, 2  ;;  %v6628_v27 = vadd.f32 %v6627_v36, %v6618_v13  ;;  %v6609_v53 = vrot.slane %v6608_v34, 2  ;;  %v6640_v18 = vadd.f32 %v6639_v38, %v6620_v58 }
 0x752   :  { %v6592_v47 = vadd.f32 %v6591_v15, %v6590_v49  ;;  %v6623_v24 = vrot.slane %v6622_v21, 2  ;;  %v6604_v63 = vadd.f32 %v6603_v12, %v6602_v32  ;;  %v6635_v14 = vrot.slane %v6634_v41, 2 }
 0x753   :  { %v6598_v0 = vadd.f32 %v6597_v54, %v6596_v20  ;;  %v6629_v62 = vrot.slane %v6628_v27, 2  ;;  %v6610_v44 = vadd.f32 %v6609_v53, %v6608_v34  ;;  %v6641_v17 = vrot.slane %v6640_v18, 2 }
 0x754   :  { %v6593_v26 = vrot.slane %v6592_v47, 1  ;;  %v6624_v7 = vadd.f32 %v6623_v24, %v6622_v21  ;;  %v6605_v9 = vrot.slane %v6604_v63, 1  ;;  %v6636_v4 = vadd.f32 %v6635_v14, %v6634_v41 }
 0x755   :  { %v6599_v5 = vrot.slane %v6598_v0, 1  ;;  %v6630_v29 = vadd.f32 %v6629_v62, %v6628_v27  ;;  %v6611_v22 = vrot.slane %v6610_v44, 1  ;;  %v6642_v46 = vadd.f32 %v6641_v17, %v6640_v18 }
 0x756   :  { %v6594_v6 = vadd.f32 %v6593_v26, %v6592_v47  ;;  %v6625_v30 = vrot.slane %v6624_v7, 1  ;;  %v6606_v35 = vadd.f32 %v6605_v9, %v6604_v63  ;;  %v6637_v48 = vrot.slane %v6636_v4, 1 }
 0x757   :  { %v6600_v8 = vadd.f32 %v6599_v5, %v6598_v0  ;;  %v6631_v10 = vrot.slane %v6630_v29, 1  ;;  %v6612_v52 = vadd.f32 %v6611_v22, %v6610_v44  ;;  %v6643_v61 = vrot.slane %v6642_v46, 1  ;;  %v6121_v44 = vld [vmem:[#allocation14 + $0x10] sm:$0xf] }
 0x758   :  { %v6613_v42 = vmul.f32 0.125, %v6594_v6  ;;  %v6626_v1 = vadd.f32 %v6625_v30, %v6624_v7  ;;  %v6615_v2 = vmul.f32 0.125, %v6606_v35  ;;  %v6638_v56 = vadd.f32 %v6637_v48, %v6636_v4 }
 0x759   :  { %v6614_v25 = vmul.f32 0.125, %v6600_v8  ;;  %v6632_v23 = vadd.f32 %v6631_v10, %v6630_v29  ;;  %v6616_v57 = vmul.f32 0.125, %v6612_v52  ;;  %v6644_v39 = vadd.f32 %v6643_v61, %v6642_v46 }
 0x75a   :  { %v6645_v13 = vmul.f32 0.125, %v6626_v1  ;;  %v6649_v59 = vmul.f32 %v6613_v42, %v6613_v42  ;;  %v6647_v58 = vmul.f32 0.125, %v6638_v56  ;;  %v6651_v40 = vmul.f32 %v6615_v2, %v6615_v2 }
 0x75b   :  { %v6646_v33 = vmul.f32 0.125, %v6632_v23  ;;  %v6650_v49 = vmul.f32 %v6614_v25, %v6614_v25  ;;  %v6648_v43 = vmul.f32 0.125, %v6644_v39  ;;  %v6652_v32 = vmul.f32 %v6616_v57, %v6616_v57  ;;  %v6122_v23 = vld [vmem:[#allocation14 + $0x28] sm:$0xf] }
 0x75c   :  { %v6653_v45 = vsub.f32 %v6645_v13, %v6649_v59  ;;  %v6655_v28 = vsub.f32 %v6647_v58, %v6651_v40 }
 0x75d   :  { %v6654_v19 = vsub.f32 %v6646_v33, %v6650_v49  ;;  %v6656_v20 = vsub.f32 %v6648_v43, %v6652_v32 }
 0x75e   :  { %v6657_v36 = vmax.f32 %v6653_v45, 0.0  ;;  %v6659_v34 = vmax.f32 %v6655_v28, 0.0 }
 0x75f   :  { %v6658_v38 = vmax.f32 %v6654_v19, 0.0  ;;  %v6660_v15 = vmax.f32 %v6656_v20, 0.0 }
 0x760   :  { %v6661_v21 = vadd.f32 1e-05, %v6657_v36  ;;  %v6663_v12 = vadd.f32 1e-05, %v6659_v34  ;;  %v9107_v34 = vld [vmem:[#allocation13 + $0x40] sm:$0xff]  }
 0x761   :  { %v6662_v41 = vadd.f32 1e-05, %v6658_v38  ;;  %v6664_v54 = vadd.f32 1e-05, %v6660_v15  ;;  %v9108_v38 = vld [vmem:[#allocation13] sm:$0xff]   ;;  %8533 = vmatprep.subr.bf16.mxu0 %v9107_v34  ;;  %v9109_v15 = vld [vmem:[#allocation13 + $0x48] sm:$0xff]  }
 0x762   :  { %9187 = vrsqrt.f32 %v6661_v21  ;;  %v9110_v21 = vld [vmem:[#allocation13 + $0x8] sm:$0xff]  }
 0x763   :  { %9189 = vrsqrt.f32 %v6663_v12  ;;  %v9111_v12 = vld [vmem:[#allocation13 + $0x50] sm:$0xff]  }
 0x764   :  { %9191 = vrsqrt.f32 %v6662_v41  ;;  %v9112_v41 = vld [vmem:[#allocation13 + $0x10] sm:$0xff]  }
 0x765   :  { %9193 = vrsqrt.f32 %v6664_v54  ;;  %v9113_v54 = vld [vmem:[#allocation13 + $0x58] sm:$0xff]  }
 0x76c   :  { %v9188_v27 = vpop.eup %9187 }
 0x76d   :  { %v9190_v53 = vpop.eup %9189 }
 0x76e   :  { %v9192_v18 = vpop.eup %9191 }
 0x76f   :  { %v9194_v47 = vpop.eup %9193  ;;  %v6673_v24 = vcombine.low %v9188_v27, %v9192_v18  ;;  %v9114_v27 = vld [vmem:[#allocation13 + $0x18] sm:$0xff]   ;;  %v9116_v18 = vld [vmem:[#allocation13 + $0x20] sm:$0xff]  }
 0x770   :  { %v6674_v63 = vcombine.low %v9190_v53, %v9194_v47  ;;  %v9115_v53 = vld [vmem:[#allocation13 + $0x60] sm:$0xff]   ;;  %v9117_v47 = vld [vmem:[#allocation13 + $0x68] sm:$0xff]  }
 0x771   :  { %v6681_v14 = vrot.slane %v6673_v24, %v9825_v11  ;;  %v9118_v24 = vld [vmem:[#allocation13 + $0x28] sm:$0xff]  }
 0x772   :  { %v6688_v0 = vrot.slane %v6674_v63, %v9825_v11  ;;  %v9119_v63 = vld [vmem:[#allocation13 + $0x70] sm:$0xff]  }
 0x774   :  { %v6689_v62 = vcombine.low %v6681_v14, %v6688_v0  ;;  %v9120_v14 = vld [vmem:[#allocation13 + $0x30] sm:$0xff]   ;;  %v9121_v0 = vld [vmem:[#allocation13 + $0x78] sm:$0xff]  }
 0x776   :  { %v6696_v17 = vrot.slane %v6689_v62, %v9825_v11  ;;  %v9122_v62 = vld [vmem:[#allocation13 + $0x38] sm:$0xff]  }
 0x778   :  { %v6698_v26 = vmul.f32 %v6696_v17, %v6121_v44 }
 0x77a   :  { %v6703_v7 = vrot.slane %v6698_v26, %v9881_v50  ;;  %v6707_v9 = vrot.slane %v6698_v26, %v9884_v55  ;;  %v6711_v4 = vrot.slane %v6698_v26, %v9887_v51  ;;  %v6715_v5 = vrot.slane %v6698_v26, %v9890_v60 }
 0x77c   :  { %v6720_v29 = vmul.f32 %v6703_v7, %v6613_v42  ;;  %v6721_v22 = vmul.f32 %v6707_v9, %v6614_v25  ;;  %v6722_v46 = vmul.f32 %v6711_v4, %v6615_v2  ;;  %v6723_v6 = vmul.f32 %v6715_v5, %v6616_v57 }
 0x77d   :  { %v6756_v30 = vmul.f32 %v6711_v4, %v10015_v16  ;;  %v6757_v35 = vmul.f32 %v6715_v5, %v10025_v37  ;;  %v6755_v48 = vmul.f32 %v6707_v9, %v10023_v3  ;;  %v6754_v8 = vmul.f32 %v6703_v7, %v10013_v31 }
 0x77e   :  { %v6728_v10 = vcombine.low %v6720_v29, %v6721_v22  ;;  %v6729_v52 = vcombine.low %v6722_v46, %v6723_v6 }
 0x780   :  { %v6736_v61 = vrot.slane %v6728_v10, %v9825_v11  ;;  %v6743_v1 = vrot.slane %v6729_v52, %v9825_v11 }
 0x782   :  { %v6744_v56 = vcombine.low %v6736_v61, %v6743_v1 }
 0x784   :  { %v6751_v42 = vrot.slane %v6744_v56, %v9825_v11 }
 0x786   :  { %v6753_v2 = vsub.f32 %v6122_v23, %v6751_v42 }
 0x788   :  { %v6770_v25 = vrot.slane %v6753_v2, %v9887_v51  ;;  %v6774_v16 = vrot.slane %v6753_v2, %v9890_v60  ;;  %v6766_v37 = vrot.slane %v6753_v2, %v9884_v55  ;;  %v6762_v3 = vrot.slane %v6753_v2, %v9881_v50 }
 0x78a   :  { %v6781_v31 = vadd.f32 %v6770_v25, %v6756_v30  ;;  %v6782_v57 = vadd.f32 %v6774_v16, %v6757_v35  ;;  %v6780_v39 = vadd.f32 %v6766_v37, %v6755_v48  ;;  %v6779_v13 = vadd.f32 %v6762_v3, %v6754_v8 }
 0x78c   :  { %v8448_v59 = vmul.f32 -1.442695, %v6781_v31  ;;  %v8449_v58 = vmul.f32 -1.442695, %v6782_v57 }
 0x78e   :  { %9195 = vpow2.f32 %v8448_v59 }
 0x78f   :  { %9197 = vpow2.f32 %v8449_v58 }
 0x798   :  { %v9196_v40 = vpop.eup %9195 }
 0x799   :  { %v9198_v33 = vpop.eup %9197  ;;  %v6789_v49 = vadd.f32 1.0, %v9196_v40 }
 0x79a   :  { %v6790_v43 = vadd.f32 1.0, %v9198_v33 }
 0x79b   :  { %9199 = vrcp.f32 %v6789_v49 }
 0x79c   :  { %9201 = vrcp.f32 %v6790_v43 }
 0x7a5   :  { %v9200_v32 = vpop.eup %9199 }
 0x7a6   :  { %v9202_v45 = vpop.eup %9201  ;;  %v6795_v28 = vmul.f32 %v9200_v32, %v6779_v13 }
 0x7a7   :  { %v6796_v19 = vmul.f32 %v9202_v45, %v6780_v39 }
 0x7a8   :  { %v6797_v20 = vpack.c.bf16 %v6795_v28, %v6795_v28 }
 0x7a9   :  { %v6798_v36 = vpack.c.bf16 %v6796_v19, %v6796_v19 }
 0x7ab   :  { %7217 = vmatprep.mubr.bf16.mxu0 %v6798_v36  ;;  %7258 = vmatprep.mubr.bf16.mxu1 %v6798_v36 }
 0x7ac   :  { %7218 = vmatmul.mubr.bf16.vlgmr.msra.gmra.mrb[20].mxu0 %v6797_v20  ;;  %7259 = vmatmul.mubr.bf16.vlgmr.msra.gmra.mrb[20].mxu1 %v6797_v20 }
 0x7ad   :  { %8534 = vmatpush3.bf16.msra.mxu0 %v9108_v38 }
 0x7ae   :  { %8535 = vmatprep.subr.bf16.mxu0 %v9109_v15 }
 0x7b1   :  { %8536 = vmatpush3.bf16.msra.mxu0 %v9110_v21 }
 0x7b2   :  { %8537 = vmatprep.subr.bf16.mxu0 %v9111_v12 }
 0x7b5   :  { %8538 = vmatpush3.bf16.msra.mxu0 %v9112_v41 }
 0x7b6   :  { %8539 = vmatprep.subr.bf16.mxu0 %v9113_v54 }
 0x7b9   :  { %8540 = vmatpush3.bf16.msra.mxu0 %v9114_v27 }
 0x7ba   :  { %8541 = vmatprep.subr.bf16.mxu0 %v9115_v53 }
 0x7bd   :  { %8542 = vmatpush3.bf16.msra.mxu0 %v9116_v18 }
 0x7be   :  { %8543 = vmatprep.subr.bf16.mxu0 %v9117_v47 }
 0x7c1   :  { %8544 = vmatpush3.bf16.msra.mxu0 %v9118_v24 }
 0x7c2   :  { %8545 = vmatprep.subr.bf16.mxu0 %v9119_v63 }
 0x7c5   :  { %8546 = vmatpush3.bf16.msra.mxu0 %v9120_v14 }
 0x7c6   :  { %8547 = vmatprep.subr.bf16.mxu0 %v9121_v0 }
 0x7c9   :  { %8548 = vmatpush3.bf16.msra.mxu0 %v9122_v62 }
 0x87f   :  { %v10055_v44 = vpop.f32.mrb[20].mxu0  ;;  %v10057_v17 = vpop.f32.mrb[20].mxu1 }
 0x880   :  { %v7267_v26 = vrot.slane %v10055_v44, 4  ;;  %v7295_v7 = vmul.f32 %v10055_v44, %v10055_v44  ;;  %v7279_v9 = vrot.slane %v10057_v17, 4  ;;  %v7297_v4 = vmul.f32 %v10057_v17, %v10057_v17  ;;  %v10065_v5 = vpop.f32.mrb[21].mxu0  ;;  %v10067_v29 = vpop.f32.mrb[21].mxu1 }
 0x881   :  { %v7273_v22 = vrot.slane %v10065_v5, 4  ;;  %v7296_v46 = vmul.f32 %v10065_v5, %v10065_v5  ;;  %v7285_v6 = vrot.slane %v10067_v29, 4  ;;  %v7298_v30 = vmul.f32 %v10067_v29, %v10067_v29  ;;  %v7223_v35 = vpop.f32.mrb[22].mxu0  ;;  %v7264_v48 = vpop.f32.mrb[22].mxu1 }
 0x882   :  { %v7268_v8 = vadd.f32 %v7267_v26, %v10055_v44  ;;  %v7299_v10 = vrot.slane %v7295_v7, 4  ;;  %v7280_v52 = vadd.f32 %v7279_v9, %v10057_v17  ;;  %v7311_v61 = vrot.slane %v7297_v4, 4  ;;  %v7224_v1 = vpop.f32.mrb[23].mxu0  ;;  %v7265_v56 = vpop.f32.mrb[23].mxu1 }
 0x883   :  { %v7274_v23 = vadd.f32 %v7273_v22, %v10065_v5  ;;  %v7305_v42 = vrot.slane %v7296_v46, 4  ;;  %v7286_v2 = vadd.f32 %v7285_v6, %v10067_v29  ;;  %v7317_v25 = vrot.slane %v7298_v30, 4 }
 0x884   :  { %v7269_v16 = vrot.slane %v7268_v8, 2  ;;  %v7300_v37 = vadd.f32 %v7299_v10, %v7295_v7  ;;  %v7281_v3 = vrot.slane %v7280_v52, 2  ;;  %v7312_v31 = vadd.f32 %v7311_v61, %v7297_v4 }
 0x885   :  { %v7275_v57 = vrot.slane %v7274_v23, 2  ;;  %v7306_v39 = vadd.f32 %v7305_v42, %v7296_v46  ;;  %v7287_v13 = vrot.slane %v7286_v2, 2  ;;  %v7318_v59 = vadd.f32 %v7317_v25, %v7298_v30 }
 0x886   :  { %v7270_v58 = vadd.f32 %v7269_v16, %v7268_v8  ;;  %v7301_v40 = vrot.slane %v7300_v37, 2  ;;  %v7282_v33 = vadd.f32 %v7281_v3, %v7280_v52  ;;  %v7313_v49 = vrot.slane %v7312_v31, 2 }
 0x887   :  { %v7276_v43 = vadd.f32 %v7275_v57, %v7274_v23  ;;  %v7307_v32 = vrot.slane %v7306_v39, 2  ;;  %v7288_v45 = vadd.f32 %v7287_v13, %v7286_v2  ;;  %v7319_v28 = vrot.slane %v7318_v59, 2 }
 0x888   :  { %v7271_v19 = vrot.slane %v7270_v58, 1  ;;  %v7302_v20 = vadd.f32 %v7301_v40, %v7300_v37  ;;  %v7283_v36 = vrot.slane %v7282_v33, 1  ;;  %v7314_v34 = vadd.f32 %v7313_v49, %v7312_v31 }
 0x889   :  { %v7277_v38 = vrot.slane %v7276_v43, 1  ;;  %v7308_v15 = vadd.f32 %v7307_v32, %v7306_v39  ;;  %v7289_v21 = vrot.slane %v7288_v45, 1  ;;  %v7320_v12 = vadd.f32 %v7319_v28, %v7318_v59 }
 0x88a   :  { %v7272_v41 = vadd.f32 %v7271_v19, %v7270_v58  ;;  %v7303_v54 = vrot.slane %v7302_v20, 1  ;;  %v7284_v27 = vadd.f32 %v7283_v36, %v7282_v33  ;;  %v7315_v53 = vrot.slane %v7314_v34, 1 }
 0x88b   :  { %v7278_v18 = vadd.f32 %v7277_v38, %v7276_v43  ;;  %v7309_v47 = vrot.slane %v7308_v15, 1  ;;  %v7290_v24 = vadd.f32 %v7289_v21, %v7288_v45  ;;  %v7321_v63 = vrot.slane %v7320_v12, 1  ;;  %v6799_v45 = vld [vmem:[#allocation14 + $0x14] sm:$0xf] }
 0x88c   :  { %v7291_v14 = vmul.f32 0.125, %v7272_v41  ;;  %v7304_v0 = vadd.f32 %v7303_v54, %v7302_v20  ;;  %v7293_v62 = vmul.f32 0.125, %v7284_v27  ;;  %v7316_v26 = vadd.f32 %v7315_v53, %v7314_v34 }
 0x88d   :  { %v7292_v7 = vmul.f32 0.125, %v7278_v18  ;;  %v7310_v9 = vadd.f32 %v7309_v47, %v7308_v15  ;;  %v7294_v4 = vmul.f32 0.125, %v7290_v24  ;;  %v7322_v22 = vadd.f32 %v7321_v63, %v7320_v12 }
 0x88e   :  { %v7323_v46 = vmul.f32 0.125, %v7304_v0  ;;  %v7327_v6 = vmul.f32 %v7291_v14, %v7291_v14  ;;  %v7325_v30 = vmul.f32 0.125, %v7316_v26  ;;  %v7329_v35 = vmul.f32 %v7293_v62, %v7293_v62 }
 0x88f   :  { %v7324_v48 = vmul.f32 0.125, %v7310_v9  ;;  %v7328_v8 = vmul.f32 %v7292_v7, %v7292_v7  ;;  %v7326_v10 = vmul.f32 0.125, %v7322_v22  ;;  %v7330_v52 = vmul.f32 %v7294_v4, %v7294_v4  ;;  %v6800_v9 = vld [vmem:[#allocation14 + $0x2c] sm:$0xf] }
 0x890   :  { %v7331_v61 = vsub.f32 %v7323_v46, %v7327_v6  ;;  %v7333_v1 = vsub.f32 %v7325_v30, %v7329_v35 }
 0x891   :  { %v7332_v56 = vsub.f32 %v7324_v48, %v7328_v8  ;;  %v7334_v23 = vsub.f32 %v7326_v10, %v7330_v52 }
 0x892   :  { %v7335_v42 = vmax.f32 %v7331_v61, 0.0  ;;  %v7337_v2 = vmax.f32 %v7333_v1, 0.0  ;;  %v8516_v1 = vld [vmem:[#allocation14 + $0x30] ss:$0 sm:$0xff] }
 0x893   :  { %v7336_v25 = vmax.f32 %v7332_v56, 0.0  ;;  %v7338_v16 = vmax.f32 %v7334_v23, 0.0 }
 0x894   :  { %v7339_v37 = vadd.f32 1e-05, %v7335_v42  ;;  %v7341_v3 = vadd.f32 1e-05, %v7337_v2 }
 0x895   :  { %v7340_v31 = vadd.f32 1e-05, %v7336_v25  ;;  %v7342_v57 = vadd.f32 1e-05, %v7338_v16 }
 0x896   :  { %9203 = vrsqrt.f32 %v7339_v37 }
 0x897   :  { %9205 = vrsqrt.f32 %v7341_v3 }
 0x898   :  { %9207 = vrsqrt.f32 %v7340_v31 }
 0x899   :  { %9209 = vrsqrt.f32 %v7342_v57 }
 0x8a0   :  { %v9204_v39 = vpop.eup %9203 }
 0x8a1   :  { %v9206_v13 = vpop.eup %9205 }
 0x8a2   :  { %v9208_v59 = vpop.eup %9207 }
 0x8a3   :  { %v9210_v58 = vpop.eup %9209  ;;  %v7351_v40 = vcombine.low %v9204_v39, %v9208_v59 }
 0x8a4   :  { %v7352_v33 = vcombine.low %v9206_v13, %v9210_v58 }
 0x8a5   :  { %v7359_v49 = vrot.slane %v7351_v40, %v9825_v11 }
 0x8a6   :  { %v7366_v43 = vrot.slane %v7352_v33, %v9825_v11 }
 0x8a8   :  { %v7367_v32 = vcombine.low %v7359_v49, %v7366_v43 }
 0x8aa   :  { %v7374_v28 = vrot.slane %v7367_v32, %v9825_v11 }
 0x8ac   :  { %v7376_v19 = vmul.f32 %v7374_v28, %v6799_v45 }
 0x8ae   :  { %v7381_v20 = vrot.slane %v7376_v19, %v9881_v50  ;;  %v7385_v36 = vrot.slane %v7376_v19, %v9884_v55  ;;  %v7389_v34 = vrot.slane %v7376_v19, %v9887_v51  ;;  %v7393_v38 = vrot.slane %v7376_v19, %v9890_v60 }
 0x8b0   :  { %v7398_v15 = vmul.f32 %v7381_v20, %v7291_v14  ;;  %v7399_v21 = vmul.f32 %v7385_v36, %v7292_v7  ;;  %v7400_v12 = vmul.f32 %v7389_v34, %v7293_v62  ;;  %v7401_v41 = vmul.f32 %v7393_v38, %v7294_v4 }
 0x8b1   :  { %v7434_v54 = vmul.f32 %v7389_v34, %v10057_v17  ;;  %v7435_v27 = vmul.f32 %v7393_v38, %v10067_v29  ;;  %v7433_v53 = vmul.f32 %v7385_v36, %v10065_v5  ;;  %v7432_v18 = vmul.f32 %v7381_v20, %v10055_v44 }
 0x8b2   :  { %v7406_v47 = vcombine.low %v7398_v15, %v7399_v21  ;;  %v7407_v24 = vcombine.low %v7400_v12, %v7401_v41 }
 0x8b4   :  { %v7414_v63 = vrot.slane %v7406_v47, %v9825_v11  ;;  %v7421_v0 = vrot.slane %v7407_v24, %v9825_v11 }
 0x8b6   :  { %v7422_v26 = vcombine.low %v7414_v63, %v7421_v0 }
 0x8b8   :  { %v7429_v14 = vrot.slane %v7422_v26, %v9825_v11 }
 0x8ba   :  { %v7431_v62 = vsub.f32 %v6800_v9, %v7429_v14 }
 0x8bc   :  { %v7448_v7 = vrot.slane %v7431_v62, %v9887_v51  ;;  %v7452_v17 = vrot.slane %v7431_v62, %v9890_v60  ;;  %v7444_v29 = vrot.slane %v7431_v62, %v9884_v55  ;;  %v7440_v5 = vrot.slane %v7431_v62, %v9881_v50 }
 0x8be   :  { %v7459_v44 = vadd.f32 %v7448_v7, %v7434_v54  ;;  %v7460_v4 = vadd.f32 %v7452_v17, %v7435_v27  ;;  %v7458_v22 = vadd.f32 %v7444_v29, %v7433_v53  ;;  %v7457_v46 = vadd.f32 %v7440_v5, %v7432_v18 }
 0x8c0   :  { %v8514_v6 = vmul.f32 -1.442695, %v7459_v44  ;;  %v8515_v30 = vmul.f32 -1.442695, %v7460_v4 }
 0x8c2   :  { %9211 = vpow2.f32 %v8514_v6 }
 0x8c3   :  { %9213 = vpow2.f32 %v8515_v30 }
 0x8cc   :  { %v9212_v35 = vpop.eup %9211 }
 0x8cd   :  { %v9214_v48 = vpop.eup %9213  ;;  %v7467_v11 = vadd.f32 1.0, %v9212_v35 }
 0x8ce   :  { %v7468_v8 = vadd.f32 1.0, %v9214_v48 }
 0x8cf   :  { %9215 = vrcp.f32 %v7467_v11 }
 0x8d0   :  { %9217 = vrcp.f32 %v7468_v8 }
 0x8d9   :  { %v9216_v51 = vpop.eup %9215 }
 0x8da   :  { %v9218_v60 = vpop.eup %9217  ;;  %v7473_v10 = vmul.f32 %v9216_v51, %v7457_v46 }
 0x8db   :  { %v7474_v55 = vmul.f32 %v9218_v60, %v7458_v22 }
 0x8dc   :  { %v7475_v52 = vpack.c.bf16 %v7473_v10, %v7473_v10 }
 0x8dd   :  { %v7476_v50 = vpack.c.bf16 %v7474_v55, %v7474_v55 }
 0x8df   :  { %7644 = vmatprep.mubr.bf16.mxu0 %v7476_v50 }
 0x8e0   :  { %7645 = vmatmul.mubr.bf16.vlgmr.msra.gmra.mrb[24].mxu0 %v7475_v52 }
 0x9b3   :  { %v8549_v61 = vpop.f32.mrb[24].mxu0 }
 0x9b4   :  { %v8550_v56 = vpop.f32.mrb[25].mxu0 }
 0x9b5   :  { %v8551_v23 = vadd.f32 %v8550_v56, %v8549_v61  ;;  %v8552_v42 = vpop.f32.mrb[26].mxu0 }
 0x9b6   :  { %v8553_v2 = vpop.f32.mrb[27].mxu0 }
 0x9b7   :  { %v7647_v25 = vadd.f32 %v8551_v23, %v8516_v1 }
 0x9b9   :  { %7652 = vst [vmem:[#allocation16] sm:$0xff] %v7647_v25 }
 0x9ba   :  { %9406 = shalt.err (!%p9403_p12)
}
 0x9bb   :  { %s9407_s12 = scalar_lea.hbm %s10117_s8, 128 }
 0x9bc   :  { %p9408_p13 = scmp.ne.s32.totalorder %s10117_s8, %s9407_s12  ;;  %p9411_p0 = scmp.lt.u32.totalorder %s9407_s12, %s10117_s8 }
 0x9be   :  { %p9413_p1 = pnand %p9411_p0, %p9408_p13 }
 0x9c0   :  { %9416 = shalt.err (!%p9413_p1)
}
 0x9c1   :  { %7662 = dma.vmem_to_hbm [thread:$0]  %s7660_s5, 128, %s10117_s8, [#allocation4]  }
 0x9c2   :  { %9427 = dma.done.wait [#allocation4], 128  }
 0x9c3   :  { %9428 = vsyncadd [#allocation4], 4294967168 }
 0x9c4   :  { %7666 = vsyncpa [#allocation3], 1 }
 0x9c5   :  { %7667 = vsyncpa [#allocation6], 1 }
 0x9c6   :  { %7668 = vsyncpa [#allocation9], 1 }
 0x9c7   :  { %7669 = vsyncpa [#allocation12], 1 }
 0x9c8   :  { %7670 = vsyncpa [#allocation15], 1 }
 0x9c9   :  { %7671 = vsyncpa [#allocation4], 1 }

</bundles_post_ra>
